<compile_context>
chip_gen: v6e
topology: v6e:2x2x1
jax: 0.10.0
libtpu: 0.0.40
codegen_flags: <defaults>
</compile_context>

<pallas_src>
import functools

import numpy as np
import jax
import jax.numpy as jnp
from jax import lax
from jax.experimental import pallas as pl
from jax.experimental.pallas import tpu as pltpu

VMEM_SPEC = pl.BlockSpec(memory_space=pltpu.MemorySpace.VMEM)


# ----------------------------- fused forward kernel -------------------------
def _fused_forward_kernel(
        x_ref, b1_ref, b2_ref, b3_ref, b4_ref, b5_ref, b6_ref,
        mw1_ref, ah1b_ref, mw2_ref, ah2b_ref, bn_ref,
        wb_ref, bb_ref, wf_ref, bfc_ref,
        out_ref,
        pad1, pad2, pad3, pad6,
        *, B, S, H0, H1, H2, n, slope, eps):
    f32, bf16 = jnp.float32, jnp.bfloat16

    def leaky(v):
        return jnp.where(v >= 0, v, slope * v)

    def conv(xpad_ref, band_ref, KH, Ho):
        # xpad_ref: (B, Hp, K) f32 H-padded slab; band_ref: (KH*K, Wo*Cout) bf16.
        # KW taps + W zero padding live in the band; the KH taps are folded into
        # the contraction dim by lane-concatenating shifted H windows, so the
        # whole conv is a single MXU matmul.
        xp = xpad_ref[...]
        K = xp.shape[2]
        if KH == 1:
            lhs = xp.reshape(B * Ho, K)
        else:
            lhs = jnp.concatenate(
                [xp[:, kh:kh + Ho, :] for kh in range(KH)], axis=-1
            ).reshape(B * Ho, KH * K)
        return jnp.dot(lhs.astype(bf16), band_ref[...],
                       preferred_element_type=f32)            # (B*Ho, Wo*Cout) f32

    def group_sum(st):
        # (rows, g*n) -> (rows, n): f32 tree-fold of the per-W-position lane
        # groups on the VPU (keeps BN statistics in f32, no MXU involvement).
        g = st.shape[1] // n
        while g > 1:
            if g % 2:
                head = st[:, :n] + st[:, (g - 1) * n:]
                st = jnp.concatenate([head, st[:, n:(g - 1) * n]], axis=-1)
                g -= 1
            half = g // 2
            st = st[:, :half * n] + st[:, half * n:]
            g = half
        return st

    def batchnorm(y, idx, count):
        # Train-mode BN (biased batch variance) fused on the slab.
        gamma = bn_ref[2 * idx:2 * idx + 1, :]                # (1, n)
        beta = bn_ref[2 * idx + 1:2 * idx + 2, :]
        wo = y.shape[1] // n
        inv_cnt = 1.0 / count
        s1c = group_sum(jnp.sum(y, axis=0, keepdims=True))    # (1, n)
        s2c = group_sum(jnp.sum(y * y, axis=0, keepdims=True))
        mean = s1c * inv_cnt
        var = jnp.maximum(s2c * inv_cnt - mean * mean, 0.0)
        scale_c = gamma * lax.rsqrt(var + eps)                # (1, n)
        shift_c = beta - mean * scale_c
        scale = jnp.concatenate([scale_c] * wo, axis=-1)      # (1, wo*n) exact bcast
        shift = jnp.concatenate([shift_c] * wo, axis=-1)
        return y * scale + shift

    # Zero only the H-pad border rows (interiors are fully overwritten before use).
    z = jnp.zeros((B, 1, H0), f32)
    pad1[:, 0:1, :] = z
    pad1[:, H0 + 1:H0 + 2, :] = z
    z = jnp.zeros((B, 1, H1 * n), f32)
    pad2[:, 0:1, :] = z
    pad2[:, H1 + 1:H1 + 2, :] = z
    z = jnp.zeros((B, 1, S * n), f32)
    pad3[:, 0:1, :] = z
    pad3[:, S + 1:S + 2, :] = z
    z = jnp.zeros((B, 3, S * n), f32)
    pad6[:, 0:3, :] = z
    pad6[:, S + 3:S + 6, :] = z

    x = x_ref[...]                                            # (B, H0, H0) f32

    # res1 = bilinear(x, (S,S)): separable — W matmul, then block-diag H matmul.
    xw = jnp.dot(x.reshape(B * H0, H0).astype(bf16), mw1_ref[...],
                 preferred_element_type=f32)                  # (B*H0, S)
    res1 = jnp.dot(ah1b_ref[...], xw.astype(bf16),
                   preferred_element_type=f32)                # (B*S, S)

    # block1: conv7x7(pad 1) -> lrelu -> conv1x1(pad 1) -> lrelu -> BN1
    pad1[:, 1:1 + H0, :] = x
    h = leaky(conv(pad1, b1_ref, KH=7, Ho=H1))                # (B*H1, H1*n)
    pad2[:, 1:1 + H1, :] = h.reshape(B, H1, H1 * n)
    h = leaky(conv(pad2, b2_ref, KH=1, Ho=H2))                # (B*H2, H2*n)
    h = batchnorm(h, 0, count=B * H2 * H2)

    # res2 = bilinear(block1 output, (S,S))
    hw = jnp.dot(h.astype(bf16), mw2_ref[...],
                 preferred_element_type=f32)                  # (B*H2, S*n)
    res2 = jnp.dot(ah2b_ref[...], hw.astype(bf16),
                   preferred_element_type=f32)                # (B*S, S*n)

    # block2: conv3x3 -> BN2 -> lrelu -> conv3x3 -> BN3 ; x += res2
    pad3[:, 1:1 + S, :] = res2.reshape(B, S, S * n)
    h = conv(pad3, b3_ref, KH=3, Ho=S)
    h = leaky(batchnorm(h, 1, count=B * S * S))
    pad3[:, 1:1 + S, :] = h.reshape(B, S, S * n)
    h = conv(pad3, b4_ref, KH=3, Ho=S)
    h = batchnorm(h, 2, count=B * S * S) + res2

    # block3: conv3x3 -> BN4 ; x += res2      (self.r == 1: no extra loop)
    pad3[:, 1:1 + S, :] = h.reshape(B, S, S * n)
    h = conv(pad3, b5_ref, KH=3, Ho=S)
    h = batchnorm(h, 3, count=B * S * S) + res2

    # block4: conv7x7(pad 3), n -> 1 channel ; x += res1
    pad6[:, 3:3 + S, :] = h.reshape(B, S, S * n)
    h = conv(pad6, b6_ref, KH=7, Ho=S)                        # (B*S, S)
    h = h + res1

    # flatten (B, S, S) -> (B, S*S): one lane concat, no scratch round-trip.
    h3 = h.reshape(B, S, S)
    feats = jnp.concatenate([h3[:, r, :] for r in range(S)], axis=-1)   # (B, S*S)

    # TODO(synk): timm pretrained backbone has no clean Pallas equivalent;
    # replaced by a deterministic stand-in (flatten -> linear to nb_ft features).
    feats = jnp.dot(feats.astype(bf16), wb_ref[...],
                    preferred_element_type=f32) + bb_ref[...]           # (B, nb_ft)
    logits = jnp.dot(feats.astype(bf16), wf_ref[...],
                     preferred_element_type=f32) + bfc_ref[...]         # (B, n_classes)
    out_ref[...] = logits


# ----------------------------- one-time plumbing -----------------------------
def _bilinear_matrix(in_size, out_size):
    """Resize matrix matching F.interpolate(mode='bilinear', align_corners=False)."""
    A = np.zeros((out_size, in_size), dtype=np.float32)
    scale = in_size / out_size
    for o in range(out_size):
        src = max((o + 0.5) * scale - 0.5, 0.0)
        i0 = min(int(np.floor(src)), in_size - 1)
        i1 = min(i0 + 1, in_size - 1)
        frac = src - i0
        A[o, i0] += 1.0 - frac
        A[o, i1] += frac
    return A


def _conv_band(w, w_in, pad):
    """w: (KH, KW, Cin, Cout) -> (KH*w_in*Cin, Wo*Cout) bf16 band matrix that folds
    the kw taps, the W zero-padding, AND the kh taps (along the contraction dim)
    of a stride-1 conv."""
    KH, KW, Cin, Cout = w.shape
    Wo = w_in + 2 * pad - KW + 1
    wi = np.arange(w_in)[None, :, None]
    wo = np.arange(Wo)[None, None, :]
    kw = np.arange(KW)[:, None, None]
    ind = (wi + pad - wo == kw).astype(np.float32)            # (KW, w_in, Wo)
    band = jnp.einsum('hkic,kvw->hviwc', w.astype(jnp.float32), jnp.asarray(ind))
    return band.reshape(KH * w_in * Cin, Wo * Cout).astype(jnp.bfloat16)


def init_params(key, *, n=16, in_channels=1, output_size=16, nb_ft=32, n_classes=8):
    keys = jax.random.split(key, 9)

    def conv_w(k, cout, cin, kh, kw):
        w = jax.random.normal(k, (cout, cin, kh, kw), jnp.float32) / np.sqrt(cin * kh * kw)
        return jnp.transpose(w, (2, 3, 1, 0))      # PyTorch OIHW -> (KH, KW, Cin, Cout)

    return {
        'w1': conv_w(keys[0], n, in_channels, 7, 7),
        'w2': conv_w(keys[1], n, n, 1, 1),
        'w3': conv_w(keys[2], n, n, 3, 3),
        'w4': conv_w(keys[3], n, n, 3, 3),
        'w5': conv_w(keys[4], n, n, 3, 3),
        'w6': conv_w(keys[5], 1, n, 7, 7),
        'bn1_g': jnp.ones((n,)), 'bn1_b': jnp.zeros((n,)),
        'bn2_g': jnp.ones((n,)), 'bn2_b': jnp.zeros((n,)),
        'bn3_g': jnp.ones((n,)), 'bn3_b': jnp.zeros((n,)),
        'bn4_g': jnp.ones((n,)), 'bn4_b': jnp.zeros((n,)),
        # TODO(synk): timm pretrained backbone has no clean Pallas equivalent;
        # replaced by a deterministic stand-in (flatten -> linear to nb_ft features).
        'wb': jax.random.normal(keys[6], (output_size * output_size, nb_ft), jnp.float32)
              / np.sqrt(output_size * output_size),
        'bb': jnp.zeros((nb_ft,)),
        'wf': jax.random.normal(keys[7], (nb_ft, n_classes), jnp.float32) / np.sqrt(nb_ft),
        'bf': 0.01 * jax.random.normal(keys[8], (n_classes,), jnp.float32),
    }


def prepare(params, *, input_hw=16, output_size=16, n=16, batch=2):
    """One-time layout plumbing: KH-folded conv band matrices, separable bilinear
    matrices (H-resize as block-diagonal kron(I_B, A_h)), bf16 MXU operands."""
    S = output_size
    H0 = input_hw
    H1 = H0 + 2 - 7 + 1          # after conv1: 7x7, pad 1
    H2 = H1 + 2 - 1 + 1          # after conv2: 1x1, pad 1
    f32, bf16 = jnp.float32, jnp.bfloat16

    aw1 = _bilinear_matrix(H0, S)
    ah1 = _bilinear_matrix(H0, S)
    aw2 = _bilinear_matrix(H2, S)
    ah2 = _bilinear_matrix(H2, S)
    eye_b = np.eye(batch, dtype=np.float32)
    return {
        'band1': _conv_band(params['w1'], H0, 1),
        'band2': _conv_band(params['w2'], H1, 1),
        'band3': _conv_band(params['w3'], S, 1),
        'band4': _conv_band(params['w4'], S, 1),
        'band5': _conv_band(params['w5'], S, 1),
        'band6': _conv_band(params['w6'], S, 3),
        'mw1': jnp.asarray(aw1.T, bf16),                                   # (H0, S)
        'ah1_blk': jnp.asarray(np.kron(eye_b, ah1), bf16),                 # (B*S, B*H0)
        'mw2': jnp.asarray(np.kron(aw2.T, np.eye(n, dtype=np.float32)), bf16),  # (H2*n, S*n)
        'ah2_blk': jnp.asarray(np.kron(eye_b, ah2), bf16),                 # (B*S, B*H2)
        'bn': jnp.stack([params['bn1_g'], params['bn1_b'],
                         params['bn2_g'], params['bn2_b'],
                         params['bn3_g'], params['bn3_b'],
                         params['bn4_g'], params['bn4_b']], axis=0).astype(f32),
        'wb': params['wb'].astype(bf16),
        'bb': params['bb'].reshape(1, -1).astype(f32),
        'wf': params['wf'].astype(bf16),
        'bf': params['bf'].reshape(1, -1).astype(f32),
    }


# ---------------------------------- forward ----------------------------------
def forward(ops, x_nchw, *, slope=0.1, eps=1e-5):
    """x_nchw: (B, 1, H, W) like the PyTorch module."""
    n = 16
    B = x_nchw.shape[0]
    H0 = ops['band1'].shape[0] // 7
    H1 = ops['band1'].shape[1] // n
    H2 = ops['band2'].shape[1] // n
    S = ops['band6'].shape[1]
    n_classes = ops['wf'].shape[1]
    assert ops['ah1_blk'].shape == (B * S, B * H0), 'prepare(batch=...) mismatch'

    x_slab = x_nchw[:, 0, :, :].astype(jnp.float32)          # Cin = 1 -> (B, H, W)

    kernel = functools.partial(_fused_forward_kernel, B=B, S=S, H0=H0, H1=H1,
                               H2=H2, n=n, slope=slope, eps=eps)
    inputs = (x_slab, ops['band1'], ops['band2'], ops['band3'], ops['band4'],
              ops['band5'], ops['band6'], ops['mw1'], ops['ah1_blk'],
              ops['mw2'], ops['ah2_blk'], ops['bn'],
              ops['wb'], ops['bb'], ops['wf'], ops['bf'])
    return pl.pallas_call(
        kernel,
        out_shape=jax.ShapeDtypeStruct((B, n_classes), jnp.float32),
        in_specs=[VMEM_SPEC] * len(inputs),
        out_specs=VMEM_SPEC,
        scratch_shapes=[
            pltpu.VMEM((B, H0 + 2, H0), jnp.float32),        # conv1 H-padded input
            pltpu.VMEM((B, H1 + 2, H1 * n), jnp.float32),    # conv2 H-padded input
            pltpu.VMEM((B, S + 2, S * n), jnp.float32),      # conv3/4/5 H-padded input
            pltpu.VMEM((B, S + 6, S * n), jnp.float32),      # conv6 H-padded input
        ],
    )(*inputs)


if __name__ == "__main__":
    key = jax.random.PRNGKey(0)
    kp, kx = jax.random.split(key)
    B, C, H, W = 2, 1, 16, 16
    output_size, n_classes = 16, 8
    params = init_params(kp, output_size=output_size, n_classes=n_classes)
    ops = prepare(params, input_hw=H, output_size=output_size, batch=B)
    x = jax.random.normal(kx, (B, C, H, W), jnp.float32)     # NCHW like PyTorch
    out = jax.block_until_ready(forward(ops, x))
    assert out.shape == (B, n_classes)
    assert bool(jnp.all(jnp.isfinite(out)))
    print("KERNEL_OK")
</pallas_src>

<mosaic_0001>
module attributes {stable_mosaic.version = 11 : i64} {
  func.func @_fused_forward_kernel(%arg0: memref<2x16x16xf32, #tpu.memory_space<vmem>>, %arg1: memref<112x192xbf16, #tpu.memory_space<vmem>>, %arg2: memref<192x224xbf16, #tpu.memory_space<vmem>>, %arg3: memref<768x256xbf16, #tpu.memory_space<vmem>>, %arg4: memref<768x256xbf16, #tpu.memory_space<vmem>>, %arg5: memref<768x256xbf16, #tpu.memory_space<vmem>>, %arg6: memref<1792x16xbf16, #tpu.memory_space<vmem>>, %arg7: memref<16x16xbf16, #tpu.memory_space<vmem>>, %arg8: memref<32x32xbf16, #tpu.memory_space<vmem>>, %arg9: memref<224x256xbf16, #tpu.memory_space<vmem>>, %arg10: memref<32x28xbf16, #tpu.memory_space<vmem>>, %arg11: memref<8x16xf32, #tpu.memory_space<vmem>>, %arg12: memref<256x32xbf16, #tpu.memory_space<vmem>>, %arg13: memref<1x32xf32, #tpu.memory_space<vmem>>, %arg14: memref<32x8xbf16, #tpu.memory_space<vmem>>, %arg15: memref<1x8xf32, #tpu.memory_space<vmem>>, %arg16: memref<2x8xf32, #tpu.memory_space<vmem>>, %arg17: memref<2x18x16xf32, #tpu.memory_space<vmem>>, %arg18: memref<2x14x192xf32, #tpu.memory_space<vmem>>, %arg19: memref<2x18x256xf32, #tpu.memory_space<vmem>>, %arg20: memref<2x22x256xf32, #tpu.memory_space<vmem>>) attributes {dimension_semantics = [], scalar_prefetch = 0 : i64, scratch_operands = 4 : i64, tpu.core_type = #tpu.core_type<tc>} {
    %cst = arith.constant 0.000000e+00 : f32
    %0 = vector.broadcast %cst : f32 to vector<2x1x16xf32>
    %c0 = arith.constant 0 : index
    %c0_0 = arith.constant 0 : index
    %c0_1 = arith.constant 0 : index
    %1 = vector.load %arg17[%c0, %c0_0, %c0_1] : memref<2x18x16xf32, #tpu.memory_space<vmem>>, vector<2x1x16xf32>
    tpu.vector_store %arg17[%c0, %c0_0, %c0_1], %0 {strides = array<i32>} : memref<2x18x16xf32, #tpu.memory_space<vmem>>, vector<2x1x16xf32>,
    %c0_2 = arith.constant 0 : index
    %c17 = arith.constant 17 : index
    %c0_3 = arith.constant 0 : index
    %2 = vector.load %arg17[%c0_2, %c17, %c0_3] : memref<2x18x16xf32, #tpu.memory_space<vmem>>, vector<2x1x16xf32>
    tpu.vector_store %arg17[%c0_2, %c17, %c0_3], %0 {strides = array<i32>} : memref<2x18x16xf32, #tpu.memory_space<vmem>>, vector<2x1x16xf32>,
    %cst_4 = arith.constant 0.000000e+00 : f32
    %3 = vector.broadcast %cst_4 : f32 to vector<2x1x192xf32>
    %c0_5 = arith.constant 0 : index
    %c0_6 = arith.constant 0 : index
    %c0_7 = arith.constant 0 : index
    %4 = vector.load %arg18[%c0_5, %c0_6, %c0_7] : memref<2x14x192xf32, #tpu.memory_space<vmem>>, vector<2x1x192xf32>
    tpu.vector_store %arg18[%c0_5, %c0_6, %c0_7], %3 {strides = array<i32>} : memref<2x14x192xf32, #tpu.memory_space<vmem>>, vector<2x1x192xf32>,
    %c0_8 = arith.constant 0 : index
    %c13 = arith.constant 13 : index
    %c0_9 = arith.constant 0 : index
    %5 = vector.load %arg18[%c0_8, %c13, %c0_9] : memref<2x14x192xf32, #tpu.memory_space<vmem>>, vector<2x1x192xf32>
    tpu.vector_store %arg18[%c0_8, %c13, %c0_9], %3 {strides = array<i32>} : memref<2x14x192xf32, #tpu.memory_space<vmem>>, vector<2x1x192xf32>,
    %cst_10 = arith.constant 0.000000e+00 : f32
    %6 = vector.broadcast %cst_10 : f32 to vector<2x1x256xf32>
    %c0_11 = arith.constant 0 : index
    %c0_12 = arith.constant 0 : index
    %c0_13 = arith.constant 0 : index
    %7 = vector.load %arg19[%c0_11, %c0_12, %c0_13] : memref<2x18x256xf32, #tpu.memory_space<vmem>>, vector<2x1x256xf32>
    tpu.vector_store %arg19[%c0_11, %c0_12, %c0_13], %6 {strides = array<i32>} : memref<2x18x256xf32, #tpu.memory_space<vmem>>, vector<2x1x256xf32>,
    %c0_14 = arith.constant 0 : index
    %c17_15 = arith.constant 17 : index
    %c0_16 = arith.constant 0 : index
    %8 = vector.load %arg19[%c0_14, %c17_15, %c0_16] : memref<2x18x256xf32, #tpu.memory_space<vmem>>, vector<2x1x256xf32>
    tpu.vector_store %arg19[%c0_14, %c17_15, %c0_16], %6 {strides = array<i32>} : memref<2x18x256xf32, #tpu.memory_space<vmem>>, vector<2x1x256xf32>,
    %cst_17 = arith.constant 0.000000e+00 : f32
    %9 = vector.broadcast %cst_17 : f32 to vector<2x3x256xf32>
    %c0_18 = arith.constant 0 : index
    %c0_19 = arith.constant 0 : index
    %c0_20 = arith.constant 0 : index
    %10 = vector.load %arg20[%c0_18, %c0_19, %c0_20] : memref<2x22x256xf32, #tpu.memory_space<vmem>>, vector<2x3x256xf32>
    tpu.vector_store %arg20[%c0_18, %c0_19, %c0_20], %9 {strides = array<i32>} : memref<2x22x256xf32, #tpu.memory_space<vmem>>, vector<2x3x256xf32>,
    %c0_21 = arith.constant 0 : index
    %c19 = arith.constant 19 : index
    %c0_22 = arith.constant 0 : index
    %11 = vector.load %arg20[%c0_21, %c19, %c0_22] : memref<2x22x256xf32, #tpu.memory_space<vmem>>, vector<2x3x256xf32>
    tpu.vector_store %arg20[%c0_21, %c19, %c0_22], %9 {strides = array<i32>} : memref<2x22x256xf32, #tpu.memory_space<vmem>>, vector<2x3x256xf32>,
    %c0_23 = arith.constant 0 : index
    %c0_24 = arith.constant 0 : index
    %c0_25 = arith.constant 0 : index
    %12 = vector.load %arg0[%c0_23, %c0_24, %c0_25] : memref<2x16x16xf32, #tpu.memory_space<vmem>>, vector<2x16x16xf32>
    %13 = vector.shape_cast %12 : vector<2x16x16xf32> to vector<32x16xf32>
    %14 = arith.truncf %13 : vector<32x16xf32> to vector<32x16xbf16>
    %c0_26 = arith.constant 0 : index
    %c0_27 = arith.constant 0 : index
    %15 = vector.load %arg7[%c0_26, %c0_27] : memref<16x16xbf16, #tpu.memory_space<vmem>>, vector<16x16xbf16>
    %cst_28 = arith.constant dense<0.000000e+00> : vector<32x16xf32>
    %16 = tpu.matmul %14, %15, %cst_28 {dimension_numbers = #tpu.dot_dimension_numbers<[1], [0], [0], [1], [0, 0, 1, 1], [], []>} : vector<32x16xbf16>, vector<16x16xbf16>, vector<32x16xf32> -> vector<32x16xf32>
    %c0_29 = arith.constant 0 : index
    %c0_30 = arith.constant 0 : index
    %17 = vector.load %arg8[%c0_29, %c0_30] : memref<32x32xbf16, #tpu.memory_space<vmem>>, vector<32x32xbf16>
    %18 = arith.truncf %16 : vector<32x16xf32> to vector<32x16xbf16>
    %cst_31 = arith.constant dense<0.000000e+00> : vector<32x16xf32>
    %19 = tpu.matmul %17, %18, %cst_31 {dimension_numbers = #tpu.dot_dimension_numbers<[1], [0], [0], [1], [0, 0, 1, 1], [], []>} : vector<32x32xbf16>, vector<32x16xbf16>, vector<32x16xf32> -> vector<32x16xf32>
    %c0_32 = arith.constant 0 : index
    %c1 = arith.constant 1 : index
    %c0_33 = arith.constant 0 : index
    %20 = vector.load %arg17[%c0_32, %c1, %c0_33] : memref<2x18x16xf32, #tpu.memory_space<vmem>>, vector<2x16x16xf32>
    tpu.vector_store %arg17[%c0_32, %c1, %c0_33], %12 {strides = array<i32>} : memref<2x18x16xf32, #tpu.memory_space<vmem>>, vector<2x16x16xf32>,
    %c0_34 = arith.constant 0 : index
    %c0_35 = arith.constant 0 : index
    %c0_36 = arith.constant 0 : index
    %21 = vector.load %arg17[%c0_34, %c0_35, %c0_36] : memref<2x18x16xf32, #tpu.memory_space<vmem>>, vector<2x18x16xf32>
    %22 = vector.extract_strided_slice %21 {offsets = [0, 0, 0], sizes = [2, 12, 16], strides = [1, 1, 1]} : vector<2x18x16xf32> to vector<2x12x16xf32>
    %23 = vector.extract_strided_slice %21 {offsets = [0, 1, 0], sizes = [2, 12, 16], strides = [1, 1, 1]} : vector<2x18x16xf32> to vector<2x12x16xf32>
    %24 = vector.extract_strided_slice %21 {offsets = [0, 2, 0], sizes = [2, 12, 16], strides = [1, 1, 1]} : vector<2x18x16xf32> to vector<2x12x16xf32>
    %25 = vector.extract_strided_slice %21 {offsets = [0, 3, 0], sizes = [2, 12, 16], strides = [1, 1, 1]} : vector<2x18x16xf32> to vector<2x12x16xf32>
    %26 = vector.extract_strided_slice %21 {offsets = [0, 4, 0], sizes = [2, 12, 16], strides = [1, 1, 1]} : vector<2x18x16xf32> to vector<2x12x16xf32>
    %27 = vector.extract_strided_slice %21 {offsets = [0, 5, 0], sizes = [2, 12, 16], strides = [1, 1, 1]} : vector<2x18x16xf32> to vector<2x12x16xf32>
    %28 = vector.extract_strided_slice %21 {offsets = [0, 6, 0], sizes = [2, 12, 16], strides = [1, 1, 1]} : vector<2x18x16xf32> to vector<2x12x16xf32>
    %29 = tpu.concatenate %22, %23, %24, %25, %26, %27, %28 in 2 : vector<2x12x16xf32>, vector<2x12x16xf32>, vector<2x12x16xf32>, vector<2x12x16xf32>, vector<2x12x16xf32>, vector<2x12x16xf32>, vector<2x12x16xf32> -> vector<2x12x112xf32>
    %30 = vector.shape_cast %29 : vector<2x12x112xf32> to vector<24x112xf32>
    %31 = arith.truncf %30 : vector<24x112xf32> to vector<24x112xbf16>
    %c0_37 = arith.constant 0 : index
    %c0_38 = arith.constant 0 : index
    %32 = vector.load %arg1[%c0_37, %c0_38] : memref<112x192xbf16, #tpu.memory_space<vmem>>, vector<112x192xbf16>
    %cst_39 = arith.constant dense<0.000000e+00> : vector<24x192xf32>
    %33 = tpu.matmul %31, %32, %cst_39 {dimension_numbers = #tpu.dot_dimension_numbers<[1], [0], [0], [1], [0, 0, 1, 1], [], []>} : vector<24x112xbf16>, vector<112x192xbf16>, vector<24x192xf32> -> vector<24x192xf32>
    %cst_40 = arith.constant 0.000000e+00 : f32
    %34 = vector.broadcast %cst_40 : f32 to vector<24x192xf32>
    %35 = arith.cmpf oge, %33, %34 : vector<24x192xf32>
    %cst_41 = arith.constant 1.000000e-01 : f32
    %36 = vector.broadcast %cst_41 : f32 to vector<24x192xf32>
    %37 = arith.mulf %36, %33 : vector<24x192xf32>
    %38 = arith.select %35, %33, %37 : vector<24x192xi1>, vector<24x192xf32>
    %39 = vector.shape_cast %38 : vector<24x192xf32> to vector<2x12x192xf32>
    %c0_42 = arith.constant 0 : index
    %c1_43 = arith.constant 1 : index
    %c0_44 = arith.constant 0 : index
    %40 = vector.load %arg18[%c0_42, %c1_43, %c0_44] : memref<2x14x192xf32, #tpu.memory_space<vmem>>, vector<2x12x192xf32>
    tpu.vector_store %arg18[%c0_42, %c1_43, %c0_44], %39 {strides = array<i32>} : memref<2x14x192xf32, #tpu.memory_space<vmem>>, vector<2x12x192xf32>,
    %c0_45 = arith.constant 0 : index
    %c0_46 = arith.constant 0 : index
    %c0_47 = arith.constant 0 : index
    %41 = vector.load %arg18[%c0_45, %c0_46, %c0_47] : memref<2x14x192xf32, #tpu.memory_space<vmem>>, vector<2x14x192xf32>
    %42 = vector.shape_cast %41 : vector<2x14x192xf32> to vector<28x192xf32>
    %43 = arith.truncf %42 : vector<28x192xf32> to vector<28x192xbf16>
    %c0_48 = arith.constant 0 : index
    %c0_49 = arith.constant 0 : index
    %44 = vector.load %arg2[%c0_48, %c0_49] : memref<192x224xbf16, #tpu.memory_space<vmem>>, vector<192x224xbf16>
    %cst_50 = arith.constant dense<0.000000e+00> : vector<28x224xf32>
    %45 = tpu.matmul %43, %44, %cst_50 {dimension_numbers = #tpu.dot_dimension_numbers<[1], [0], [0], [1], [0, 0, 1, 1], [], []>} : vector<28x192xbf16>, vector<192x224xbf16>, vector<28x224xf32> -> vector<28x224xf32>
    %cst_51 = arith.constant 0.000000e+00 : f32
    %46 = vector.broadcast %cst_51 : f32 to vector<28x224xf32>
    %47 = arith.cmpf oge, %45, %46 : vector<28x224xf32>
    %cst_52 = arith.constant 1.000000e-01 : f32
    %48 = vector.broadcast %cst_52 : f32 to vector<28x224xf32>
    %49 = arith.mulf %48, %45 : vector<28x224xf32>
    %50 = arith.select %47, %45, %49 : vector<28x224xi1>, vector<28x224xf32>
    %c0_53 = arith.constant 0 : index
    %c0_54 = arith.constant 0 : index
    %51 = vector.load %arg11[%c0_53, %c0_54] : memref<8x16xf32, #tpu.memory_space<vmem>>, vector<1x16xf32>
    %c1_55 = arith.constant 1 : index
    %c0_56 = arith.constant 0 : index
    %52 = vector.load %arg11[%c1_55, %c0_56] : memref<8x16xf32, #tpu.memory_space<vmem>>, vector<1x16xf32>
    %cst_57 = arith.constant dense<0.000000e+00> : vector<224xf32>
    %53 = vector.multi_reduction <add>, %50, %cst_57 [0] : vector<28x224xf32> to vector<224xf32>
    %54 = vector.shape_cast %53 : vector<224xf32> to vector<1x224xf32>
    %55 = vector.extract_strided_slice %54 {offsets = [0, 0], sizes = [1, 112], strides = [1, 1]} : vector<1x224xf32> to vector<1x112xf32>
    %56 = vector.extract_strided_slice %54 {offsets = [0, 112], sizes = [1, 112], strides = [1, 1]} : vector<1x224xf32> to vector<1x112xf32>
    %57 = arith.addf %55, %56 : vector<1x112xf32>
    %58 = vector.extract_strided_slice %57 {offsets = [0, 0], sizes = [1, 16], strides = [1, 1]} : vector<1x112xf32> to vector<1x16xf32>
    %59 = vector.extract_strided_slice %57 {offsets = [0, 96], sizes = [1, 16], strides = [1, 1]} : vector<1x112xf32> to vector<1x16xf32>
    %60 = arith.addf %58, %59 : vector<1x16xf32>
    %61 = vector.extract_strided_slice %57 {offsets = [0, 16], sizes = [1, 80], strides = [1, 1]} : vector<1x112xf32> to vector<1x80xf32>
    %62 = tpu.concatenate %60, %61 in 1 : vector<1x16xf32>, vector<1x80xf32> -> vector<1x96xf32>
    %63 = vector.extract_strided_slice %62 {offsets = [0, 0], sizes = [1, 48], strides = [1, 1]} : vector<1x96xf32> to vector<1x48xf32>
    %64 = vector.extract_strided_slice %62 {offsets = [0, 48], sizes = [1, 48], strides = [1, 1]} : vector<1x96xf32> to vector<1x48xf32>
    %65 = arith.addf %63, %64 : vector<1x48xf32>
    %66 = vector.extract_strided_slice %65 {offsets = [0, 0], sizes = [1, 16], strides = [1, 1]} : vector<1x48xf32> to vector<1x16xf32>
    %67 = vector.extract_strided_slice %65 {offsets = [0, 32], sizes = [1, 16], strides = [1, 1]} : vector<1x48xf32> to vector<1x16xf32>
    %68 = arith.addf %66, %67 : vector<1x16xf32>
    %69 = vector.extract_strided_slice %65 {offsets = [0, 16], sizes = [1, 16], strides = [1, 1]} : vector<1x48xf32> to vector<1x16xf32>
    %70 = tpu.concatenate %68, %69 in 1 : vector<1x16xf32>, vector<1x16xf32> -> vector<1x32xf32>
    %71 = vector.extract_strided_slice %70 {offsets = [0, 0], sizes = [1, 16], strides = [1, 1]} : vector<1x32xf32> to vector<1x16xf32>
    %72 = vector.extract_strided_slice %70 {offsets = [0, 16], sizes = [1, 16], strides = [1, 1]} : vector<1x32xf32> to vector<1x16xf32>
    %73 = arith.addf %71, %72 : vector<1x16xf32>
    %74 = arith.mulf %50, %50 : vector<28x224xf32>
    %cst_58 = arith.constant dense<0.000000e+00> : vector<224xf32>
    %75 = vector.multi_reduction <add>, %74, %cst_58 [0] : vector<28x224xf32> to vector<224xf32>
    %76 = vector.shape_cast %75 : vector<224xf32> to vector<1x224xf32>
    %77 = vector.extract_strided_slice %76 {offsets = [0, 0], sizes = [1, 112], strides = [1, 1]} : vector<1x224xf32> to vector<1x112xf32>
    %78 = vector.extract_strided_slice %76 {offsets = [0, 112], sizes = [1, 112], strides = [1, 1]} : vector<1x224xf32> to vector<1x112xf32>
    %79 = arith.addf %77, %78 : vector<1x112xf32>
    %80 = vector.extract_strided_slice %79 {offsets = [0, 0], sizes = [1, 16], strides = [1, 1]} : vector<1x112xf32> to vector<1x16xf32>
    %81 = vector.extract_strided_slice %79 {offsets = [0, 96], sizes = [1, 16], strides = [1, 1]} : vector<1x112xf32> to vector<1x16xf32>
    %82 = arith.addf %80, %81 : vector<1x16xf32>
    %83 = vector.extract_strided_slice %79 {offsets = [0, 16], sizes = [1, 80], strides = [1, 1]} : vector<1x112xf32> to vector<1x80xf32>
    %84 = tpu.concatenate %82, %83 in 1 : vector<1x16xf32>, vector<1x80xf32> -> vector<1x96xf32>
    %85 = vector.extract_strided_slice %84 {offsets = [0, 0], sizes = [1, 48], strides = [1, 1]} : vector<1x96xf32> to vector<1x48xf32>
    %86 = vector.extract_strided_slice %84 {offsets = [0, 48], sizes = [1, 48], strides = [1, 1]} : vector<1x96xf32> to vector<1x48xf32>
    %87 = arith.addf %85, %86 : vector<1x48xf32>
    %88 = vector.extract_strided_slice %87 {offsets = [0, 0], sizes = [1, 16], strides = [1, 1]} : vector<1x48xf32> to vector<1x16xf32>
    %89 = vector.extract_strided_slice %87 {offsets = [0, 32], sizes = [1, 16], strides = [1, 1]} : vector<1x48xf32> to vector<1x16xf32>
    %90 = arith.addf %88, %89 : vector<1x16xf32>
    %91 = vector.extract_strided_slice %87 {offsets = [0, 16], sizes = [1, 16], strides = [1, 1]} : vector<1x48xf32> to vector<1x16xf32>
    %92 = tpu.concatenate %90, %91 in 1 : vector<1x16xf32>, vector<1x16xf32> -> vector<1x32xf32>
    %93 = vector.extract_strided_slice %92 {offsets = [0, 0], sizes = [1, 16], strides = [1, 1]} : vector<1x32xf32> to vector<1x16xf32>
    %94 = vector.extract_strided_slice %92 {offsets = [0, 16], sizes = [1, 16], strides = [1, 1]} : vector<1x32xf32> to vector<1x16xf32>
    %95 = arith.addf %93, %94 : vector<1x16xf32>
    %cst_59 = arith.constant 0.00255102036 : f32
    %96 = vector.broadcast %cst_59 : f32 to vector<1x16xf32>
    %97 = arith.mulf %73, %96 : vector<1x16xf32>
    %cst_60 = arith.constant 0.00255102036 : f32
    %98 = vector.broadcast %cst_60 : f32 to vector<1x16xf32>
    %99 = arith.mulf %95, %98 : vector<1x16xf32>
    %100 = arith.mulf %97, %97 : vector<1x16xf32>
    %101 = arith.subf %99, %100 : vector<1x16xf32>
    %cst_61 = arith.constant 0.000000e+00 : f32
    %102 = vector.broadcast %cst_61 : f32 to vector<1x16xf32>
    %103 = arith.maximumf %101, %102 : vector<1x16xf32>
    %cst_62 = arith.constant 9.99999974E-6 : f32
    %104 = vector.broadcast %cst_62 : f32 to vector<1x16xf32>
    %105 = arith.addf %103, %104 : vector<1x16xf32>
    %106 = math.rsqrt %105 : vector<1x16xf32>
    %107 = arith.mulf %51, %106 : vector<1x16xf32>
    %108 = arith.mulf %97, %107 : vector<1x16xf32>
    %109 = arith.subf %52, %108 : vector<1x16xf32>
    %110 = tpu.concatenate %107, %107, %107, %107, %107, %107, %107, %107, %107, %107, %107, %107, %107, %107 in 1 : vector<1x16xf32>, vector<1x16xf32>, vector<1x16xf32>, vector<1x16xf32>, vector<1x16xf32>, vector<1x16xf32>, vector<1x16xf32>, vector<1x16xf32>, vector<1x16xf32>, vector<1x16xf32>, vector<1x16xf32>, vector<1x16xf32>, vector<1x16xf32>, vector<1x16xf32> -> vector<1x224xf32>
    %111 = tpu.concatenate %109, %109, %109, %109, %109, %109, %109, %109, %109, %109, %109, %109, %109, %109 in 1 : vector<1x16xf32>, vector<1x16xf32>, vector<1x16xf32>, vector<1x16xf32>, vector<1x16xf32>, vector<1x16xf32>, vector<1x16xf32>, vector<1x16xf32>, vector<1x16xf32>, vector<1x16xf32>, vector<1x16xf32>, vector<1x16xf32>, vector<1x16xf32>, vector<1x16xf32> -> vector<1x224xf32>
    %112 = vector.broadcast %110 : vector<1x224xf32> to vector<28x224xf32>
    %113 = arith.mulf %50, %112 : vector<28x224xf32>
    %114 = vector.broadcast %111 : vector<1x224xf32> to vector<28x224xf32>
    %115 = arith.addf %113, %114 : vector<28x224xf32>
    %116 = arith.truncf %115 : vector<28x224xf32> to vector<28x224xbf16>
    %c0_63 = arith.constant 0 : index
    %c0_64 = arith.constant 0 : index
    %117 = vector.load %arg9[%c0_63, %c0_64] : memref<224x256xbf16, #tpu.memory_space<vmem>>, vector<224x256xbf16>
    %cst_65 = arith.constant dense<0.000000e+00> : vector<28x256xf32>
    %118 = tpu.matmul %116, %117, %cst_65 {dimension_numbers = #tpu.dot_dimension_numbers<[1], [0], [0], [1], [0, 0, 1, 1], [], []>} : vector<28x224xbf16>, vector<224x256xbf16>, vector<28x256xf32> -> vector<28x256xf32>
    %c0_66 = arith.constant 0 : index
    %c0_67 = arith.constant 0 : index
    %119 = vector.load %arg10[%c0_66, %c0_67] : memref<32x28xbf16, #tpu.memory_space<vmem>>, vector<32x28xbf16>
    %120 = arith.truncf %118 : vector<28x256xf32> to vector<28x256xbf16>
    %cst_68 = arith.constant dense<0.000000e+00> : vector<32x256xf32>
    %121 = tpu.matmul %119, %120, %cst_68 {dimension_numbers = #tpu.dot_dimension_numbers<[1], [0], [0], [1], [0, 0, 1, 1], [], []>} : vector<32x28xbf16>, vector<28x256xbf16>, vector<32x256xf32> -> vector<32x256xf32>
    %122 = vector.shape_cast %121 : vector<32x256xf32> to vector<2x16x256xf32>
    %c0_69 = arith.constant 0 : index
    %c1_70 = arith.constant 1 : index
    %c0_71 = arith.constant 0 : index
    %123 = vector.load %arg19[%c0_69, %c1_70, %c0_71] : memref<2x18x256xf32, #tpu.memory_space<vmem>>, vector<2x16x256xf32>
    tpu.vector_store %arg19[%c0_69, %c1_70, %c0_71], %122 {strides = array<i32>} : memref<2x18x256xf32, #tpu.memory_space<vmem>>, vector<2x16x256xf32>,
    %c0_72 = arith.constant 0 : index
    %c0_73 = arith.constant 0 : index
    %c0_74 = arith.constant 0 : index
    %124 = vector.load %arg19[%c0_72, %c0_73, %c0_74] : memref<2x18x256xf32, #tpu.memory_space<vmem>>, vector<2x18x256xf32>
    %125 = vector.extract_strided_slice %124 {offsets = [0, 0, 0], sizes = [2, 16, 256], strides = [1, 1, 1]} : vector<2x18x256xf32> to vector<2x16x256xf32>
    %126 = vector.extract_strided_slice %124 {offsets = [0, 1, 0], sizes = [2, 16, 256], strides = [1, 1, 1]} : vector<2x18x256xf32> to vector<2x16x256xf32>
    %127 = vector.extract_strided_slice %124 {offsets = [0, 2, 0], sizes = [2, 16, 256], strides = [1, 1, 1]} : vector<2x18x256xf32> to vector<2x16x256xf32>
    %128 = tpu.concatenate %125, %126, %127 in 2 : vector<2x16x256xf32>, vector<2x16x256xf32>, vector<2x16x256xf32> -> vector<2x16x768xf32>
    %129 = vector.shape_cast %128 : vector<2x16x768xf32> to vector<32x768xf32>
    %130 = arith.truncf %129 : vector<32x768xf32> to vector<32x768xbf16>
    %c0_75 = arith.constant 0 : index
    %c0_76 = arith.constant 0 : index
    %131 = vector.load %arg3[%c0_75, %c0_76] : memref<768x256xbf16, #tpu.memory_space<vmem>>, vector<768x256xbf16>
    %cst_77 = arith.constant dense<0.000000e+00> : vector<32x256xf32>
    %132 = tpu.matmul %130, %131, %cst_77 {dimension_numbers = #tpu.dot_dimension_numbers<[1], [0], [0], [1], [0, 0, 1, 1], [], []>} : vector<32x768xbf16>, vector<768x256xbf16>, vector<32x256xf32> -> vector<32x256xf32>
    %c2 = arith.constant 2 : index
    %c0_78 = arith.constant 0 : index
    %133 = vector.load %arg11[%c2, %c0_78] : memref<8x16xf32, #tpu.memory_space<vmem>>, vector<1x16xf32>
    %c3 = arith.constant 3 : index
    %c0_79 = arith.constant 0 : index
    %134 = vector.load %arg11[%c3, %c0_79] : memref<8x16xf32, #tpu.memory_space<vmem>>, vector<1x16xf32>
    %cst_80 = arith.constant dense<0.000000e+00> : vector<256xf32>
    %135 = vector.multi_reduction <add>, %132, %cst_80 [0] : vector<32x256xf32> to vector<256xf32>
    %136 = vector.shape_cast %135 : vector<256xf32> to vector<1x256xf32>
    %137 = vector.extract_strided_slice %136 {offsets = [0, 0], sizes = [1, 128], strides = [1, 1]} : vector<1x256xf32> to vector<1x128xf32>
    %138 = vector.extract_strided_slice %136 {offsets = [0, 128], sizes = [1, 128], strides = [1, 1]} : vector<1x256xf32> to vector<1x128xf32>
    %139 = arith.addf %137, %138 : vector<1x128xf32>
    %140 = vector.extract_strided_slice %139 {offsets = [0, 0], sizes = [1, 64], strides = [1, 1]} : vector<1x128xf32> to vector<1x64xf32>
    %141 = vector.extract_strided_slice %139 {offsets = [0, 64], sizes = [1, 64], strides = [1, 1]} : vector<1x128xf32> to vector<1x64xf32>
    %142 = arith.addf %140, %141 : vector<1x64xf32>
    %143 = vector.extract_strided_slice %142 {offsets = [0, 0], sizes = [1, 32], strides = [1, 1]} : vector<1x64xf32> to vector<1x32xf32>
    %144 = vector.extract_strided_slice %142 {offsets = [0, 32], sizes = [1, 32], strides = [1, 1]} : vector<1x64xf32> to vector<1x32xf32>
    %145 = arith.addf %143, %144 : vector<1x32xf32>
    %146 = vector.extract_strided_slice %145 {offsets = [0, 0], sizes = [1, 16], strides = [1, 1]} : vector<1x32xf32> to vector<1x16xf32>
    %147 = vector.extract_strided_slice %145 {offsets = [0, 16], sizes = [1, 16], strides = [1, 1]} : vector<1x32xf32> to vector<1x16xf32>
    %148 = arith.addf %146, %147 : vector<1x16xf32>
    %149 = arith.mulf %132, %132 : vector<32x256xf32>
    %cst_81 = arith.constant dense<0.000000e+00> : vector<256xf32>
    %150 = vector.multi_reduction <add>, %149, %cst_81 [0] : vector<32x256xf32> to vector<256xf32>
    %151 = vector.shape_cast %150 : vector<256xf32> to vector<1x256xf32>
    %152 = vector.extract_strided_slice %151 {offsets = [0, 0], sizes = [1, 128], strides = [1, 1]} : vector<1x256xf32> to vector<1x128xf32>
    %153 = vector.extract_strided_slice %151 {offsets = [0, 128], sizes = [1, 128], strides = [1, 1]} : vector<1x256xf32> to vector<1x128xf32>
    %154 = arith.addf %152, %153 : vector<1x128xf32>
    %155 = vector.extract_strided_slice %154 {offsets = [0, 0], sizes = [1, 64], strides = [1, 1]} : vector<1x128xf32> to vector<1x64xf32>
    %156 = vector.extract_strided_slice %154 {offsets = [0, 64], sizes = [1, 64], strides = [1, 1]} : vector<1x128xf32> to vector<1x64xf32>
    %157 = arith.addf %155, %156 : vector<1x64xf32>
    %158 = vector.extract_strided_slice %157 {offsets = [0, 0], sizes = [1, 32], strides = [1, 1]} : vector<1x64xf32> to vector<1x32xf32>
    %159 = vector.extract_strided_slice %157 {offsets = [0, 32], sizes = [1, 32], strides = [1, 1]} : vector<1x64xf32> to vector<1x32xf32>
    %160 = arith.addf %158, %159 : vector<1x32xf32>
    %161 = vector.extract_strided_slice %160 {offsets = [0, 0], sizes = [1, 16], strides = [1, 1]} : vector<1x32xf32> to vector<1x16xf32>
    %162 = vector.extract_strided_slice %160 {offsets = [0, 16], sizes = [1, 16], strides = [1, 1]} : vector<1x32xf32> to vector<1x16xf32>
    %163 = arith.addf %161, %162 : vector<1x16xf32>
    %cst_82 = arith.constant 0.001953125 : f32
    %164 = vector.broadcast %cst_82 : f32 to vector<1x16xf32>
    %165 = arith.mulf %148, %164 : vector<1x16xf32>
    %cst_83 = arith.constant 0.001953125 : f32
    %166 = vector.broadcast %cst_83 : f32 to vector<1x16xf32>
    %167 = arith.mulf %163, %166 : vector<1x16xf32>
    %168 = arith.mulf %165, %165 : vector<1x16xf32>
    %169 = arith.subf %167, %168 : vector<1x16xf32>
    %cst_84 = arith.constant 0.000000e+00 : f32
    %170 = vector.broadcast %cst_84 : f32 to vector<1x16xf32>
    %171 = arith.maximumf %169, %170 : vector<1x16xf32>
    %cst_85 = arith.constant 9.99999974E-6 : f32
    %172 = vector.broadcast %cst_85 : f32 to vector<1x16xf32>
    %173 = arith.addf %171, %172 : vector<1x16xf32>
    %174 = math.rsqrt %173 : vector<1x16xf32>
    %175 = arith.mulf %133, %174 : vector<1x16xf32>
    %176 = arith.mulf %165, %175 : vector<1x16xf32>
    %177 = arith.subf %134, %176 : vector<1x16xf32>
    %178 = tpu.concatenate %175, %175, %175, %175, %175, %175, %175, %175, %175, %175, %175, %175, %175, %175, %175, %175 in 1 : vector<1x16xf32>, vector<1x16xf32>, vector<1x16xf32>, vector<1x16xf32>, vector<1x16xf32>, vector<1x16xf32>, vector<1x16xf32>, vector<1x16xf32>, vector<1x16xf32>, vector<1x16xf32>, vector<1x16xf32>, vector<1x16xf32>, vector<1x16xf32>, vector<1x16xf32>, vector<1x16xf32>, vector<1x16xf32> -> vector<1x256xf32>
    %179 = tpu.concatenate %177, %177, %177, %177, %177, %177, %177, %177, %177, %177, %177, %177, %177, %177, %177, %177 in 1 : vector<1x16xf32>, vector<1x16xf32>, vector<1x16xf32>, vector<1x16xf32>, vector<1x16xf32>, vector<1x16xf32>, vector<1x16xf32>, vector<1x16xf32>, vector<1x16xf32>, vector<1x16xf32>, vector<1x16xf32>, vector<1x16xf32>, vector<1x16xf32>, vector<1x16xf32>, vector<1x16xf32>, vector<1x16xf32> -> vector<1x256xf32>
    %180 = vector.broadcast %178 : vector<1x256xf32> to vector<32x256xf32>
    %181 = arith.mulf %132, %180 : vector<32x256xf32>
    %182 = vector.broadcast %179 : vector<1x256xf32> to vector<32x256xf32>
    %183 = arith.addf %181, %182 : vector<32x256xf32>
    %cst_86 = arith.constant 0.000000e+00 : f32
    %184 = vector.broadcast %cst_86 : f32 to vector<32x256xf32>
    %185 = arith.cmpf oge, %183, %184 : vector<32x256xf32>
    %cst_87 = arith.constant 1.000000e-01 : f32
    %186 = vector.broadcast %cst_87 : f32 to vector<32x256xf32>
    %187 = arith.mulf %186, %183 : vector<32x256xf32>
    %188 = arith.select %185, %183, %187 : vector<32x256xi1>, vector<32x256xf32>
    %189 = vector.shape_cast %188 : vector<32x256xf32> to vector<2x16x256xf32>
    %c0_88 = arith.constant 0 : index
    %c1_89 = arith.constant 1 : index
    %c0_90 = arith.constant 0 : index
    %190 = vector.load %arg19[%c0_88, %c1_89, %c0_90] : memref<2x18x256xf32, #tpu.memory_space<vmem>>, vector<2x16x256xf32>
    tpu.vector_store %arg19[%c0_88, %c1_89, %c0_90], %189 {strides = array<i32>} : memref<2x18x256xf32, #tpu.memory_space<vmem>>, vector<2x16x256xf32>,
    %c0_91 = arith.constant 0 : index
    %c0_92 = arith.constant 0 : index
    %c0_93 = arith.constant 0 : index
    %191 = vector.load %arg19[%c0_91, %c0_92, %c0_93] : memref<2x18x256xf32, #tpu.memory_space<vmem>>, vector<2x18x256xf32>
    %192 = vector.extract_strided_slice %191 {offsets = [0, 0, 0], sizes = [2, 16, 256], strides = [1, 1, 1]} : vector<2x18x256xf32> to vector<2x16x256xf32>
    %193 = vector.extract_strided_slice %191 {offsets = [0, 1, 0], sizes = [2, 16, 256], strides = [1, 1, 1]} : vector<2x18x256xf32> to vector<2x16x256xf32>
    %194 = vector.extract_strided_slice %191 {offsets = [0, 2, 0], sizes = [2, 16, 256], strides = [1, 1, 1]} : vector<2x18x256xf32> to vector<2x16x256xf32>
    %195 = tpu.concatenate %192, %193, %194 in 2 : vector<2x16x256xf32>, vector<2x16x256xf32>, vector<2x16x256xf32> -> vector<2x16x768xf32>
    %196 = vector.shape_cast %195 : vector<2x16x768xf32> to vector<32x768xf32>
    %197 = arith.truncf %196 : vector<32x768xf32> to vector<32x768xbf16>
    %c0_94 = arith.constant 0 : index
    %c0_95 = arith.constant 0 : index
    %198 = vector.load %arg4[%c0_94, %c0_95] : memref<768x256xbf16, #tpu.memory_space<vmem>>, vector<768x256xbf16>
    %cst_96 = arith.constant dense<0.000000e+00> : vector<32x256xf32>
    %199 = tpu.matmul %197, %198, %cst_96 {dimension_numbers = #tpu.dot_dimension_numbers<[1], [0], [0], [1], [0, 0, 1, 1], [], []>} : vector<32x768xbf16>, vector<768x256xbf16>, vector<32x256xf32> -> vector<32x256xf32>
    %c4 = arith.constant 4 : index
    %c0_97 = arith.constant 0 : index
    %200 = vector.load %arg11[%c4, %c0_97] : memref<8x16xf32, #tpu.memory_space<vmem>>, vector<1x16xf32>
    %c5 = arith.constant 5 : index
    %c0_98 = arith.constant 0 : index
    %201 = vector.load %arg11[%c5, %c0_98] : memref<8x16xf32, #tpu.memory_space<vmem>>, vector<1x16xf32>
    %cst_99 = arith.constant dense<0.000000e+00> : vector<256xf32>
    %202 = vector.multi_reduction <add>, %199, %cst_99 [0] : vector<32x256xf32> to vector<256xf32>
    %203 = vector.shape_cast %202 : vector<256xf32> to vector<1x256xf32>
    %204 = vector.extract_strided_slice %203 {offsets = [0, 0], sizes = [1, 128], strides = [1, 1]} : vector<1x256xf32> to vector<1x128xf32>
    %205 = vector.extract_strided_slice %203 {offsets = [0, 128], sizes = [1, 128], strides = [1, 1]} : vector<1x256xf32> to vector<1x128xf32>
    %206 = arith.addf %204, %205 : vector<1x128xf32>
    %207 = vector.extract_strided_slice %206 {offsets = [0, 0], sizes = [1, 64], strides = [1, 1]} : vector<1x128xf32> to vector<1x64xf32>
    %208 = vector.extract_strided_slice %206 {offsets = [0, 64], sizes = [1, 64], strides = [1, 1]} : vector<1x128xf32> to vector<1x64xf32>
    %209 = arith.addf %207, %208 : vector<1x64xf32>
    %210 = vector.extract_strided_slice %209 {offsets = [0, 0], sizes = [1, 32], strides = [1, 1]} : vector<1x64xf32> to vector<1x32xf32>
    %211 = vector.extract_strided_slice %209 {offsets = [0, 32], sizes = [1, 32], strides = [1, 1]} : vector<1x64xf32> to vector<1x32xf32>
    %212 = arith.addf %210, %211 : vector<1x32xf32>
    %213 = vector.extract_strided_slice %212 {offsets = [0, 0], sizes = [1, 16], strides = [1, 1]} : vector<1x32xf32> to vector<1x16xf32>
    %214 = vector.extract_strided_slice %212 {offsets = [0, 16], sizes = [1, 16], strides = [1, 1]} : vector<1x32xf32> to vector<1x16xf32>
    %215 = arith.addf %213, %214 : vector<1x16xf32>
    %216 = arith.mulf %199, %199 : vector<32x256xf32>
    %cst_100 = arith.constant dense<0.000000e+00> : vector<256xf32>
    %217 = vector.multi_reduction <add>, %216, %cst_100 [0] : vector<32x256xf32> to vector<256xf32>
    %218 = vector.shape_cast %217 : vector<256xf32> to vector<1x256xf32>
    %219 = vector.extract_strided_slice %218 {offsets = [0, 0], sizes = [1, 128], strides = [1, 1]} : vector<1x256xf32> to vector<1x128xf32>
    %220 = vector.extract_strided_slice %218 {offsets = [0, 128], sizes = [1, 128], strides = [1, 1]} : vector<1x256xf32> to vector<1x128xf32>
    %221 = arith.addf %219, %220 : vector<1x128xf32>
    %222 = vector.extract_strided_slice %221 {offsets = [0, 0], sizes = [1, 64], strides = [1, 1]} : vector<1x128xf32> to vector<1x64xf32>
    %223 = vector.extract_strided_slice %221 {offsets = [0, 64], sizes = [1, 64], strides = [1, 1]} : vector<1x128xf32> to vector<1x64xf32>
    %224 = arith.addf %222, %223 : vector<1x64xf32>
    %225 = vector.extract_strided_slice %224 {offsets = [0, 0], sizes = [1, 32], strides = [1, 1]} : vector<1x64xf32> to vector<1x32xf32>
    %226 = vector.extract_strided_slice %224 {offsets = [0, 32], sizes = [1, 32], strides = [1, 1]} : vector<1x64xf32> to vector<1x32xf32>
    %227 = arith.addf %225, %226 : vector<1x32xf32>
    %228 = vector.extract_strided_slice %227 {offsets = [0, 0], sizes = [1, 16], strides = [1, 1]} : vector<1x32xf32> to vector<1x16xf32>
    %229 = vector.extract_strided_slice %227 {offsets = [0, 16], sizes = [1, 16], strides = [1, 1]} : vector<1x32xf32> to vector<1x16xf32>
    %230 = arith.addf %228, %229 : vector<1x16xf32>
    %cst_101 = arith.constant 0.001953125 : f32
    %231 = vector.broadcast %cst_101 : f32 to vector<1x16xf32>
    %232 = arith.mulf %215, %231 : vector<1x16xf32>
    %cst_102 = arith.constant 0.001953125 : f32
    %233 = vector.broadcast %cst_102 : f32 to vector<1x16xf32>
    %234 = arith.mulf %230, %233 : vector<1x16xf32>
    %235 = arith.mulf %232, %232 : vector<1x16xf32>
    %236 = arith.subf %234, %235 : vector<1x16xf32>
    %cst_103 = arith.constant 0.000000e+00 : f32
    %237 = vector.broadcast %cst_103 : f32 to vector<1x16xf32>
    %238 = arith.maximumf %236, %237 : vector<1x16xf32>
    %cst_104 = arith.constant 9.99999974E-6 : f32
    %239 = vector.broadcast %cst_104 : f32 to vector<1x16xf32>
    %240 = arith.addf %238, %239 : vector<1x16xf32>
    %241 = math.rsqrt %240 : vector<1x16xf32>
    %242 = arith.mulf %200, %241 : vector<1x16xf32>
    %243 = arith.mulf %232, %242 : vector<1x16xf32>
    %244 = arith.subf %201, %243 : vector<1x16xf32>
    %245 = tpu.concatenate %242, %242, %242, %242, %242, %242, %242, %242, %242, %242, %242, %242, %242, %242, %242, %242 in 1 : vector<1x16xf32>, vector<1x16xf32>, vector<1x16xf32>, vector<1x16xf32>, vector<1x16xf32>, vector<1x16xf32>, vector<1x16xf32>, vector<1x16xf32>, vector<1x16xf32>, vector<1x16xf32>, vector<1x16xf32>, vector<1x16xf32>, vector<1x16xf32>, vector<1x16xf32>, vector<1x16xf32>, vector<1x16xf32> -> vector<1x256xf32>
    %246 = tpu.concatenate %244, %244, %244, %244, %244, %244, %244, %244, %244, %244, %244, %244, %244, %244, %244, %244 in 1 : vector<1x16xf32>, vector<1x16xf32>, vector<1x16xf32>, vector<1x16xf32>, vector<1x16xf32>, vector<1x16xf32>, vector<1x16xf32>, vector<1x16xf32>, vector<1x16xf32>, vector<1x16xf32>, vector<1x16xf32>, vector<1x16xf32>, vector<1x16xf32>, vector<1x16xf32>, vector<1x16xf32>, vector<1x16xf32> -> vector<1x256xf32>
    %247 = vector.broadcast %245 : vector<1x256xf32> to vector<32x256xf32>
    %248 = arith.mulf %199, %247 : vector<32x256xf32>
    %249 = vector.broadcast %246 : vector<1x256xf32> to vector<32x256xf32>
    %250 = arith.addf %248, %249 : vector<32x256xf32>
    %251 = arith.addf %250, %121 : vector<32x256xf32>
    %252 = vector.shape_cast %251 : vector<32x256xf32> to vector<2x16x256xf32>
    %c0_105 = arith.constant 0 : index
    %c1_106 = arith.constant 1 : index
    %c0_107 = arith.constant 0 : index
    %253 = vector.load %arg19[%c0_105, %c1_106, %c0_107] : memref<2x18x256xf32, #tpu.memory_space<vmem>>, vector<2x16x256xf32>
    tpu.vector_store %arg19[%c0_105, %c1_106, %c0_107], %252 {strides = array<i32>} : memref<2x18x256xf32, #tpu.memory_space<vmem>>, vector<2x16x256xf32>,
    %c0_108 = arith.constant 0 : index
    %c0_109 = arith.constant 0 : index
    %c0_110 = arith.constant 0 : index
    %254 = vector.load %arg19[%c0_108, %c0_109, %c0_110] : memref<2x18x256xf32, #tpu.memory_space<vmem>>, vector<2x18x256xf32>
    %255 = vector.extract_strided_slice %254 {offsets = [0, 0, 0], sizes = [2, 16, 256], strides = [1, 1, 1]} : vector<2x18x256xf32> to vector<2x16x256xf32>
    %256 = vector.extract_strided_slice %254 {offsets = [0, 1, 0], sizes = [2, 16, 256], strides = [1, 1, 1]} : vector<2x18x256xf32> to vector<2x16x256xf32>
    %257 = vector.extract_strided_slice %254 {offsets = [0, 2, 0], sizes = [2, 16, 256], strides = [1, 1, 1]} : vector<2x18x256xf32> to vector<2x16x256xf32>
    %258 = tpu.concatenate %255, %256, %257 in 2 : vector<2x16x256xf32>, vector<2x16x256xf32>, vector<2x16x256xf32> -> vector<2x16x768xf32>
    %259 = vector.shape_cast %258 : vector<2x16x768xf32> to vector<32x768xf32>
    %260 = arith.truncf %259 : vector<32x768xf32> to vector<32x768xbf16>
    %c0_111 = arith.constant 0 : index
    %c0_112 = arith.constant 0 : index
    %261 = vector.load %arg5[%c0_111, %c0_112] : memref<768x256xbf16, #tpu.memory_space<vmem>>, vector<768x256xbf16>
    %cst_113 = arith.constant dense<0.000000e+00> : vector<32x256xf32>
    %262 = tpu.matmul %260, %261, %cst_113 {dimension_numbers = #tpu.dot_dimension_numbers<[1], [0], [0], [1], [0, 0, 1, 1], [], []>} : vector<32x768xbf16>, vector<768x256xbf16>, vector<32x256xf32> -> vector<32x256xf32>
    %c6 = arith.constant 6 : index
    %c0_114 = arith.constant 0 : index
    %263 = vector.load %arg11[%c6, %c0_114] : memref<8x16xf32, #tpu.memory_space<vmem>>, vector<1x16xf32>
    %c7 = arith.constant 7 : index
    %c0_115 = arith.constant 0 : index
    %264 = vector.load %arg11[%c7, %c0_115] : memref<8x16xf32, #tpu.memory_space<vmem>>, vector<1x16xf32>
    %cst_116 = arith.constant dense<0.000000e+00> : vector<256xf32>
    %265 = vector.multi_reduction <add>, %262, %cst_116 [0] : vector<32x256xf32> to vector<256xf32>
    %266 = vector.shape_cast %265 : vector<256xf32> to vector<1x256xf32>
    %267 = vector.extract_strided_slice %266 {offsets = [0, 0], sizes = [1, 128], strides = [1, 1]} : vector<1x256xf32> to vector<1x128xf32>
    %268 = vector.extract_strided_slice %266 {offsets = [0, 128], sizes = [1, 128], strides = [1, 1]} : vector<1x256xf32> to vector<1x128xf32>
    %269 = arith.addf %267, %268 : vector<1x128xf32>
    %270 = vector.extract_strided_slice %269 {offsets = [0, 0], sizes = [1, 64], strides = [1, 1]} : vector<1x128xf32> to vector<1x64xf32>
    %271 = vector.extract_strided_slice %269 {offsets = [0, 64], sizes = [1, 64], strides = [1, 1]} : vector<1x128xf32> to vector<1x64xf32>
    %272 = arith.addf %270, %271 : vector<1x64xf32>
    %273 = vector.extract_strided_slice %272 {offsets = [0, 0], sizes = [1, 32], strides = [1, 1]} : vector<1x64xf32> to vector<1x32xf32>
    %274 = vector.extract_strided_slice %272 {offsets = [0, 32], sizes = [1, 32], strides = [1, 1]} : vector<1x64xf32> to vector<1x32xf32>
    %275 = arith.addf %273, %274 : vector<1x32xf32>
    %276 = vector.extract_strided_slice %275 {offsets = [0, 0], sizes = [1, 16], strides = [1, 1]} : vector<1x32xf32> to vector<1x16xf32>
    %277 = vector.extract_strided_slice %275 {offsets = [0, 16], sizes = [1, 16], strides = [1, 1]} : vector<1x32xf32> to vector<1x16xf32>
    %278 = arith.addf %276, %277 : vector<1x16xf32>
    %279 = arith.mulf %262, %262 : vector<32x256xf32>
    %cst_117 = arith.constant dense<0.000000e+00> : vector<256xf32>
    %280 = vector.multi_reduction <add>, %279, %cst_117 [0] : vector<32x256xf32> to vector<256xf32>
    %281 = vector.shape_cast %280 : vector<256xf32> to vector<1x256xf32>
    %282 = vector.extract_strided_slice %281 {offsets = [0, 0], sizes = [1, 128], strides = [1, 1]} : vector<1x256xf32> to vector<1x128xf32>
    %283 = vector.extract_strided_slice %281 {offsets = [0, 128], sizes = [1, 128], strides = [1, 1]} : vector<1x256xf32> to vector<1x128xf32>
    %284 = arith.addf %282, %283 : vector<1x128xf32>
    %285 = vector.extract_strided_slice %284 {offsets = [0, 0], sizes = [1, 64], strides = [1, 1]} : vector<1x128xf32> to vector<1x64xf32>
    %286 = vector.extract_strided_slice %284 {offsets = [0, 64], sizes = [1, 64], strides = [1, 1]} : vector<1x128xf32> to vector<1x64xf32>
    %287 = arith.addf %285, %286 : vector<1x64xf32>
    %288 = vector.extract_strided_slice %287 {offsets = [0, 0], sizes = [1, 32], strides = [1, 1]} : vector<1x64xf32> to vector<1x32xf32>
    %289 = vector.extract_strided_slice %287 {offsets = [0, 32], sizes = [1, 32], strides = [1, 1]} : vector<1x64xf32> to vector<1x32xf32>
    %290 = arith.addf %288, %289 : vector<1x32xf32>
    %291 = vector.extract_strided_slice %290 {offsets = [0, 0], sizes = [1, 16], strides = [1, 1]} : vector<1x32xf32> to vector<1x16xf32>
    %292 = vector.extract_strided_slice %290 {offsets = [0, 16], sizes = [1, 16], strides = [1, 1]} : vector<1x32xf32> to vector<1x16xf32>
    %293 = arith.addf %291, %292 : vector<1x16xf32>
    %cst_118 = arith.constant 0.001953125 : f32
    %294 = vector.broadcast %cst_118 : f32 to vector<1x16xf32>
    %295 = arith.mulf %278, %294 : vector<1x16xf32>
    %cst_119 = arith.constant 0.001953125 : f32
    %296 = vector.broadcast %cst_119 : f32 to vector<1x16xf32>
    %297 = arith.mulf %293, %296 : vector<1x16xf32>
    %298 = arith.mulf %295, %295 : vector<1x16xf32>
    %299 = arith.subf %297, %298 : vector<1x16xf32>
    %cst_120 = arith.constant 0.000000e+00 : f32
    %300 = vector.broadcast %cst_120 : f32 to vector<1x16xf32>
    %301 = arith.maximumf %299, %300 : vector<1x16xf32>
    %cst_121 = arith.constant 9.99999974E-6 : f32
    %302 = vector.broadcast %cst_121 : f32 to vector<1x16xf32>
    %303 = arith.addf %301, %302 : vector<1x16xf32>
    %304 = math.rsqrt %303 : vector<1x16xf32>
    %305 = arith.mulf %263, %304 : vector<1x16xf32>
    %306 = arith.mulf %295, %305 : vector<1x16xf32>
    %307 = arith.subf %264, %306 : vector<1x16xf32>
    %308 = tpu.concatenate %305, %305, %305, %305, %305, %305, %305, %305, %305, %305, %305, %305, %305, %305, %305, %305 in 1 : vector<1x16xf32>, vector<1x16xf32>, vector<1x16xf32>, vector<1x16xf32>, vector<1x16xf32>, vector<1x16xf32>, vector<1x16xf32>, vector<1x16xf32>, vector<1x16xf32>, vector<1x16xf32>, vector<1x16xf32>, vector<1x16xf32>, vector<1x16xf32>, vector<1x16xf32>, vector<1x16xf32>, vector<1x16xf32> -> vector<1x256xf32>
    %309 = tpu.concatenate %307, %307, %307, %307, %307, %307, %307, %307, %307, %307, %307, %307, %307, %307, %307, %307 in 1 : vector<1x16xf32>, vector<1x16xf32>, vector<1x16xf32>, vector<1x16xf32>, vector<1x16xf32>, vector<1x16xf32>, vector<1x16xf32>, vector<1x16xf32>, vector<1x16xf32>, vector<1x16xf32>, vector<1x16xf32>, vector<1x16xf32>, vector<1x16xf32>, vector<1x16xf32>, vector<1x16xf32>, vector<1x16xf32> -> vector<1x256xf32>
    %310 = vector.broadcast %308 : vector<1x256xf32> to vector<32x256xf32>
    %311 = arith.mulf %262, %310 : vector<32x256xf32>
    %312 = vector.broadcast %309 : vector<1x256xf32> to vector<32x256xf32>
    %313 = arith.addf %311, %312 : vector<32x256xf32>
    %314 = arith.addf %313, %121 : vector<32x256xf32>
    %315 = vector.shape_cast %314 : vector<32x256xf32> to vector<2x16x256xf32>
    %c0_122 = arith.constant 0 : index
    %c3_123 = arith.constant 3 : index
    %c0_124 = arith.constant 0 : index
    %316 = vector.load %arg20[%c0_122, %c3_123, %c0_124] : memref<2x22x256xf32, #tpu.memory_space<vmem>>, vector<2x16x256xf32>
    tpu.vector_store %arg20[%c0_122, %c3_123, %c0_124], %315 {strides = array<i32>} : memref<2x22x256xf32, #tpu.memory_space<vmem>>, vector<2x16x256xf32>,
    %c0_125 = arith.constant 0 : index
    %c0_126 = arith.constant 0 : index
    %c0_127 = arith.constant 0 : index
    %317 = vector.load %arg20[%c0_125, %c0_126, %c0_127] : memref<2x22x256xf32, #tpu.memory_space<vmem>>, vector<2x22x256xf32>
    %318 = vector.extract_strided_slice %317 {offsets = [0, 0, 0], sizes = [2, 16, 256], strides = [1, 1, 1]} : vector<2x22x256xf32> to vector<2x16x256xf32>
    %319 = vector.extract_strided_slice %317 {offsets = [0, 1, 0], sizes = [2, 16, 256], strides = [1, 1, 1]} : vector<2x22x256xf32> to vector<2x16x256xf32>
    %320 = vector.extract_strided_slice %317 {offsets = [0, 2, 0], sizes = [2, 16, 256], strides = [1, 1, 1]} : vector<2x22x256xf32> to vector<2x16x256xf32>
    %321 = vector.extract_strided_slice %317 {offsets = [0, 3, 0], sizes = [2, 16, 256], strides = [1, 1, 1]} : vector<2x22x256xf32> to vector<2x16x256xf32>
    %322 = vector.extract_strided_slice %317 {offsets = [0, 4, 0], sizes = [2, 16, 256], strides = [1, 1, 1]} : vector<2x22x256xf32> to vector<2x16x256xf32>
    %323 = vector.extract_strided_slice %317 {offsets = [0, 5, 0], sizes = [2, 16, 256], strides = [1, 1, 1]} : vector<2x22x256xf32> to vector<2x16x256xf32>
    %324 = vector.extract_strided_slice %317 {offsets = [0, 6, 0], sizes = [2, 16, 256], strides = [1, 1, 1]} : vector<2x22x256xf32> to vector<2x16x256xf32>
    %325 = tpu.concatenate %318, %319, %320, %321, %322, %323, %324 in 2 : vector<2x16x256xf32>, vector<2x16x256xf32>, vector<2x16x256xf32>, vector<2x16x256xf32>, vector<2x16x256xf32>, vector<2x16x256xf32>, vector<2x16x256xf32> -> vector<2x16x1792xf32>
    %326 = vector.shape_cast %325 : vector<2x16x1792xf32> to vector<32x1792xf32>
    %327 = arith.truncf %326 : vector<32x1792xf32> to vector<32x1792xbf16>
    %c0_128 = arith.constant 0 : index
    %c0_129 = arith.constant 0 : index
    %328 = vector.load %arg6[%c0_128, %c0_129] : memref<1792x16xbf16, #tpu.memory_space<vmem>>, vector<1792x16xbf16>
    %cst_130 = arith.constant dense<0.000000e+00> : vector<32x16xf32>
    %329 = tpu.matmul %327, %328, %cst_130 {dimension_numbers = #tpu.dot_dimension_numbers<[1], [0], [0], [1], [0, 0, 1, 1], [], []>} : vector<32x1792xbf16>, vector<1792x16xbf16>, vector<32x16xf32> -> vector<32x16xf32>
    %330 = arith.addf %329, %19 : vector<32x16xf32>
    %331 = vector.shape_cast %330 : vector<32x16xf32> to vector<2x16x16xf32>
    %332 = vector.extract_strided_slice %331 {offsets = [0, 0, 0], sizes = [2, 1, 16], strides = [1, 1, 1]} : vector<2x16x16xf32> to vector<2x1x16xf32>
    %333 = vector.shape_cast %332 : vector<2x1x16xf32> to vector<2x16xf32>
    %334 = vector.extract_strided_slice %331 {offsets = [0, 1, 0], sizes = [2, 1, 16], strides = [1, 1, 1]} : vector<2x16x16xf32> to vector<2x1x16xf32>
    %335 = vector.shape_cast %334 : vector<2x1x16xf32> to vector<2x16xf32>
    %336 = vector.extract_strided_slice %331 {offsets = [0, 2, 0], sizes = [2, 1, 16], strides = [1, 1, 1]} : vector<2x16x16xf32> to vector<2x1x16xf32>
    %337 = vector.shape_cast %336 : vector<2x1x16xf32> to vector<2x16xf32>
    %338 = vector.extract_strided_slice %331 {offsets = [0, 3, 0], sizes = [2, 1, 16], strides = [1, 1, 1]} : vector<2x16x16xf32> to vector<2x1x16xf32>
    %339 = vector.shape_cast %338 : vector<2x1x16xf32> to vector<2x16xf32>
    %340 = vector.extract_strided_slice %331 {offsets = [0, 4, 0], sizes = [2, 1, 16], strides = [1, 1, 1]} : vector<2x16x16xf32> to vector<2x1x16xf32>
    %341 = vector.shape_cast %340 : vector<2x1x16xf32> to vector<2x16xf32>
    %342 = vector.extract_strided_slice %331 {offsets = [0, 5, 0], sizes = [2, 1, 16], strides = [1, 1, 1]} : vector<2x16x16xf32> to vector<2x1x16xf32>
    %343 = vector.shape_cast %342 : vector<2x1x16xf32> to vector<2x16xf32>
    %344 = vector.extract_strided_slice %331 {offsets = [0, 6, 0], sizes = [2, 1, 16], strides = [1, 1, 1]} : vector<2x16x16xf32> to vector<2x1x16xf32>
    %345 = vector.shape_cast %344 : vector<2x1x16xf32> to vector<2x16xf32>
    %346 = vector.extract_strided_slice %331 {offsets = [0, 7, 0], sizes = [2, 1, 16], strides = [1, 1, 1]} : vector<2x16x16xf32> to vector<2x1x16xf32>
    %347 = vector.shape_cast %346 : vector<2x1x16xf32> to vector<2x16xf32>
    %348 = vector.extract_strided_slice %331 {offsets = [0, 8, 0], sizes = [2, 1, 16], strides = [1, 1, 1]} : vector<2x16x16xf32> to vector<2x1x16xf32>
    %349 = vector.shape_cast %348 : vector<2x1x16xf32> to vector<2x16xf32>
    %350 = vector.extract_strided_slice %331 {offsets = [0, 9, 0], sizes = [2, 1, 16], strides = [1, 1, 1]} : vector<2x16x16xf32> to vector<2x1x16xf32>
    %351 = vector.shape_cast %350 : vector<2x1x16xf32> to vector<2x16xf32>
    %352 = vector.extract_strided_slice %331 {offsets = [0, 10, 0], sizes = [2, 1, 16], strides = [1, 1, 1]} : vector<2x16x16xf32> to vector<2x1x16xf32>
    %353 = vector.shape_cast %352 : vector<2x1x16xf32> to vector<2x16xf32>
    %354 = vector.extract_strided_slice %331 {offsets = [0, 11, 0], sizes = [2, 1, 16], strides = [1, 1, 1]} : vector<2x16x16xf32> to vector<2x1x16xf32>
    %355 = vector.shape_cast %354 : vector<2x1x16xf32> to vector<2x16xf32>
    %356 = vector.extract_strided_slice %331 {offsets = [0, 12, 0], sizes = [2, 1, 16], strides = [1, 1, 1]} : vector<2x16x16xf32> to vector<2x1x16xf32>
    %357 = vector.shape_cast %356 : vector<2x1x16xf32> to vector<2x16xf32>
    %358 = vector.extract_strided_slice %331 {offsets = [0, 13, 0], sizes = [2, 1, 16], strides = [1, 1, 1]} : vector<2x16x16xf32> to vector<2x1x16xf32>
    %359 = vector.shape_cast %358 : vector<2x1x16xf32> to vector<2x16xf32>
    %360 = vector.extract_strided_slice %331 {offsets = [0, 14, 0], sizes = [2, 1, 16], strides = [1, 1, 1]} : vector<2x16x16xf32> to vector<2x1x16xf32>
    %361 = vector.shape_cast %360 : vector<2x1x16xf32> to vector<2x16xf32>
    %362 = vector.extract_strided_slice %331 {offsets = [0, 15, 0], sizes = [2, 1, 16], strides = [1, 1, 1]} : vector<2x16x16xf32> to vector<2x1x16xf32>
    %363 = vector.shape_cast %362 : vector<2x1x16xf32> to vector<2x16xf32>
    %364 = tpu.concatenate %333, %335, %337, %339, %341, %343, %345, %347, %349, %351, %353, %355, %357, %359, %361, %363 in 1 : vector<2x16xf32>, vector<2x16xf32>, vector<2x16xf32>, vector<2x16xf32>, vector<2x16xf32>, vector<2x16xf32>, vector<2x16xf32>, vector<2x16xf32>, vector<2x16xf32>, vector<2x16xf32>, vector<2x16xf32>, vector<2x16xf32>, vector<2x16xf32>, vector<2x16xf32>, vector<2x16xf32>, vector<2x16xf32> -> vector<2x256xf32>
    %365 = arith.truncf %364 : vector<2x256xf32> to vector<2x256xbf16>
    %c0_131 = arith.constant 0 : index
    %c0_132 = arith.constant 0 : index
    %366 = vector.load %arg12[%c0_131, %c0_132] : memref<256x32xbf16, #tpu.memory_space<vmem>>, vector<256x32xbf16>
    %cst_133 = arith.constant dense<0.000000e+00> : vector<2x32xf32>
    %367 = tpu.matmul %365, %366, %cst_133 {dimension_numbers = #tpu.dot_dimension_numbers<[1], [0], [0], [1], [0, 0, 1, 1], [], []>} : vector<2x256xbf16>, vector<256x32xbf16>, vector<2x32xf32> -> vector<2x32xf32>
    %c0_134 = arith.constant 0 : index
    %c0_135 = arith.constant 0 : index
    %368 = vector.load %arg13[%c0_134, %c0_135] : memref<1x32xf32, #tpu.memory_space<vmem>>, vector<1x32xf32>
    %369 = vector.broadcast %368 : vector<1x32xf32> to vector<2x32xf32>
    %370 = arith.addf %367, %369 : vector<2x32xf32>
    %371 = arith.truncf %370 : vector<2x32xf32> to vector<2x32xbf16>
    %c0_136 = arith.constant 0 : index
    %c0_137 = arith.constant 0 : index
    %372 = vector.load %arg14[%c0_136, %c0_137] : memref<32x8xbf16, #tpu.memory_space<vmem>>, vector<32x8xbf16>
    %cst_138 = arith.constant dense<0.000000e+00> : vector<2x8xf32>
    %373 = tpu.matmul %371, %372, %cst_138 {dimension_numbers = #tpu.dot_dimension_numbers<[1], [0], [0], [1], [0, 0, 1, 1], [], []>} : vector<2x32xbf16>, vector<32x8xbf16>, vector<2x8xf32> -> vector<2x8xf32>
    %c0_139 = arith.constant 0 : index
    %c0_140 = arith.constant 0 : index
    %374 = vector.load %arg15[%c0_139, %c0_140] : memref<1x8xf32, #tpu.memory_space<vmem>>, vector<1x8xf32>
    %375 = vector.broadcast %374 : vector<1x8xf32> to vector<2x8xf32>
    %376 = arith.addf %373, %375 : vector<2x8xf32>
    %c0_141 = arith.constant 0 : index
    %c0_142 = arith.constant 0 : index
    %377 = vector.load %arg16[%c0_141, %c0_142] : memref<2x8xf32, #tpu.memory_space<vmem>>, vector<2x8xf32>
    tpu.vector_store %arg16[%c0_141, %c0_142], %376 {strides = array<i32>} : memref<2x8xf32, #tpu.memory_space<vmem>>, vector<2x8xf32>,
    return
  }
}

</mosaic_0001>

<bundles_post_ra>
// kernel: tpu_custom_call.1
= control target key start
LH: loop header
LB: loop body
LE: loop exit
PB: predicated region body
PF: predicated region fallthrough
CT: control target
= control target key end

     0   :  { %s10443_s0 = inlined_call_operand.vmem [shape: f32[2,16,16], index: 0, kind: input, shape index: {}]   ;;  %s10444_s1 = inlined_call_operand.vmem [shape: bf16[112,192], index: 1, kind: input, shape index: {}]   ;;  %s10445_s2 = inlined_call_operand.vmem [shape: bf16[192,224], index: 2, kind: input, shape index: {}]   ;;  %s10446_s3 = inlined_call_operand.vmem [shape: bf16[768,256], index: 3, kind: input, shape index: {}]   ;;  %s10447_s4 = inlined_call_operand.hbm [shape: bf16[768,256], index: 4, kind: input, shape index: {}]   ;;  %s10448_s5 = inlined_call_operand.hbm [shape: bf16[768,256], index: 5, kind: input, shape index: {}]   ;;  %s10449_s6 = inlined_call_operand.vmem [shape: bf16[1792,16], index: 6, kind: input, shape index: {}]   ;;  %s10450_s7 = inlined_call_operand.vmem [shape: bf16[16,16], index: 7, kind: input, shape index: {}]   ;;  %s10451_s8 = inlined_call_operand.vmem [shape: bf16[32,32], index: 8, kind: input, shape index: {}]   ;;  %s10452_s9 = inlined_call_operand.vmem [shape: bf16[224,256], index: 9, kind: input, shape index: {}]   ;;  %s10453_s10 = inlined_call_operand.vmem [shape: bf16[32,28], index: 10, kind: input, shape index: {}]   ;;  %s10454_s11 = inlined_call_operand.vmem [shape: f32[8,16], index: 11, kind: input, shape index: {}]   ;;  %s10455_s12 = inlined_call_operand.vmem [shape: bf16[256,32], index: 12, kind: input, shape index: {}]   ;;  %s10456_s13 = inlined_call_operand.hbm [shape: f32[1,32], index: 13, kind: input, shape index: {}]   ;;  %s10457_s14 = inlined_call_operand.vmem [shape: bf16[32,8], index: 14, kind: input, shape index: {}]   ;;  %s10458_s15 = inlined_call_operand.hbm [shape: f32[1,8], index: 15, kind: input, shape index: {}]   ;;  %s10459_s16 = inlined_call_operand.hbm [shape: f32[2,8], index: 16, kind: output, shape index: {}]  }
   0x1   :  { %10467 = sst [smem:[#allocation19_spill]] %s10443_s0 }
   0x2   :  { %21 = vsyncpa [#allocation7], 0 }
   0x3   :  { %22 = vsyncpa [#allocation10], 0 }
   0x4   :  { %23 = vsyncpa [#allocation13], 0 }
   0x5   :  { %24 = vsyncpa [#allocation8], 0  ;;  %s8244_s21 = smov [#allocation9]   ;;  %s8245_s23 = smov [#allocation6]  }
   0x6   :  { %s50_s22 = sshll.u32 %s8244_s21, 4  ;;  %s38_s24 = sshll.u32 %s8245_s23, 4  ;;  %s51_s22 = int_to_ptr.vmem [resolvable:$true] %s50_s22  ;;  %s39_s24 = int_to_ptr.vmem [resolvable:$true] %s38_s24 }
   0x7   :  { %s8144_s25 = scalar_lea.vmem %s51_s22, 12288  ;;  %p8149_p1 = scmp.lt.s32.totalorder %s51_s22, %s51_s22 }
   0x8   :  { %p8145_p0 = scmp.ne.s32.totalorder %s51_s22, %s8144_s25  ;;  %p8150_p2 = scmp.lt.s32.totalorder %s8144_s25, %s8144_s25 }
   0xa   :  { %p8151_p3 = por %p8150_p2, %p8149_p1 }
   0xc   :  { %p8152_p4 = pnand %p8151_p3, %p8145_p0 }
   0xe   :  { %8155 = shalt.err (!%p8152_p4)
}
   0xf   :  { %s8246_s26 = smov 128   ;;  %s8247_s27 = smov 8  }
  0x10   :  { %56 = dma.hbm_to_vmem [thread:$0]  %s10448_s5, 12288, %s51_s22, [#allocation10], %s8246_s26, %s8246_s26, %s8247_s27  }
  0x11   :  { %s8164_s30 = scalar_lea.vmem %s39_s24, 12288  ;;  %p8169_p6 = scmp.lt.s32.totalorder %s39_s24, %s39_s24 }
  0x12   :  { %p8165_p5 = scmp.ne.s32.totalorder %s39_s24, %s8164_s30  ;;  %p8170_p7 = scmp.lt.s32.totalorder %s8164_s30, %s8164_s30 }
  0x14   :  { %p8171_p8 = por %p8170_p7, %p8169_p6 }
  0x16   :  { %p8172_p9 = pnand %p8171_p8, %p8165_p5 }
  0x18   :  { %8175 = shalt.err (!%p8172_p9)
}
  0x19   :  { %44 = dma.hbm_to_vmem [thread:$0]  %s10447_s4, 12288, %s39_s24, [#allocation7], %s8246_s26, %s8246_s26, %s8247_s27  }
  0x1a   :  { %s8248_s18 = smov [#allocation11]   ;;  %s8249_s20 = smov [#allocation12]  }
  0x1b   :  { %s77_s19 = sshll.u32 %s8248_s18, 4  ;;  %s89_s21 = sshll.u32 %s8249_s20, 4  ;;  %s78_s19 = int_to_ptr.vmem [resolvable:$true] %s77_s19  ;;  %s90_s21 = int_to_ptr.vmem [resolvable:$true] %s89_s21 }
  0x1c   :  { %s8184_s23 = scalar_lea.vmem %s78_s19, 16  ;;  %s8188_s5 = scalar_lea.vmem %s78_s19, 32 }
  0x1d   :  { %p8185_p10 = scmp.ne.s32.totalorder %s78_s19, %s8184_s23  ;;  %p8189_p11 = scmp.lt.s32.totalorder %s78_s19, %s78_s19 }
  0x1e   :  { %p8190_p12 = scmp.lt.s32.totalorder %s8188_s5, %s8184_s23 }
  0x20   :  { %p8191_p13 = por %p8190_p12, %p8189_p11 }
  0x22   :  { %p8192_p0 = pnand %p8191_p13, %p8185_p10 }
  0x24   :  { %8195 = shalt.err (!%p8192_p0)
}
  0x25   :  { %80 = dma.hbm_to_vmem [thread:$0]  %s10456_s13, 16, %s78_s19, [#allocation10]  }
  0x26   :  { %s8204_s28 = scalar_lea.vmem %s90_s21, 16  ;;  %s8208_s4 = scalar_lea.vmem %s90_s21, 32 }
  0x27   :  { %p8205_p1 = scmp.ne.s32.totalorder %s90_s21, %s8204_s28  ;;  %p8209_p2 = scmp.lt.s32.totalorder %s90_s21, %s90_s21 }
  0x28   :  { %p8210_p3 = scmp.lt.s32.totalorder %s8208_s4, %s8204_s28 }
  0x2a   :  { %p8211_p4 = por %p8210_p3, %p8209_p2 }
  0x2c   :  { %p8212_p5 = pnand %p8211_p4, %p8205_p1 }
  0x2e   :  { %8215 = shalt.err (!%p8212_p5)
}
  0x2f   :  { %92 = dma.hbm_to_vmem [thread:$0]  %s10458_s15, 16, %s90_s21, [#allocation13]  }
  0x30   :  { %8236 = dma.done.wait [#allocation7], 12288  }
  0x31   :  { %8237 = vsyncadd [#allocation7], 4294955008 }
  0x32   :  { %8238 = dma.done.wait [#allocation10], 12304  }
  0x33   :  { %8239 = vsyncadd [#allocation10], 4294954992 }
  0x34   :  { %8240 = dma.done.wait [#allocation13], 16  }
  0x35   :  { %8241 = vsyncadd [#allocation13], 4294967280  ;;  %vm106_vm0 = vcmask 122880   ;;  %v8250_v0 = vmov 0.0   ;;  %vm161_vm1 = vcmask 130048   ;;  %s10468_s27 = sld [smem:[#allocation19_spill]] }
  0x36   :  { %107 = vst.msk [vmem:[#allocation2] sm:$0x1] %vm106_vm0, %v8250_v0  ;;  %108 = vst.msk [vmem:[#allocation2 + $0x18] sm:$0x1] %vm106_vm0, %v8250_v0  ;;  %v7448_v6 = vld [vmem:[%s10450_s7] sm:$0xff]   ;;  %vm303_vm2 = vcmask 1046528  }
  0x37   :  { %109 = vst.msk [vmem:[#allocation2 + $0x11] sm:$0x1] %vm106_vm0, %v8250_v0  ;;  %110 = vst.msk [vmem:[#allocation2 + $0x29] sm:$0x1] %vm106_vm0, %v8250_v0  ;;  %7373 = vmatprep.subr.bf16.mxu0 %v7448_v6  ;;  %v7451_v8 = vld [vmem:[%s10444_s1 + $0x64] ss:$8 sps:$4 sm:$0xff]  }
  0x38   :  { %139 = vst [vmem:[#allocation5 + $0x50] sm:$0x7] %v8250_v0  ;;  %140 = vst [vmem:[#allocation5] sm:$0x7] %v8250_v0  ;;  %7374 = vmatpush3.bf16.msra.mxu0 %v7448_v6  ;;  %v7449_v9 = vld [vmem:[%s10444_s1 + $0x60] ss:$8 sps:$4 sm:$0xff]  }
  0x39   :  { %141 = vst [vmem:[#allocation5 + $0x48] sm:$0x7] %v8250_v0  ;;  %142 = vst [vmem:[#allocation5 + $0x38] sm:$0x7] %v8250_v0  ;;  %562 = vmatprep.subr.bf16.mxu0 %v7451_v8  ;;  %s8251_s7 = smov 48   ;;  %s8252_s28 = smov 16  }
  0x3a   :  { %143 = vst [vmem:[#allocation5 + $0x40] sm:$0x38] %v8250_v0  ;;  %144 = vst [vmem:[#allocation5 + $0x20] sm:$0x38] %v8250_v0  ;;  %v7452_v22 = vld [vmem:[%s10444_s1 + $0x50] ss:$8 sps:$4 sm:$0xff]  }
  0x3b   :  { %145 = vst [vmem:[#allocation5 + $0x8] sm:$0x38] %v8250_v0  ;;  %146 = vst [vmem:[#allocation5 + $0x58] sm:$0x38] %v8250_v0  ;;  %v147_v1 = vld [vmem:[%s10468_s27] sm:$0xff]  ;;  %v148_v2 = vld [vmem:[%s10468_s27 + $0x8] sm:$0xff] }
  0x3c   :  { %v149_v3 = vld [vmem:[%s10468_s27 + $0x10] sm:$0xff]  ;;  %289 = vst.msk [vmem:[#allocation2 + $0x1] sm:$0xff] %vm161_vm1, %v147_v1  ;;  %290 = vst.msk [vmem:[#allocation2 + $0x9] sm:$0xff] %vm161_vm1, %v148_v2  ;;  %v150_v4 = vld [vmem:[%s10468_s27 + $0x18] sm:$0xff]  ;;  %v151_v5 = vpack.c.bf16 %v148_v2, %v147_v1  ;;  %vm322_vm3 = vcmask 1045504   ;;  %s8253_s0 = smov 32  }
  0x3d   :  { %291 = vst.msk [vmem:[#allocation2 + $0x19] sm:$0xff] %vm161_vm1, %v149_v3  ;;  %292 = vst.msk [vmem:[#allocation2 + $0x21] sm:$0xff] %vm161_vm1, %v150_v4  ;;  %v152_v7 = vpack.c.bf16 %v150_v4, %v149_v3  ;;  %v7454_v23 = vld [vmem:[%s10444_s1 + $0x54] ss:$8 sps:$4 sm:$0xff]   ;;  %v7457_v24 = vld [vmem:[%s10444_s1 + $0x44] ss:$8 sps:$4 sm:$0xff]  }
  0x3e   :  { %7375 = vmatprep.mubr.msk.bf16.mxu0 %vm161_vm1, %v151_v5  ;;  %v7455_v25 = vld [vmem:[%s10444_s1 + $0x40] ss:$8 sps:$4 sm:$0xff]   ;;  %vm10464_vm4 = vcmask 1043456   ;;  %vm10461_vm5 = vcmask 1044480   ;;  %v7460_v31 = vld [vmem:[%s10444_s1 + $0x34] ss:$8 sps:$4 sm:$0xff]  }
  0x3f   :  { %7376 = vmatmul.mubr.msk.bf16.vlgmr.msra.gmra.mxu0 %vm161_vm1, %v152_v7  ;;  %v7458_v32 = vld [vmem:[%s10444_s1 + $0x30] ss:$8 sps:$4 sm:$0xff]   ;;  %v7463_v39 = vld [vmem:[%s10444_s1 + $0x24] ss:$8 sps:$4 sm:$0xff]   ;;  %v7461_v40 = vld [vmem:[%s10444_s1 + $0x20] ss:$8 sps:$4 sm:$0xff]  }
  0x40   :  { %563 = vmatpush1.bf16.msra.mxu0 %v7449_v9  ;;  %s8254_s25 = smov 64   ;;  %vm10463_vm6 = vcmask 1042432   ;;  %v7466_v45 = vld [vmem:[%s10444_s1 + $0x14] ss:$8 sps:$4 sm:$0xff]   ;;  %v7464_v46 = vld [vmem:[%s10444_s1 + $0x10] ss:$8 sps:$4 sm:$0xff]  }
  0x41   :  { %564 = vmatprep.subr.bf16.mxu0 %v7454_v23  ;;  %vm10462_vm7 = vcmask 1041408   ;;  %v7469_v53 = vld [vmem:[%s10444_s1 + $0x4] ss:$8 sps:$4 sm:$0xff]   ;;  %v7467_v54 = vld [vmem:[%s10444_s1] ss:$8 sps:$4 sm:$0xff]   ;;  %s8255_s17 = smov 80  }
  0x42   :  { %v8256_v60 = vmov 0   ;;  %s8257_s1 = smov 96   ;;  %vm233_vm8 = vcmask 261120   ;;  %vm435_vm9 = vcmask 392192   ;;  %vm440_vm10 = vcmask 523264  }
  0x43   :  { %v8397_v10 = vld [vmem:[#allocation2 + $0x8] sm:$0xff]  ;;  %v8399_v11 = vld [vmem:[#allocation2] sm:$0xff]  ;;  %v295_v48 = vld [vmem:[#allocation2 + $0x10] sm:$0x3]  ;;  %592 = vmatprep.mubr.bf16.mxu0 %v8256_v60  ;;  %vm445_vm11 = vcmask 654336   ;;  %vm10466_vm12 = vcmask 785408  }
  0x44   :  { %v8401_v12 = vld [vmem:[#allocation2 + $0x18] sm:$0xff]  ;;  %v343_v13 = vrot.slane %v8397_v10, 3  ;;  %v305_v14 = vrot.slane %v8397_v10, 1  ;;  %v304_v15 = vrot.slane %v8399_v11, 1  ;;  %v8407_v16 = vld [vmem:[#allocation2 + $0x20] sm:$0xff]  ;;  %v324_v17 = vrot.slane %v8397_v10, 2  ;;  %565 = vmatpush1.bf16.msra.mxu0 %v7452_v22 }
  0x45   :  { %v307_v18 = vrot.slane %v8401_v12, 1  ;;  %v308_v20 = vrot.slane %v8407_v16, 1  ;;  %v323_v21 = vrot.slane %v8399_v11, 2  ;;  %v361_v26 = vrot.slane %v8399_v11, 4  ;;  %566 = vmatprep.subr.bf16.mxu0 %v7457_v24  ;;  %v298_v5 = vld [vmem:[#allocation2 + $0x28] sm:$0x3] }
  0x46   :  { %350 = vrot.lane.b32.xlu0 %v343_v13, %s8251_s7  ;;  %312 = vrot.lane.b32.xlu1 %v305_v14, %s8252_s28  ;;  %v306_v19 = vsel %vm303_vm2, %v304_v15, %v305_v14  ;;  %v362_v29 = vrot.slane %v8397_v10, 4  ;;  %v342_v30 = vrot.slane %v8399_v11, 3  ;;  %v345_v33 = vrot.slane %v8401_v12, 3 }
  0x47   :  { %v309_v27 = vsel %vm303_vm2, %v307_v18, %v308_v20  ;;  %v325_v28 = vsel %vm322_vm3, %v323_v21, %v324_v17  ;;  %v346_v34 = vrot.slane %v8407_v16, 3  ;;  %v326_v37 = vrot.slane %v8401_v12, 2 }
  0x48   :  { %v363_v35 = vsel %vm10464_vm4, %v361_v26, %v362_v29  ;;  %v344_v36 = vsel %vm10461_vm5, %v342_v30, %v343_v13  ;;  %v327_v38 = vrot.slane %v8407_v16, 2  ;;  %567 = vmatpush1.bf16.msra.mxu0 %v7455_v25  ;;  %v382_v43 = vrot.slane %v8399_v11, 5  ;;  %v8133_v30 = vld [vmem:[#allocation2 + $0x8] sm:$0xff] }
  0x49   :  { %568 = vmatprep.subr.bf16.mxu0 %v7460_v31  ;;  %v347_v41 = vsel %vm10461_vm5, %v345_v33, %v346_v34  ;;  %v383_v44 = vrot.slane %v8397_v10, 5  ;;  %v405_v47 = vrot.slane %v8399_v11, 6  ;;  %v406_v50 = vrot.slane %v8397_v10, 6  ;;  %v7470_v10 = vld [vmem:[%s10451_s8] sm:$0xff]  }
  0x4a   :  { %331 = vrot.lane.b32.xlu1 %v324_v17, %s8253_s0  ;;  %310 = vrot.lane.b32.xlu0 %v306_v19, %s8252_s28  ;;  %v328_v42 = vsel %vm322_vm3, %v326_v37, %v327_v38  ;;  %v364_v51 = vrot.slane %v8401_v12, 4  ;;  %v365_v52 = vrot.slane %v8407_v16, 4  ;;  %v387_v55 = vrot.slane %v8401_v12, 5 }
  0x4b   :  { %v384_v49 = vsel %vm10463_vm6, %v382_v43, %v383_v44  ;;  %v407_v56 = vsel %vm10462_vm7, %v405_v47, %v406_v50  ;;  %v388_v58 = vrot.slane %v8407_v16, 5  ;;  %v385_v59 = vrot.slane %v295_v48, 5  ;;  %7383 = vmatprep.mubr.msk.bf16.mxu1 %vm233_vm8, %v7470_v10 }
  0x4c   :  { %569 = vmatpush1.bf16.msra.mxu0 %v7458_v32  ;;  %v366_v57 = vsel %vm10464_vm4, %v364_v51, %v365_v52  ;;  %v410_v61 = vrot.slane %v8401_v12, 6  ;;  %v411_v1 = vrot.slane %v8407_v16, 6  ;;  %v408_v2 = vrot.slane %v295_v48, 6  ;;  %v8134_v32 = vld [vmem:[#allocation2 + $0x18] sm:$0xff] }
  0x4d   :  { %570 = vmatprep.subr.bf16.mxu0 %v7463_v39  ;;  %v389_v62 = vsel %vm10463_vm6, %v387_v55, %v388_v58  ;;  %v386_v63 = vsel %vm10463_vm6, %v383_v44, %v385_v59  ;;  %v390_v6 = vrot.slane %v298_v5, 5  ;;  %v413_v7 = vrot.slane %v298_v5, 6  ;;  %v8135_v55 = vld [vmem:[#allocation2 + $0x20] sm:$0xff] }
  0x4e   :  { %314 = vrot.lane.b32.xlu1 %v309_v27, %s8252_s28  ;;  %329 = vrot.lane.b32.xlu0 %v325_v28, %s8253_s0  ;;  %v412_v3 = vsel %vm10462_vm7, %v410_v61, %v411_v1  ;;  %v409_v4 = vsel %vm10462_vm7, %v406_v50, %v408_v2  ;;  %vm10465_vm13 = vcmask 916480  }
  0x4f   :  { %v391_v8 = vsel %vm10463_vm6, %v388_v58, %v390_v6  ;;  %v414_v9 = vsel %vm10462_vm7, %v411_v1, %v413_v7 }
  0x50   :  { %571 = vmatpush1.bf16.msra.mxu0 %v7461_v40 }
  0x51   :  { %572 = vmatprep.subr.bf16.mxu0 %v7466_v45 }
  0x52   :  { %367 = vrot.lane.b32.xlu1 %v363_v35, %s8254_s25  ;;  %348 = vrot.lane.b32.xlu0 %v344_v36, %s8251_s7 }
  0x54   :  { %573 = vmatpush1.bf16.msra.mxu0 %v7464_v46 }
  0x55   :  { %574 = vmatprep.subr.bf16.mxu0 %v7469_v53 }
  0x56   :  { %352 = vrot.lane.b32.xlu1 %v347_v41, %s8251_s7  ;;  %333 = vrot.lane.b32.xlu0 %v328_v42, %s8253_s0 }
  0x58   :  { %575 = vmatpush1.bf16.msra.mxu0 %v7467_v54 }
  0x5a   :  { %369 = vrot.lane.b32.xlu1 %v362_v29, %s8254_s25  ;;  %392 = vrot.lane.b32.xlu0 %v384_v49, %s8255_s17 }
  0x5e   :  { %415 = vrot.lane.b32.xlu1 %v407_v56, %s8257_s1  ;;  %371 = vrot.lane.b32.xlu0 %v366_v57, %s8254_s25 }
  0x62   :  { %396 = vrot.lane.b32.xlu1 %v389_v62, %s8255_s17  ;;  %394 = vrot.lane.b32.xlu0 %v386_v63, %s8255_s17 }
  0x66   :  { %419 = vrot.lane.b32.xlu1 %v412_v3, %s8257_s1  ;;  %417 = vrot.lane.b32.xlu0 %v409_v4, %s8257_s1 }
  0x6a   :  { %316 = vrot.lane.b32.xlu0 %v308_v20, %s8252_s28  ;;  %335 = vrot.lane.b32.xlu1 %v327_v38, %s8253_s0 }
  0x6e   :  { %354 = vrot.lane.b32.xlu0 %v346_v34, %s8251_s7  ;;  %373 = vrot.lane.b32.xlu1 %v365_v52, %s8254_s25 }
  0x72   :  { %398 = vrot.lane.b32.xlu0 %v391_v8, %s8255_s17  ;;  %421 = vrot.lane.b32.xlu1 %v414_v9, %s8257_s1 }
  0xb8   :  { %v351_v12 = vpop.permute.xlu0 %350  ;;  %v313_v13 = vpop.permute.xlu1 %312 }
  0xb9   :  { %v428_v31 = vsel %vm161_vm1, %v8133_v30, %v313_v13  ;;  %v7495_v30 = vld [vmem:[%s10445_s2 + $0x4] ss:$8 sps:$4 sm:$0xff]  }
  0xbc   :  { %v332_v14 = vpop.permute.xlu1 %331  ;;  %v311_v15 = vpop.permute.xlu0 %310 }
  0xbd   :  { %v427_v22 = vsel %vm161_vm1, %v8399_v11, %v311_v15  ;;  %v432_v11 = vsel %vm233_vm8, %v428_v31, %v332_v14  ;;  %v7474_v14 = vld [vmem:[%s10445_s2 + $0x74] ss:$8 sps:$4 sm:$0xff]   ;;  %v7471_v15 = vld [vmem:[%s10451_s8 + $0x8] sm:$0xff]  }
  0xbe   :  { %v437_v39 = vsel %vm435_vm9, %v432_v11, %v351_v12  ;;  %v7493_v31 = vld [vmem:[%s10445_s2] ss:$8 sps:$4 sm:$0xff]  }
  0xbf   :  { %v7499_v11 = vld [vmem:[%s10445_s2 + $0xa0] ss:$8 sps:$4 sm:$0xff]  }
  0xc0   :  { %v315_v16 = vpop.permute.xlu1 %314  ;;  %v330_v17 = vpop.permute.xlu0 %329 }
  0xc1   :  { %v431_v25 = vsel %vm233_vm8, %v427_v22, %v330_v17  ;;  %v429_v33 = vsel %vm161_vm1, %v8134_v32, %v315_v16  ;;  %v7472_v16 = vld [vmem:[%s10445_s2 + $0x70] ss:$8 sps:$4 sm:$0xff]   ;;  %v7477_v17 = vld [vmem:[%s10445_s2 + $0x64] ss:$8 sps:$4 sm:$0xff]  }
  0xc2   :  { %v7483_v22 = vld [vmem:[%s10445_s2 + $0x44] ss:$8 sps:$4 sm:$0xff]   ;;  %v7496_v32 = vld [vmem:[%s10445_s2 + $0xb0] ss:$8 sps:$4 sm:$0xff]  }
  0xc4   :  { %v368_v18 = vpop.permute.xlu1 %367  ;;  %v349_v19 = vpop.permute.xlu0 %348 }
  0xc5   :  { %v436_v26 = vsel %vm435_vm9, %v431_v25, %v349_v19  ;;  %v7480_v19 = vld [vmem:[%s10445_s2 + $0x54] ss:$8 sps:$4 sm:$0xff]   ;;  %v7484_v25 = vld [vmem:[%s10445_s2 + $0x30] ss:$8 sps:$4 sm:$0xff]  }
  0xc6   :  { %v441_v29 = vsel %vm440_vm10, %v436_v26, %v368_v18  ;;  %v7475_v18 = vld [vmem:[%s10445_s2 + $0x60] ss:$8 sps:$4 sm:$0xff]   ;;  %v7489_v26 = vld [vmem:[%s10445_s2 + $0x24] ss:$8 sps:$4 sm:$0xff]  }
  0xc8   :  { %v353_v20 = vpop.permute.xlu1 %352  ;;  %v334_v21 = vpop.permute.xlu0 %333 }
  0xc9   :  { %v433_v35 = vsel %vm233_vm8, %v429_v33, %v334_v21  ;;  %v7478_v21 = vld [vmem:[%s10445_s2 + $0x50] ss:$8 sps:$4 sm:$0xff]   ;;  %v7498_v33 = vld [vmem:[%s10445_s2 + $0xb4] ss:$8 sps:$4 sm:$0xff]  }
  0xca   :  { %v438_v41 = vsel %vm435_vm9, %v433_v35, %v353_v20  ;;  %v111_v20 = vlaneseq  ;;  %v7504_v35 = vld [vmem:[%s10445_s2 + $0x94] ss:$8 sps:$4 sm:$0xff]  }
  0xcc   :  { %v370_v23 = vpop.permute.xlu1 %369  ;;  %v393_v24 = vpop.permute.xlu0 %392  ;;  %vm113_vm14 = vcmp.lt.s32.totalorder %v111_v20, 192 }
  0xcd   :  { %v446_v34 = vsel %vm445_vm11, %v441_v29, %v393_v24  ;;  %v442_v42 = vsel %vm440_vm10, %v437_v39, %v370_v23  ;;  %115 = vst.msk [vmem:[#allocation3] ss:$8 sm:$0x3] %vm113_vm14, %v8250_v0  ;;  %118 = vst.msk [vmem:[#allocation3 + $0x20] ss:$8 sm:$0x3] %vm113_vm14, %v8250_v0 }
  0xce   :  { %121 = vst.msk [vmem:[#allocation3 + $0x15] ss:$8 sm:$0x3] %vm113_vm14, %v8250_v0  ;;  %124 = vst.msk [vmem:[#allocation3 + $0x35] ss:$8 sm:$0x3] %vm113_vm14, %v8250_v0 }
  0xcf   :  { %v7481_v23 = vld [vmem:[%s10445_s2 + $0x40] ss:$8 sps:$4 sm:$0xff]   ;;  %v7486_v24 = vld [vmem:[%s10445_s2 + $0x34] ss:$8 sps:$4 sm:$0xff]   ;;  %v7490_v29 = vld [vmem:[%s10445_s2 + $0x10] ss:$8 sps:$4 sm:$0xff]  }
  0xd0   :  { %v416_v27 = vpop.permute.xlu1 %415  ;;  %v372_v28 = vpop.permute.xlu0 %371  ;;  %vm669_vm14 = vcmask 523265  }
  0xd1   :  { %v451_v36 = vsel %vm10466_vm12, %v446_v34, %v416_v27  ;;  %v443_v43 = vsel %vm440_vm10, %v438_v41, %v372_v28  ;;  %v7487_v27 = vld [vmem:[%s10445_s2 + $0x20] ss:$8 sps:$4 sm:$0xff]   ;;  %v7492_v28 = vld [vmem:[%s10445_s2 + $0x14] ss:$8 sps:$4 sm:$0xff]   ;;  %v7501_v34 = vld [vmem:[%s10445_s2 + $0xa4] ss:$8 sps:$4 sm:$0xff]  }
  0xd2   :  { %v459_v40 = vcombine.high %v451_v36, %v451_v36 }
  0xd4   :  { %v397_v37 = vpop.permute.xlu1 %396  ;;  %v395_v38 = vpop.permute.xlu0 %394  ;;  %v461_v50 = vcombine.low %v451_v36, %v459_v40  ;;  %v7502_v36 = vld [vmem:[%s10445_s2 + $0x90] ss:$8 sps:$4 sm:$0xff]  }
  0xd5   :  { %v448_v44 = vsel %vm445_vm11, %v443_v43, %v397_v37  ;;  %v447_v45 = vsel %vm445_vm11, %v442_v42, %v395_v38  ;;  %v7507_v37 = vld [vmem:[%s10445_s2 + $0x84] ss:$8 sps:$4 sm:$0xff]   ;;  %v7505_v38 = vld [vmem:[%s10445_s2 + $0x80] ss:$8 sps:$4 sm:$0xff]   ;;  %s8259_s2 = smov 112  }
  0xd8   :  { %v420_v46 = vpop.permute.xlu1 %419  ;;  %v418_v47 = vpop.permute.xlu0 %417 }
  0xd9   :  { %v453_v48 = vsel %vm10466_vm12, %v448_v44, %v420_v46  ;;  %v452_v49 = vsel %vm10466_vm12, %v447_v45, %v418_v47 }
  0xda   :  { %v462_v51 = vcombine.low %v452_v49, %v453_v48  ;;  %v460_v2 = vcombine.high %v453_v48, %v453_v48 }
  0xdc   :  { %v467_v52 = vpack.c.bf16 %v462_v51, %v461_v50  ;;  %v317_v53 = vpop.permute.xlu0 %316  ;;  %v336_v54 = vpop.permute.xlu1 %335 }
  0xdd   :  { %v430_v56 = vsel %vm161_vm1, %v8135_v55, %v317_v53  ;;  %v8258_v53 = vmov 1983009808  }
  0xde   :  { %6657 = vmatmul.mubr.msk.bf16.vlgmr.msra.gmra.mxu0 %vm10465_vm13, %v467_v52  ;;  %v434_v57 = vsel %vm233_vm8, %v430_v56, %v336_v54  ;;  %v697_v54 = vunpack.c.l.s4 %v8258_v53 }
  0xdf   :  { %602 = vmatprep.mubr.bf16.mxu0 %v8256_v60 }
  0xe0   :  { %v355_v58 = vpop.permute.xlu0 %354  ;;  %v374_v59 = vpop.permute.xlu1 %373 }
  0xe1   :  { %v439_v61 = vsel %vm435_vm9, %v434_v57, %v355_v58 }
  0xe2   :  { %v444_v62 = vsel %vm440_vm10, %v439_v61, %v374_v59  ;;  %v698_v61 = vunpack.c.0.s8 %v697_v54 }
  0xe4   :  { %v399_v63 = vpop.permute.xlu0 %398  ;;  %v422_v1 = vpop.permute.xlu1 %421 }
  0xe5   :  { %v449_v3 = vsel %vm445_vm11, %v444_v62, %v399_v63  ;;  %v8630_v62 = vshrl.u32 %v111_v20, 7 }
  0xe6   :  { %v454_v4 = vsel %vm10466_vm12, %v449_v3, %v422_v1 }
  0xe7   :  { %v463_v5 = vcombine.low %v460_v2, %v454_v4 }
  0xe9   :  { %v468_v6 = vpack.c.bf16 %v463_v5, %v463_v5 }
  0xeb   :  { %6658 = vmatmul.mubr.msk.bf16.gmra.mxu0 %vm10465_vm13, %v468_v6 }
  0xff   :  { %v7377_v7 = vpop.f32.mrf.mxu0 }
 0x101   :  { %v202_v8 = vpop.f32.mrf.mxu0 }
 0x103   :  { %v7378_v9 = vpop.f32.mrf.mxu0 }
 0x104   :  { %v222_v10 = vpack.c.bf16 %v7378_v9, %v7377_v7 }
 0x105   :  { %v205_v12 = vpop.f32.mrf.mxu0 }
 0x106   :  { %7379 = vmatprep.subr.bf16.mxu1 %v222_v10  ;;  %v221_v13 = vpack.c.bf16 %v205_v12, %v202_v8  ;;  %v701_v12 = vsub.s32 %v698_v61, %v8630_v62 }
 0x107   :  { %7380 = vmatpush3.bf16.msra.mxu1 %v222_v10 }
 0x108   :  { %7381 = vmatprep.subr.bf16.mxu1 %v221_v13 }
 0x10b   :  { %7382 = vmatpush3.bf16.msra.mxu1 %v221_v13 }
 0x10c   :  { %989 = vmatprep.subr.bf16.mxu1 %v7474_v14 }
 0x10e   :  { %7384 = vmatmul.mubr.msk.bf16.vlgmr.msra.gmra.mxu1 %vm233_vm8, %v7471_v15 }
 0x10f   :  { %990 = vmatpush1.bf16.msra.mxu1 %v7472_v16 }
 0x110   :  { %991 = vmatprep.subr.bf16.mxu1 %v7477_v17 }
 0x113   :  { %992 = vmatpush1.bf16.msra.mxu1 %v7475_v18 }
 0x114   :  { %993 = vmatprep.subr.bf16.mxu1 %v7480_v19 }
 0x117   :  { %994 = vmatpush1.bf16.msra.mxu1 %v7478_v21 }
 0x118   :  { %995 = vmatprep.subr.bf16.mxu1 %v7483_v22 }
 0x11b   :  { %996 = vmatpush1.bf16.msra.mxu1 %v7481_v23 }
 0x11c   :  { %997 = vmatprep.subr.bf16.mxu1 %v7486_v24 }
 0x11f   :  { %998 = vmatpush1.bf16.msra.mxu1 %v7484_v25 }
 0x120   :  { %999 = vmatprep.subr.bf16.mxu1 %v7489_v26 }
 0x123   :  { %1000 = vmatpush1.bf16.msra.mxu1 %v7487_v27 }
 0x124   :  { %1001 = vmatprep.subr.bf16.mxu1 %v7492_v28 }
 0x127   :  { %1002 = vmatpush1.bf16.msra.mxu1 %v7490_v29 }
 0x128   :  { %1003 = vmatprep.subr.bf16.mxu1 %v7495_v30 }
 0x12b   :  { %1004 = vmatpush1.bf16.msra.mxu1 %v7493_v31 }
 0x12c   :  { %1013 = vmatprep.subr.bf16.mxu1 %v7498_v33 }
 0x12f   :  { %1014 = vmatpush2.bf16.msra.mxu1 %v7496_v32 }
 0x130   :  { %1015 = vmatprep.subr.bf16.mxu1 %v7501_v34 }
 0x133   :  { %1016 = vmatpush2.bf16.msra.mxu1 %v7499_v11 }
 0x134   :  { %1017 = vmatprep.subr.bf16.mxu1 %v7504_v35 }
 0x137   :  { %1018 = vmatpush2.bf16.msra.mxu1 %v7502_v36 }
 0x138   :  { %1019 = vmatprep.subr.bf16.mxu1 %v7507_v37 }
 0x13b   :  { %1020 = vmatpush2.bf16.msra.mxu1 %v7505_v38 }
 0x19e   :  { %v594_v39 = vpop.f32.mrf.mxu0 }
 0x19f   :  { %vm611_vm15 = vcmp.ge.f32.partialorder %v594_v39, 0.0  ;;  %v617_v40 = vmul.f32 0.1, %v594_v39 }
 0x1a0   :  { %v596_v41 = vpop.f32.mrf.mxu0 }
 0x1a1   :  { %v623_v42 = vsel %vm611_vm15, %v594_v39, %v617_v40  ;;  %vm612_vm0 = vcmp.ge.f32.partialorder %v596_v41, 0.0  ;;  %v618_v43 = vmul.f32 0.1, %v596_v41  ;;  %vm647_vm15 = vcmask 1040384  }
 0x1a2   :  { %v648_v44 = vrot.slane %v623_v42, 7  ;;  %v598_v45 = vpop.f32.mrf.mxu0 }
 0x1a3   :  { %v624_v46 = vsel %vm612_vm0, %v596_v41, %v618_v43  ;;  %v619_v47 = vmul.f32 0.1, %v598_v45  ;;  %vm613_vm5 = vcmp.ge.f32.partialorder %v598_v45, 0.0  ;;  %vm672_vm0 = vcmask 520192  }
 0x1a4   :  { %668 = vst [vmem:[#allocation3] sm:$0xfe] %v648_v44  ;;  %v649_v48 = vrot.slane %v624_v46, 7  ;;  %v600_v49 = vpop.f32.mrf.mxu0 }
 0x1a5   :  { %vm614_vm7 = vcmp.ge.f32.partialorder %v600_v49, 0.0  ;;  %v620_v50 = vmul.f32 0.1, %v600_v49  ;;  %v625_v51 = vsel %vm613_vm5, %v598_v45, %v619_v47 }
 0x1a6   :  { %670 = vst.msk [vmem:[#allocation3 + $0x8] sm:$0xfe] %vm669_vm14, %v649_v48 }
 0x1a7   :  { %v626_v52 = vsel %vm614_vm7, %v600_v49, %v620_v50 }
 0x1a8   :  { %v637_v55 = vcombine.low %v625_v51, %v626_v52  ;;  %v6659_v56 = vcombine.low %v626_v52, %v626_v52  ;;  %v638_v3 = vcombine.high %v625_v51, %v626_v52 }
 0x1aa   :  { %v650_v57 = vrot.slane %v637_v55, 7  ;;  %v652_v58 = vrot.slane %v6659_v56, 7 }
 0x1ab   :  { %v604_v59 = vpop.f32.mrf.mxu0 }
 0x1ac   :  { %v651_v63 = vsel %vm647_vm15, %v648_v44, %v650_v57  ;;  %v653_v1 = vsel %vm647_vm15, %v649_v48, %v652_v58  ;;  %vm615_vm6 = vcmp.ge.f32.partialorder %v604_v59, 0.0  ;;  %v621_v2 = vmul.f32 0.1, %v604_v59 }
 0x1ad   :  { %671 = vst [vmem:[#allocation3 + $0x10] sm:$0x1f] %v651_v63  ;;  %673 = vst.msk [vmem:[#allocation3 + $0x18] sm:$0x1f] %vm672_vm0, %v653_v1  ;;  %v606_v4 = vpop.f32.mrf.mxu0  ;;  %v7508_v10 = vld [vmem:[#allocation3] ss:$8 sps:$4 sm:$0xff]  }
 0x1ae   :  { %v627_v5 = vsel %vm615_vm6, %v604_v59, %v621_v2  ;;  %vm616_vm5 = vcmp.ge.f32.partialorder %v606_v4, 0.0  ;;  %v622_v6 = vmul.f32 0.1, %v606_v4  ;;  %v7510_v18 = vld [vmem:[#allocation3 + $0x4] ss:$8 sps:$4 sm:$0xff]   ;;  %v702_v22 = vrot.slane %v7508_v10, %v701_v12 }
 0x1af   :  { %v6660_v7 = vcombine.low %v638_v3, %v627_v5  ;;  %v608_v8 = vpop.f32.mrf.mxu0  ;;  %v709_v27 = vrot.slane %v7510_v18, %v701_v12 }
 0x1b0   :  { %v628_v9 = vsel %vm616_vm5, %v606_v4, %v622_v6  ;;  %v710_v30 = vcombine.high %v702_v22, %v702_v22 }
 0x1b1   :  { %v654_v13 = vrot.slane %v6660_v7, 7  ;;  %v639_v14 = vcombine.low %v627_v5, %v628_v9  ;;  %v640_v15 = vcombine.high %v627_v5, %v628_v9  ;;  %v6662_v16 = vcombine.high %v628_v9, %v628_v9  ;;  %v609_v17 = vpop.f32.mrf.mxu0 }
 0x1b2   :  { %v711_v31 = vcombine.high %v709_v27, %v709_v27  ;;  %v764_v34 = vcombine.low %v702_v22, %v710_v30 }
 0x1b3   :  { %674 = vst [vmem:[#allocation3 + $0x20] sm:$0xfe] %v654_v13  ;;  %v6661_v19 = vcombine.high %v626_v52, %v639_v14  ;;  %v656_v21 = vrot.slane %v640_v15, 7  ;;  %v658_v26 = vrot.slane %v6662_v16, 7 }
 0x1b4   :  { %v7511_v23 = vld [vmem:[#allocation3 + $0x10] ss:$8 sps:$4 sm:$0xff]   ;;  %v7513_v32 = vld [vmem:[#allocation3 + $0x14] ss:$8 sps:$4 sm:$0x33]   ;;  %v765_v11 = vcombine.low %v709_v27, %v711_v31  ;;  %v772_v44 = vrot.slane %v764_v34, %v701_v12 }
 0x1b5   :  { %v655_v24 = vrot.slane %v6661_v19, 7  ;;  %v657_v25 = vsel %vm647_vm15, %v654_v13, %v656_v21  ;;  %v720_v29 = vrot.slane %v7511_v23, %v701_v12  ;;  %v727_v40 = vrot.slane %v7513_v32, %v701_v12 }
 0x1b6   :  { %676 = vst [vmem:[#allocation3 + $0x30] sm:$0x1f] %v657_v25  ;;  %v779_v45 = vrot.slane %v765_v11, %v701_v12 }
 0x1b7   :  { %v659_v28 = vsel %vm647_vm15, %v655_v24, %v658_v26  ;;  %675 = vst.msk [vmem:[#allocation3 + $0x28] sm:$0xfe] %vm669_vm14, %v655_v24  ;;  %v728_v33 = vcombine.high %v720_v29, %v720_v29 }
 0x1b8   :  { %677 = vst.msk [vmem:[#allocation3 + $0x38] sm:$0x1f] %vm672_vm0, %v659_v28  ;;  %v781_v56 = vcombine.high %v772_v44, %v779_v45  ;;  %v780_v61 = vcombine.low %v772_v44, %v779_v45 }
 0x1b9   :  { %v782_v42 = vcombine.low %v720_v29, %v728_v33 }
 0x1ba   :  { %v682_v35 = vld [vmem:[#allocation3 + $0x20] sm:$0xff] }
 0x1bb   :  { %v790_v53 = vrot.slane %v782_v42, %v701_v12 }
 0x1be   :  { %v683_v36 = vld [vmem:[#allocation3 + $0x28] sm:$0xff] }
 0x1bf   :  { %v7514_v37 = vld [vmem:[#allocation3 + $0x20] ss:$8 sps:$4 sm:$0xff]   ;;  %v730_v38 = vcombine.high %v682_v35, %v683_v36  ;;  %v7516_v39 = vld [vmem:[#allocation3 + $0x30] ss:$8 sps:$4 sm:$0xff]  }
 0x1c0   :  { %v737_v41 = vrot.slane %v7514_v37, %v701_v12  ;;  %v7518_v43 = vld [vmem:[#allocation3 + $0x34] ss:$8 sps:$4 sm:$0x33]   ;;  %v755_v47 = vrot.slane %v7516_v39, %v701_v12 }
 0x1c1   :  { %v744_v46 = vrot.slane %v730_v38, %v701_v12  ;;  %v762_v51 = vrot.slane %v7518_v43, %v701_v12 }
 0x1c2   :  { %v783_v48 = vcombine.low %v727_v40, %v737_v41  ;;  %v745_v49 = vcombine.high %v737_v41, %v737_v41  ;;  %v763_v52 = vcombine.high %v755_v47, %v755_v47 }
 0x1c3   :  { %v746_v50 = vcombine.high %v744_v46, %v744_v46 }
 0x1c4   :  { %v797_v54 = vrot.slane %v783_v48, %v701_v12  ;;  %v800_v55 = vcombine.low %v745_v49, %v744_v46  ;;  %v818_v58 = vcombine.low %v763_v52, %v762_v51 }
 0x1c5   :  { %v801_v57 = vcombine.low %v746_v50, %v755_v47 }
 0x1c6   :  { %v799_v59 = vcombine.high %v790_v53, %v797_v54  ;;  %v798_v63 = vcombine.low %v790_v53, %v797_v54  ;;  %v808_v1 = vrot.slane %v800_v55, %v701_v12  ;;  %v825_v3 = vrot.slane %v818_v58, %v701_v12 }
 0x1c7   :  { %v815_v2 = vrot.slane %v801_v57, %v701_v12 }
 0x1c8   :  { %v836_v4 = vpack.c.bf16 %v799_v59, %v781_v56  ;;  %v835_v5 = vpack.c.bf16 %v798_v63, %v780_v61  ;;  %v826_v7 = vcombine.high %v825_v3, %v825_v3 }
 0x1c9   :  { %v817_v6 = vcombine.high %v808_v1, %v815_v2  ;;  %v816_v9 = vcombine.low %v808_v1, %v815_v2 }
 0x1ca   :  { %6687 = vmatprep.mubr.msk.bf16.mxu1 %vm440_vm10, %v836_v4 }
 0x1cb   :  { %1022 = vmatmul.mubr.bf16.vlgmr.msra.gmra.mxu1 %v835_v5  ;;  %v838_v8 = vpack.c.bf16 %v826_v7, %v817_v6  ;;  %v837_v10 = vpack.c.bf16 %v825_v3, %v816_v9 }
 0x1cd   :  { %6688 = vmatprep.mubr.msk.bf16.mxu1 %vm440_vm10, %v838_v8 }
 0x1ce   :  { %v8643_v13 = vpop.f32.mrf.mxu1 }
 0x1d0   :  { %v8645_v14 = vpop.f32.mrf.mxu1 }
 0x1d2   :  { %v8647_v12 = vpop.f32.mrf.mxu1 }
 0x1d3   :  { %1032 = vmatmul.mubr.bf16.gmra.mxu1 %v837_v10 }
 0x1d4   :  { %1579 = vmatprep.mubr.bf16.mxu1 %v8256_v60  ;;  %v8649_v15 = vpop.f32.mrf.mxu1 }
 0x28b   :  { %v1023_v16 = vpop.f32.mrf.mxu1 }
 0x28c   :  { %v1050_v18 = vmul.f32 0.1, %v1023_v16  ;;  %vm1042_vm7 = vcmp.ge.f32.partialorder %v1023_v16, 0.0 }
 0x28d   :  { %v1025_v17 = vpop.f32.mrf.mxu1 }
 0x28e   :  { %vm1043_vm6 = vcmp.ge.f32.partialorder %v1025_v17, 0.0  ;;  %v1051_v19 = vmul.f32 0.1, %v1025_v17  ;;  %v8653_v25 = vsel %vm1042_vm7, %v1023_v16, %v1050_v18 }
 0x28f   :  { %v1027_v21 = vpop.f32.mrf.mxu1  ;;  %v1123_v32 = vmul.f32 %v8653_v25, %v8653_v25 }
 0x290   :  { %v8651_v22 = vsel %vm1043_vm6, %v1025_v17, %v1051_v19  ;;  %vm1044_vm14 = vcmp.ge.f32.partialorder %v1027_v21, 0.0  ;;  %v1052_v23 = vmul.f32 0.1, %v1027_v21  ;;  %vm1083_vm6 = vcmask 781312  }
 0x291   :  { %v1029_v24 = vpop.f32.mrf.mxu1  ;;  %v1124_v28 = vmul.f32 %v8651_v22, %v8651_v22  ;;  %v1078_v38 = vsel %vm10466_vm12, %v8651_v22, 0.0 }
 0x292   :  { %v8655_v26 = vsel %vm1044_vm14, %v1027_v21, %v1052_v23  ;;  %vm1045_vm0 = vcmp.ge.f32.partialorder %v1029_v24, 0.0  ;;  %v1053_v27 = vmul.f32 0.1, %v1029_v24 }
 0x293   :  { %v1033_v29 = vpop.f32.mrf.mxu1  ;;  %v1125_v33 = vmul.f32 %v8655_v26, %v8655_v26  ;;  %v1141_v39 = vsel %vm10466_vm12, %v1124_v28, 0.0  ;;  %v1068_v40 = vadd.f32 %v8655_v26, %v8653_v25 }
 0x294   :  { %v8659_v30 = vsel %vm1045_vm0, %v1029_v24, %v1053_v27  ;;  %vm1046_vm5 = vcmp.ge.f32.partialorder %v1033_v29, 0.0  ;;  %v1054_v31 = vmul.f32 0.1, %v1033_v29 }
 0x295   :  { %v1126_v34 = vmul.f32 %v8659_v30, %v8659_v30  ;;  %v1035_v11 = vpop.f32.mrf.mxu1  ;;  %v1079_v35 = vsel %vm10466_vm12, %v8659_v30, 0.0  ;;  %v1131_v46 = vadd.f32 %v1125_v33, %v1123_v32 }
 0x296   :  { %v8669_v36 = vsel %vm1046_vm5, %v1033_v29, %v1054_v31  ;;  %vm1047_vm7 = vcmp.ge.f32.partialorder %v1035_v11, 0.0  ;;  %v1055_v37 = vmul.f32 0.1, %v1035_v11  ;;  %v1080_v47 = vadd.f32 %v1079_v35, %v1078_v38 }
 0x297   :  { %v1142_v41 = vsel %vm10466_vm12, %v1126_v34, 0.0  ;;  %v1037_v42 = vpop.f32.mrf.mxu1  ;;  %v1127_v43 = vmul.f32 %v8669_v36, %v8669_v36  ;;  %v1069_v51 = vadd.f32 %v1068_v40, %v8669_v36  ;;  %vm1534_vm5 = vcmask 228352  }
 0x298   :  { %v8679_v44 = vsel %vm1047_vm7, %v1035_v11, %v1055_v37  ;;  %vm1048_vm14 = vcmp.ge.f32.partialorder %v1037_v42, 0.0  ;;  %v1056_v45 = vmul.f32 0.1, %v1037_v42  ;;  %v1143_v54 = vadd.f32 %v1142_v41, %v1141_v39 }
 0x299   :  { %v1081_v48 = vsel %vm10466_vm12, %v8679_v44, 0.0  ;;  %v1128_v49 = vmul.f32 %v8679_v44, %v8679_v44  ;;  %v1039_v50 = vpop.f32.mrf.mxu1  ;;  %v1132_v58 = vadd.f32 %v1131_v46, %v1127_v43 }
 0x29a   :  { %v8686_v52 = vsel %vm1048_vm14, %v1037_v42, %v1056_v45  ;;  %vm1049_vm0 = vcmp.ge.f32.partialorder %v1039_v50, 0.0  ;;  %v1057_v53 = vmul.f32 0.1, %v1039_v50  ;;  %v1082_v59 = vadd.f32 %v1081_v48, %v1080_v47 }
 0x29b   :  { %v1144_v55 = vsel %vm10466_vm12, %v1128_v49, 0.0  ;;  %v1070_v56 = vsel %vm10464_vm4, %v8686_v52, 0.0  ;;  %v1129_v57 = vmul.f32 %v8686_v52, %v8686_v52 }
 0x29c   :  { %v1071_v61 = vadd.f32 %v1070_v56, %v1069_v51  ;;  %v8693_v63 = vsel %vm1049_vm0, %v1039_v50, %v1057_v53  ;;  %v1145_v4 = vadd.f32 %v1144_v55, %v1143_v54 }
 0x29d   :  { %v1133_v1 = vsel %vm10464_vm4, %v1129_v57, 0.0  ;;  %v1084_v2 = vsel %vm1083_vm6, %v8693_v63, 0.0  ;;  %v1130_v3 = vmul.f32 %v8693_v63, %v8693_v63 }
 0x29e   :  { %v1072_v5 = vrot.slane %v1071_v61, 4  ;;  %v1134_v6 = vadd.f32 %v1133_v1, %v1132_v58  ;;  %v1085_v7 = vadd.f32 %v1084_v2, %v1082_v59 }
 0x29f   :  { %v1146_v8 = vsel %vm1083_vm6, %v1130_v3, 0.0  ;;  %vm126_vm6 = vcmp.lt.s32.totalorder %v111_v20, 256  ;;  %v7646_v20 = vld [vmem:[%s10446_s3 + $0x94] ss:$8 sps:$4 sm:$0xff]  }
 0x2a0   :  { %v1086_v9 = vrot.slane %v1085_v7, 4  ;;  %v1147_v10 = vadd.f32 %v1146_v8, %v1145_v4  ;;  %v1073_v16 = vadd.f32 %v1072_v5, %v1071_v61  ;;  %v1135_v17 = vrot.slane %v1134_v6, 4  ;;  %128 = vst.msk [vmem:[#allocation4] ss:$8 sm:$0x3] %vm126_vm6, %v8250_v0 }
 0x2a1   :  { %131 = vst.msk [vmem:[#allocation4 + $0x30] ss:$8 sm:$0x3] %vm126_vm6, %v8250_v0  ;;  %134 = vst.msk [vmem:[#allocation4 + $0x21] ss:$8 sm:$0x3] %vm126_vm6, %v8250_v0 }
 0x2a2   :  { %v1074_v18 = vrot.slane %v1073_v16, 2  ;;  %v1087_v19 = vadd.f32 %v1086_v9, %v1085_v7  ;;  %v1136_v21 = vadd.f32 %v1135_v17, %v1134_v6  ;;  %v1148_v23 = vrot.slane %v1147_v10, 4  ;;  %v7519_v9 = vld [vmem:[%s10452_s9 + $0x70] ss:$8 sps:$4 sm:$0xff]   ;;  %v7522_v17 = vld [vmem:[%s10452_s9 + $0x60] ss:$8 sps:$4 sm:$0xff]  }
 0x2a3   :  { %137 = vst.msk [vmem:[#allocation4 + $0x51] ss:$8 sm:$0x3] %vm126_vm6, %v8250_v0 }
 0x2a4   :  { %v1075_v24 = vadd.f32 %v1074_v18, %v1073_v16  ;;  %v1088_v27 = vrot.slane %v1087_v19, 2  ;;  %v1137_v28 = vrot.slane %v1136_v21, 2  ;;  %v1149_v29 = vadd.f32 %v1148_v23, %v1147_v10  ;;  %v7521_v10 = vld [vmem:[%s10452_s9 + $0x74] ss:$8 sps:$4 sm:$0xff]   ;;  %v7524_v16 = vld [vmem:[%s10452_s9 + $0x64] ss:$8 sps:$4 sm:$0xff]  }
 0x2a5   :  { %1463 = vmatprep.subr.bf16.mxu0 %v7521_v10  ;;  %v7527_v18 = vld [vmem:[%s10452_s9 + $0x54] ss:$8 sps:$4 sm:$0xff]   ;;  %v7528_v23 = vld [vmem:[%s10452_s9 + $0x40] ss:$8 sps:$4 sm:$0xff]  }
 0x2a6   :  { %v1076_v31 = vrot.slane %v1075_v24, 1  ;;  %v1089_v32 = vadd.f32 %v1088_v27, %v1087_v19  ;;  %v1138_v33 = vadd.f32 %v1137_v28, %v1136_v21  ;;  %v1150_v34 = vrot.slane %v1149_v29, 2  ;;  %1464 = vmatpush1.bf16.msra.mxu0 %v7519_v9  ;;  %v7525_v19 = vld [vmem:[%s10452_s9 + $0x50] ss:$8 sps:$4 sm:$0xff]   ;;  %v7530_v21 = vld [vmem:[%s10452_s9 + $0x44] ss:$8 sps:$4 sm:$0xff]  }
 0x2a7   :  { %1465 = vmatprep.subr.bf16.mxu0 %v7524_v16  ;;  %v7531_v27 = vld [vmem:[%s10452_s9 + $0x30] ss:$8 sps:$4 sm:$0xff]   ;;  %v7536_v28 = vld [vmem:[%s10452_s9 + $0x24] ss:$8 sps:$4 sm:$0xff]  }
 0x2a8   :  { %v1077_v11 = vadd.f32 %v1076_v31, %v1075_v24  ;;  %v1090_v35 = vrot.slane %v1089_v32, 1  ;;  %v1139_v37 = vrot.slane %v1138_v33, 1  ;;  %v1151_v38 = vadd.f32 %v1150_v34, %v1149_v29  ;;  %v7533_v24 = vld [vmem:[%s10452_s9 + $0x34] ss:$8 sps:$4 sm:$0xff]   ;;  %v7534_v29 = vld [vmem:[%s10452_s9 + $0x20] ss:$8 sps:$4 sm:$0xff]  }
 0x2aa   :  { %1094 = vrot.lane.b32.xlu0 %v1077_v11, %s8252_s28  ;;  %v1091_v39 = vadd.f32 %v1090_v35, %v1089_v32  ;;  %v1152_v40 = vrot.slane %v1151_v38, 1  ;;  %v1140_v41 = vadd.f32 %v1139_v37, %v1138_v33  ;;  %1466 = vmatpush1.bf16.msra.mxu0 %v7522_v17 }
 0x2ab   :  { %1467 = vmatprep.subr.bf16.mxu0 %v7527_v18 }
 0x2ac   :  { %1096 = vrot.lane.b32.xlu1 %v1091_v39, %s8252_s28  ;;  %v1153_v42 = vadd.f32 %v1152_v40, %v1151_v38 }
 0x2ae   :  { %1156 = vrot.lane.b32.xlu0 %v1140_v41, %s8252_s28  ;;  %1468 = vmatpush1.bf16.msra.mxu0 %v7525_v19 }
 0x2af   :  { %1469 = vmatprep.subr.bf16.mxu0 %v7530_v21 }
 0x2b0   :  { %1158 = vrot.lane.b32.xlu1 %v1153_v42, %s8252_s28  ;;  %v7537_v42 = vld [vmem:[%s10452_s9 + $0x10] ss:$8 sps:$4 sm:$0xff]  }
 0x2b2   :  { %1470 = vmatpush1.bf16.msra.mxu0 %v7528_v23 }
 0x2b3   :  { %1471 = vmatprep.subr.bf16.mxu0 %v7533_v24  ;;  %v8828_v24 = vsub.s32 0, %v8630_v62 }
 0x2b6   :  { %1472 = vmatpush1.bf16.msra.mxu0 %v7531_v27 }
 0x2b7   :  { %1473 = vmatprep.subr.bf16.mxu0 %v7536_v28 }
 0x2ba   :  { %1474 = vmatpush1.bf16.msra.mxu0 %v7534_v29 }
 0x31c   :  { %v1095_v43 = vpop.permute.xlu0 %1094 }
 0x31e   :  { %v1097_v45 = vpop.permute.xlu1 %1096 }
 0x31f   :  { %v1098_v46 = vsel %vm161_vm1, %v1095_v43, %v1097_v45  ;;  %v7542_v43 = vld [vmem:[%s10452_s9 + $0x4] ss:$8 sps:$4 sm:$0xff]   ;;  %v7540_v45 = vld [vmem:[%s10452_s9] ss:$8 sps:$4 sm:$0xff]  }
 0x320   :  { %v1100_v47 = vadd.f32 %v1098_v46, %v1077_v11  ;;  %v1157_v48 = vpop.permute.xlu0 %1156  ;;  %v7545_v46 = vld [vmem:[%s10452_s9 + $0xd4] ss:$8 sps:$4 sm:$0xff]  }
 0x322   :  { %1102 = vrot.lane.b32.xlu0 %v1100_v47, %s8253_s0  ;;  %v1159_v49 = vpop.permute.xlu1 %1158 }
 0x323   :  { %v1160_v50 = vsel %vm161_vm1, %v1157_v48, %v1159_v49  ;;  %v7543_v48 = vld [vmem:[%s10452_s9 + $0xd0] ss:$8 sps:$4 sm:$0xff]  }
 0x324   :  { %v1162_v51 = vadd.f32 %v1160_v50, %v1140_v41  ;;  %v7539_v41 = vld [vmem:[%s10452_s9 + $0x14] ss:$8 sps:$4 sm:$0xff]  }
 0x325   :  { %1475 = vmatprep.subr.bf16.mxu0 %v7539_v41 }
 0x326   :  { %1164 = vrot.lane.b32.xlu1 %v1162_v51, %s8253_s0  ;;  %1476 = vmatpush1.bf16.msra.mxu0 %v7537_v42 }
 0x327   :  { %1477 = vmatprep.subr.bf16.mxu0 %v7542_v43 }
 0x32a   :  { %1478 = vmatpush1.bf16.msra.mxu0 %v7540_v45 }
 0x32b   :  { %1483 = vmatprep.subr.bf16.mxu0 %v7545_v46 }
 0x32e   :  { %1484 = vmatpush2.bf16.msra.mxu0 %v7543_v48 }
 0x394   :  { %v1103_v53 = vpop.permute.xlu0 %1102 }
 0x395   :  { %v1105_v54 = vadd.f32 %v1103_v53, %v1100_v47  ;;  %v1067_v53 = vld [vmem:[%s10454_s11 + $0x1] sm:$0x1] }
 0x397   :  { %v1106_v55 = vsel %vm161_vm1, %v1105_v54, %v1100_v47  ;;  %v1066_v47 = vld [vmem:[%s10454_s11] sm:$0x1] }
 0x398   :  { %1108 = vrot.lane.b32.xlu0 %v1106_v55, %s8255_s17  ;;  %v1165_v56 = vpop.permute.xlu1 %1164  ;;  %v7546_v54 = vld [vmem:[%s10452_s9 + $0xc0] ss:$8 sps:$4 sm:$0xff]  }
 0x399   :  { %v1167_v57 = vadd.f32 %v1165_v56, %v1162_v51 }
 0x39b   :  { %v1168_v58 = vsel %vm161_vm1, %v1167_v57, %v1162_v51  ;;  %v7548_v51 = vld [vmem:[%s10452_s9 + $0xc4] ss:$8 sps:$4 sm:$0xff]   ;;  %v7551_v57 = vld [vmem:[%s10452_s9 + $0xb4] ss:$8 sps:$4 sm:$0xff]  }
 0x39c   :  { %1170 = vrot.lane.b32.xlu1 %v1168_v58, %s8255_s17  ;;  %1485 = vmatprep.subr.bf16.mxu0 %v7548_v51 }
 0x39d   :  { %1486 = vmatpush2.bf16.msra.mxu0 %v7546_v54 }
 0x39e   :  { %1487 = vmatprep.subr.bf16.mxu0 %v7551_v57 }
 0x40a   :  { %v1109_v59 = vpop.permute.xlu0 %1108 }
 0x40b   :  { %v1111_v61 = vadd.f32 %v1109_v59, %v1106_v55  ;;  %v7554_v59 = vld [vmem:[%s10452_s9 + $0xa4] ss:$8 sps:$4 sm:$0xff]  }
 0x40d   :  { %1113 = vrot.lane.b32.xlu0 %v1111_v61, %s8257_s1 }
 0x40e   :  { %v1171_v1 = vpop.permute.xlu1 %1170 }
 0x40f   :  { %v1173_v2 = vadd.f32 %v1171_v1, %v1168_v58  ;;  %v7549_v58 = vld [vmem:[%s10452_s9 + $0xb0] ss:$8 sps:$4 sm:$0xff]   ;;  %v7557_v1 = vld [vmem:[%s10452_s9 + $0x94] ss:$8 sps:$4 sm:$0xff]  }
 0x410   :  { %1488 = vmatpush2.bf16.msra.mxu0 %v7549_v58 }
 0x411   :  { %1175 = vrot.lane.b32.xlu1 %v1173_v2, %s8257_s1  ;;  %1489 = vmatprep.subr.bf16.mxu0 %v7554_v59 }
 0x47f   :  { %v1114_v3 = vpop.permute.xlu0 %1113 }
 0x480   :  { %v1116_v4 = vadd.f32 %v1114_v3, %v1111_v61  ;;  %v7560_v3 = vld [vmem:[%s10452_s9 + $0x84] ss:$8 sps:$4 sm:$0xff]  }
 0x482   :  { %v1117_v5 = vsel %vm161_vm1, %v1116_v4, %v1111_v61  ;;  %v7552_v61 = vld [vmem:[%s10452_s9 + $0xa0] ss:$8 sps:$4 sm:$0xff]  }
 0x483   :  { %1119 = vrot.lane.b32.xlu0 %v1117_v5, %s8259_s2  ;;  %v1176_v6 = vpop.permute.xlu1 %1175  ;;  %1490 = vmatpush2.bf16.msra.mxu0 %v7552_v61  ;;  %v7558_v4 = vld [vmem:[%s10452_s9 + $0x80] ss:$8 sps:$4 sm:$0xff]  }
 0x484   :  { %v1178_v7 = vadd.f32 %v1176_v6, %v1173_v2  ;;  %1491 = vmatprep.subr.bf16.mxu0 %v7557_v1 }
 0x486   :  { %v1179_v8 = vsel %vm161_vm1, %v1178_v7, %v1173_v2  ;;  %v7555_v2 = vld [vmem:[%s10452_s9 + $0x90] ss:$8 sps:$4 sm:$0xff]  }
 0x487   :  { %1181 = vrot.lane.b32.xlu1 %v1179_v8, %s8259_s2  ;;  %1492 = vmatpush2.bf16.msra.mxu0 %v7555_v2 }
 0x488   :  { %1493 = vmatprep.subr.bf16.mxu0 %v7560_v3  ;;  %v7569_v3 = vld [vmem:[%s10446_s3 + $0x170] ss:$8 sps:$4 sm:$0xff]  }
 0x48b   :  { %1494 = vmatpush2.bf16.msra.mxu0 %v7558_v4  ;;  %v7571_v4 = vld [vmem:[%s10446_s3 + $0x174] ss:$8 sps:$4 sm:$0xff]  }
 0x48c   :  { %2365 = vmatprep.subr.bf16.mxu0 %v7571_v4  ;;  %v7626_v4 = vld [vmem:[%s10446_s3 + $0xc0] ss:$8 sps:$4 sm:$0xff]  }
 0x4f5   :  { %v1120_v31 = vpop.permute.xlu0 %1119 }
 0x4f6   :  { %v1122_v32 = vadd.f32 %v1120_v31, %v1117_v5 }
 0x4f8   :  { %v1185_v33 = vmul.f32 0.0025510204, %v1122_v32 }
 0x4f9   :  { %v1182_v34 = vpop.permute.xlu1 %1181 }
 0x4fa   :  { %v1184_v11 = vadd.f32 %v1182_v34, %v1179_v8  ;;  %v1187_v35 = vmul.f32 %v1185_v33, %v1185_v33 }
 0x4fc   :  { %v1186_v37 = vmul.f32 0.0025510204, %v1184_v11 }
 0x4fe   :  { %v1188_v38 = vsub.f32 %v1186_v37, %v1187_v35 }
 0x500   :  { %v1189_v39 = vmax.f32 %v1188_v38, 0.0 }
 0x502   :  { %v1190_v40 = vadd.f32 1e-05, %v1189_v39 }
 0x504   :  { %8125 = vrsqrt.f32 %v1190_v40 }
 0x511   :  { %v8126_v49 = vpop.eup %8125 }
 0x512   :  { %v1192_v50 = vmul.f32 %v8126_v49, %v1066_v47 }
 0x514   :  { %1199 = vrot.lane.b32.xlu1 %v1192_v50, %s8253_s0  ;;  %1196 = vrot.lane.b32.xlu0 %v1192_v50, %s8252_s28  ;;  %v1193_v55 = vmul.f32 %v1192_v50, %v1185_v33 }
 0x516   :  { %v1194_v56 = vsub.f32 %v1067_v53, %v1193_v55 }
 0x518   :  { %1202 = vrot.lane.b32.xlu0 %v1192_v50, %s8251_s7  ;;  %1225 = vrot.lane.b32.xlu1 %v1194_v56, %s8252_s28 }
 0x51c   :  { %1205 = vrot.lane.b32.xlu0 %v1192_v50, %s8254_s25  ;;  %1228 = vrot.lane.b32.xlu1 %v1194_v56, %s8253_s0 }
 0x520   :  { %1208 = vrot.lane.b32.xlu0 %v1192_v50, %s8255_s17  ;;  %1231 = vrot.lane.b32.xlu1 %v1194_v56, %s8251_s7 }
 0x524   :  { %1211 = vrot.lane.b32.xlu0 %v1192_v50, %s8257_s1  ;;  %1234 = vrot.lane.b32.xlu1 %v1194_v56, %s8254_s25 }
 0x528   :  { %1214 = vrot.lane.b32.xlu0 %v1192_v50, %s8259_s2  ;;  %1237 = vrot.lane.b32.xlu1 %v1194_v56, %s8255_s17 }
 0x52c   :  { %1240 = vrot.lane.b32.xlu0 %v1194_v56, %s8257_s1  ;;  %1243 = vrot.lane.b32.xlu1 %v1194_v56, %s8259_s2 }
 0x586   :  { %v1200_v5 = vpop.permute.xlu1 %1199  ;;  %v1197_v6 = vpop.permute.xlu0 %1196 }
 0x587   :  { %v1217_v16 = vsel %vm161_vm1, %v1192_v50, %v1197_v6  ;;  %v7581_v6 = vld [vmem:[%s10446_s3 + $0x150] ss:$8 sps:$4 sm:$0xff]  }
 0x588   :  { %v1218_v17 = vsel %vm233_vm8, %v1217_v16, %v1200_v5  ;;  %v7583_v5 = vld [vmem:[%s10446_s3 + $0x154] ss:$8 sps:$4 sm:$0xff]   ;;  %v7601_v16 = vld [vmem:[%s10446_s3 + $0x124] ss:$8 sps:$4 sm:$0xff]  }
 0x58a   :  { %v1203_v7 = vpop.permute.xlu0 %1202  ;;  %v1226_v8 = vpop.permute.xlu1 %1225 }
 0x58b   :  { %v1219_v21 = vsel %vm435_vm9, %v1218_v17, %v1203_v7  ;;  %v1246_v31 = vsel %vm161_vm1, %v1194_v56, %v1226_v8  ;;  %v7589_v7 = vld [vmem:[%s10446_s3 + $0x144] ss:$8 sps:$4 sm:$0xff]   ;;  %v7587_v8 = vld [vmem:[%s10446_s3 + $0x140] ss:$8 sps:$4 sm:$0xff]  }
 0x58c   :  { %v7599_v17 = vld [vmem:[%s10446_s3 + $0x120] ss:$8 sps:$4 sm:$0xff]  }
 0x58e   :  { %v1206_v9 = vpop.permute.xlu0 %1205  ;;  %v1229_v10 = vpop.permute.xlu1 %1228 }
 0x58f   :  { %v1220_v23 = vsel %vm440_vm10, %v1219_v21, %v1206_v9  ;;  %v1247_v32 = vsel %vm233_vm8, %v1246_v31, %v1229_v10  ;;  %v7595_v9 = vld [vmem:[%s10446_s3 + $0x134] ss:$8 sps:$4 sm:$0xff]   ;;  %v7593_v10 = vld [vmem:[%s10446_s3 + $0x130] ss:$8 sps:$4 sm:$0xff]   ;;  %v7613_v21 = vld [vmem:[%s10446_s3 + $0x104] ss:$8 sps:$4 sm:$0xff]  }
 0x590   :  { %v7623_v31 = vld [vmem:[%s10446_s3 + $0x1e0] ss:$8 sps:$4 sm:$0xff]  }
 0x592   :  { %v1209_v18 = vpop.permute.xlu0 %1208  ;;  %v1232_v19 = vpop.permute.xlu1 %1231 }
 0x593   :  { %v1221_v27 = vsel %vm445_vm11, %v1220_v23, %v1209_v18  ;;  %v1248_v34 = vsel %vm435_vm9, %v1247_v32, %v1232_v19  ;;  %v7607_v18 = vld [vmem:[%s10446_s3 + $0x114] ss:$8 sps:$4 sm:$0xff]   ;;  %v7605_v19 = vld [vmem:[%s10446_s3 + $0x110] ss:$8 sps:$4 sm:$0xff]   ;;  %v7611_v23 = vld [vmem:[%s10446_s3 + $0x100] ss:$8 sps:$4 sm:$0xff]  }
 0x594   :  { %v1260_v33 = vrot.slane %v1221_v27, %v8828_v24 }
 0x596   :  { %v1212_v28 = vpop.permute.xlu0 %1211  ;;  %v1235_v29 = vpop.permute.xlu1 %1234  ;;  %v1262_v40 = vmul.f32 %v1260_v33, %v8651_v22  ;;  %v1264_v41 = vmul.f32 %v1260_v33, %v8659_v30  ;;  %v1266_v50 = vmul.f32 %v1260_v33, %v8679_v44  ;;  %v1268_v51 = vmul.f32 %v1260_v33, %v8693_v63 }
 0x597   :  { %v1222_v11 = vsel %vm10466_vm12, %v1221_v27, %v1212_v28  ;;  %v1249_v35 = vsel %vm440_vm10, %v1248_v34, %v1235_v29  ;;  %v7619_v27 = vld [vmem:[%s10446_s3 + $0x1f4] ss:$8 sps:$4 sm:$0xff]   ;;  %v7617_v28 = vld [vmem:[%s10446_s3 + $0x1f0] ss:$8 sps:$4 sm:$0xff]   ;;  %v7625_v29 = vld [vmem:[%s10446_s3 + $0x1e4] ss:$8 sps:$4 sm:$0xff]  }
 0x59a   :  { %v1215_v37 = vpop.permute.xlu0 %1214  ;;  %v1238_v38 = vpop.permute.xlu1 %1237 }
 0x59b   :  { %v1223_v62 = vsel %vm10465_vm13, %v1222_v11, %v1215_v37  ;;  %v1250_v39 = vsel %vm445_vm11, %v1249_v35, %v1238_v38 }
 0x59c   :  { %v1276_v42 = vrot.slane %v1250_v39, %v8828_v24  ;;  %v1256_v43 = vrot.slane %v1223_v62, %v8828_v24 }
 0x59e   :  { %v1241_v45 = vpop.permute.xlu0 %1240  ;;  %v1244_v46 = vpop.permute.xlu1 %1243  ;;  %v1278_v47 = vadd.f32 %v1276_v42, %v1262_v40  ;;  %v1280_v48 = vadd.f32 %v1276_v42, %v1264_v41  ;;  %v1261_v22 = vmul.f32 %v1256_v43, %v8653_v25  ;;  %v1263_v30 = vmul.f32 %v1256_v43, %v8655_v26 }
 0x59f   :  { %v1251_v49 = vsel %vm10466_vm12, %v1250_v39, %v1241_v45  ;;  %v1282_v56 = vadd.f32 %v1276_v42, %v1266_v50  ;;  %v1284_v57 = vadd.f32 %v1276_v42, %v1268_v51  ;;  %v1265_v44 = vmul.f32 %v1256_v43, %v8669_v36  ;;  %v7577_v36 = vld [vmem:[%s10446_s3 + $0x164] ss:$8 sps:$4 sm:$0xff]   ;;  %v7574_v50 = vld [vmem:[%s10446_s3 + $0x54] ss:$8 sps:$4 sm:$0xff]  }
 0x5a0   :  { %v1252_v53 = vsel %vm10465_vm13, %v1251_v49, %v1244_v46  ;;  %v1286_v54 = vpack.c.bf16 %v1280_v48, %v1278_v47  ;;  %v1267_v63 = vmul.f32 %v1256_v43, %v8686_v52  ;;  %v7575_v52 = vld [vmem:[%s10446_s3 + $0x160] ss:$8 sps:$4 sm:$0xff]   ;;  %v7565_v43 = vld [vmem:[%s10446_s3 + $0x74] ss:$8 sps:$4 sm:$0xff]   ;;  %v7563_v47 = vld [vmem:[%s10446_s3 + $0x70] ss:$8 sps:$4 sm:$0xff]  }
 0x5a1   :  { %v1272_v55 = vrot.slane %v1252_v53, %v8828_v24  ;;  %v1288_v1 = vpack.c.bf16 %v1284_v57, %v1282_v56  ;;  %v7561_v46 = vld [vmem:[%s10453_s10] sm:$0xff]   ;;  %v7562_v51 = vld [vmem:[%s10453_s10 + $0x8] sm:$0xff]   ;;  %v7572_v53 = vld [vmem:[%s10446_s3 + $0x50] ss:$8 sps:$4 sm:$0xff]  }
 0x5a2   :  { %6717 = vmatprep.mubr.msk.bf16.mxu0 %vm10466_vm12, %v1286_v54  ;;  %v7568_v48 = vld [vmem:[%s10446_s3 + $0x64] ss:$8 sps:$4 sm:$0xff]   ;;  %v7566_v49 = vld [vmem:[%s10446_s3 + $0x60] ss:$8 sps:$4 sm:$0xff]   ;;  %v7598_v57 = vld [vmem:[%s10446_s3 + $0x14] ss:$8 sps:$4 sm:$0xff]  }
 0x5a3   :  { %v1277_v58 = vadd.f32 %v1272_v55, %v1261_v22  ;;  %v1279_v59 = vadd.f32 %v1272_v55, %v1263_v30  ;;  %v1281_v25 = vadd.f32 %v1272_v55, %v1265_v44  ;;  %v1283_v2 = vadd.f32 %v1272_v55, %v1267_v63  ;;  %v7578_v54 = vld [vmem:[%s10446_s3 + $0x40] ss:$8 sps:$4 sm:$0xff]   ;;  %v7586_v22 = vld [vmem:[%s10446_s3 + $0x34] ss:$8 sps:$4 sm:$0xff]   ;;  %v7584_v30 = vld [vmem:[%s10446_s3 + $0x30] ss:$8 sps:$4 sm:$0xff]  }
 0x5a4   :  { %v7592_v55 = vld [vmem:[%s10446_s3 + $0x24] ss:$8 sps:$4 sm:$0xff]   ;;  %v7590_v56 = vld [vmem:[%s10446_s3 + $0x20] ss:$8 sps:$4 sm:$0xff]   ;;  %v7608_v44 = vld [vmem:[%s10446_s3 + $0xf0] ss:$8 sps:$4 sm:$0xff]  }
 0x5a5   :  { %v1285_v61 = vpack.c.bf16 %v1279_v59, %v1277_v58  ;;  %v1287_v26 = vpack.c.bf16 %v1283_v2, %v1281_v25  ;;  %v7596_v58 = vld [vmem:[%s10446_s3 + $0x10] ss:$8 sps:$4 sm:$0xff]   ;;  %v7604_v59 = vld [vmem:[%s10446_s3 + $0x4] ss:$8 sps:$4 sm:$0xff]   ;;  %v7614_v25 = vld [vmem:[%s10446_s3 + $0xe0] ss:$8 sps:$4 sm:$0xff]  }
 0x5a6   :  { %v7616_v63 = vld [vmem:[%s10446_s3 + $0xe4] ss:$8 sps:$4 sm:$0xff]   ;;  %v7622_v2 = vld [vmem:[%s10446_s3 + $0xd4] ss:$8 sps:$4 sm:$0xff]  }
 0x5a7   :  { %1496 = vmatmul.mubr.bf16.vlgmr.msra.gmra.mxu0 %v1285_v61  ;;  %v7602_v61 = vld [vmem:[%s10446_s3] ss:$8 sps:$4 sm:$0xff]  }
 0x5a8   :  { %6718 = vmatprep.mubr.msk.bf16.mxu0 %vm10466_vm12, %v1288_v1  ;;  %2366 = vmatpush1.bf16.msra.mxu0 %v7569_v3  ;;  %v7610_v1 = vld [vmem:[%s10446_s3 + $0xf4] ss:$8 sps:$4 sm:$0xff]   ;;  %v7628_v3 = vld [vmem:[%s10446_s3 + $0xc4] ss:$8 sps:$4 sm:$0xff]  }
 0x5a9   :  { %2367 = vmatprep.subr.bf16.mxu0 %v7577_v36  ;;  %v7631_v36 = vld [vmem:[%s10446_s3 + $0x1d4] ss:$8 sps:$4 sm:$0xff]  }
 0x5ac   :  { %2368 = vmatpush1.bf16.msra.mxu0 %v7575_v52  ;;  %v7634_v52 = vld [vmem:[%s10446_s3 + $0xb4] ss:$8 sps:$4 sm:$0xff]  }
 0x5ad   :  { %2369 = vmatprep.subr.bf16.mxu0 %v7583_v5  ;;  %v7629_v5 = vld [vmem:[%s10446_s3 + $0x1d0] ss:$8 sps:$4 sm:$0xff]  }
 0x5af   :  { %1506 = vmatmul.mubr.bf16.gmra.mxu0 %v1287_v26  ;;  %v7620_v26 = vld [vmem:[%s10446_s3 + $0xd0] ss:$8 sps:$4 sm:$0xff]  }
 0x5b0   :  { %2370 = vmatpush1.bf16.msra.mxu0 %v7581_v6  ;;  %v7632_v6 = vld [vmem:[%s10446_s3 + $0xb0] ss:$8 sps:$4 sm:$0xff]  }
 0x5b1   :  { %2371 = vmatprep.subr.bf16.mxu0 %v7589_v7  ;;  %v7637_v7 = vld [vmem:[%s10446_s3 + $0x1c4] ss:$8 sps:$4 sm:$0xff]  }
 0x5b4   :  { %2372 = vmatpush1.bf16.msra.mxu0 %v7587_v8  ;;  %v7640_v8 = vld [vmem:[%s10446_s3 + $0xa4] ss:$8 sps:$4 sm:$0xff]  }
 0x5b5   :  { %2373 = vmatprep.subr.bf16.mxu0 %v7595_v9  ;;  %v7635_v9 = vld [vmem:[%s10446_s3 + $0x1c0] ss:$8 sps:$4 sm:$0xff]  }
 0x5b8   :  { %2374 = vmatpush1.bf16.msra.mxu0 %v7593_v10  ;;  %v7638_v10 = vld [vmem:[%s10446_s3 + $0xa0] ss:$8 sps:$4 sm:$0xff]  }
 0x5b9   :  { %2375 = vmatprep.subr.bf16.mxu0 %v7601_v16  ;;  %v7643_v16 = vld [vmem:[%s10446_s3 + $0x1b4] ss:$8 sps:$4 sm:$0xff]  }
 0x5bc   :  { %2376 = vmatpush1.bf16.msra.mxu0 %v7599_v17  ;;  %v7641_v17 = vld [vmem:[%s10446_s3 + $0x1b0] ss:$8 sps:$4 sm:$0xff]  }
 0x5bd   :  { %2377 = vmatprep.subr.bf16.mxu0 %v7607_v18  ;;  %v7644_v18 = vld [vmem:[%s10446_s3 + $0x90] ss:$8 sps:$4 sm:$0xff]  }
 0x5c0   :  { %2378 = vmatpush1.bf16.msra.mxu0 %v7605_v19  ;;  %v7649_v19 = vld [vmem:[%s10446_s3 + $0x1a4] ss:$8 sps:$4 sm:$0xff]  }
 0x5c1   :  { %2379 = vmatprep.subr.bf16.mxu0 %v7613_v21  ;;  %v7652_v21 = vld [vmem:[%s10446_s3 + $0x84] ss:$8 sps:$4 sm:$0xff]  }
 0x5c4   :  { %2380 = vmatpush1.bf16.msra.mxu0 %v7611_v23  ;;  %v7647_v23 = vld [vmem:[%s10446_s3 + $0x1a0] ss:$8 sps:$4 sm:$0xff]  }
 0x5c5   :  { %2381 = vmatprep.subr.bf16.mxu0 %v7619_v27  ;;  %v7650_v27 = vld [vmem:[%s10446_s3 + $0x80] ss:$8 sps:$4 sm:$0xff]  }
 0x5c8   :  { %2382 = vmatpush2.bf16.msra.mxu0 %v7617_v28  ;;  %v7655_v28 = vld [vmem:[%s10446_s3 + $0x194] ss:$8 sps:$4 sm:$0xff]  }
 0x5c9   :  { %2383 = vmatprep.subr.bf16.mxu0 %v7625_v29  ;;  %v7661_v29 = vld [vmem:[%s10446_s3 + $0x274] ss:$8 sps:$4 sm:$0xff]  }
 0x5cc   :  { %2384 = vmatpush2.bf16.msra.mxu0 %v7623_v31  ;;  %v7653_v31 = vld [vmem:[%s10446_s3 + $0x190] ss:$8 sps:$4 sm:$0xff]  }
 0x5cd   :  { %2385 = vmatprep.subr.bf16.mxu0 %v7631_v36  ;;  %v7667_v36 = vld [vmem:[%s10446_s3 + $0x254] ss:$8 sps:$4 sm:$0xff]  }
 0x5d0   :  { %2386 = vmatpush2.bf16.msra.mxu0 %v7629_v5 }
 0x5d1   :  { %2387 = vmatprep.subr.bf16.mxu0 %v7637_v7 }
 0x5d4   :  { %2388 = vmatpush2.bf16.msra.mxu0 %v7635_v9 }
 0x5d5   :  { %2389 = vmatprep.subr.bf16.mxu0 %v7643_v16 }
 0x5d8   :  { %2390 = vmatpush2.bf16.msra.mxu0 %v7641_v17 }
 0x5d9   :  { %2391 = vmatprep.subr.bf16.mxu0 %v7649_v19 }
 0x5dc   :  { %2392 = vmatpush2.bf16.msra.mxu0 %v7647_v23 }
 0x5dd   :  { %2393 = vmatprep.subr.bf16.mxu0 %v7655_v28 }
 0x5e0   :  { %2394 = vmatpush2.bf16.msra.mxu0 %v7653_v31 }
 0x667   :  { %v1497_v32 = vpop.f32.mrf.mxu0 }
 0x669   :  { %v1499_v33 = vpop.f32.mrf.mxu0 }
 0x66b   :  { %v1501_v34 = vpop.f32.mrf.mxu0 }
 0x66c   :  { %v1520_v45 = vpack.c.bf16 %v1501_v34, %v1497_v32  ;;  %v7658_v32 = vld [vmem:[%s10446_s3 + $0x184] ss:$8 sps:$4 sm:$0xff]  }
 0x66d   :  { %v1503_v11 = vpop.f32.mrf.mxu0  ;;  %2395 = vmatprep.subr.bf16.mxu0 %v7658_v32  ;;  %v7670_v32 = vld [vmem:[%s10446_s3 + $0x244] ss:$8 sps:$4 sm:$0xff]  }
 0x66e   :  { %v1521_v41 = vpack.c.bf16 %v1503_v11, %v1499_v33  ;;  %v7656_v33 = vld [vmem:[%s10446_s3 + $0x180] ss:$8 sps:$4 sm:$0xff]  }
 0x66f   :  { %v1507_v35 = vpop.f32.mrf.mxu0  ;;  %2396 = vmatpush2.bf16.msra.mxu0 %v7656_v33 }
 0x671   :  { %v1509_v37 = vpop.f32.mrf.mxu0 }
 0x673   :  { %v1511_v38 = vpop.f32.mrf.mxu0 }
 0x674   :  { %v1522_v62 = vpack.c.bf16 %v1511_v38, %v1507_v35 }
 0x675   :  { %v1513_v39 = vpop.f32.mrf.mxu0 }
 0x676   :  { %v1523_v40 = vpack.c.bf16 %v1513_v39, %v1509_v37  ;;  %v1542_v42 = vsel %vm322_vm3, %v1522_v62, 0 }
 0x678   :  { %6721 = vmatprep.subr.msk.bf16.mxu1 %vm322_vm3, %v1523_v40 }
 0x679   :  { %1560 = vmatpush1.bf16.msra.mxu1 %v1542_v42 }
 0x67a   :  { %1561 = vmatprep.subr.bf16.mxu1 %v1521_v41 }
 0x67d   :  { %1562 = vmatpush1.bf16.msra.mxu1 %v1520_v45 }
 0x67e   :  { %2312 = vmatprep.subr.bf16.mxu1 %v7565_v43 }
 0x680   :  { %6722 = vmatmul.mubr.msk.bf16.vlgmr.msra.gmra.mxu1 %vm1534_vm5, %v7561_v46 }
 0x681   :  { %1589 = vmatprep.mubr.bf16.mxu1 %v8256_v60  ;;  %2313 = vmatpush1.bf16.msra.mxu1 %v7563_v47  ;;  %v7580_v60 = vld [vmem:[%s10446_s3 + $0x44] ss:$8 sps:$4 sm:$0xff]  }
 0x682   :  { %2314 = vmatprep.subr.bf16.mxu1 %v7568_v48 }
 0x685   :  { %2315 = vmatpush1.bf16.msra.mxu1 %v7566_v49 }
 0x686   :  { %2316 = vmatprep.subr.bf16.mxu1 %v7574_v50 }
 0x688   :  { %6723 = vmatmul.mubr.msk.bf16.gmra.mxu1 %vm1534_vm5, %v7562_v51 }
 0x689   :  { %2317 = vmatpush1.bf16.msra.mxu1 %v7572_v53 }
 0x68a   :  { %2318 = vmatprep.subr.bf16.mxu1 %v7580_v60  ;;  %v7659_v60 = vld [vmem:[%s10446_s3 + $0x270] ss:$8 sps:$4 sm:$0xff]  }
 0x68d   :  { %2319 = vmatpush1.bf16.msra.mxu1 %v7578_v54 }
 0x68e   :  { %2320 = vmatprep.subr.bf16.mxu1 %v7586_v22 }
 0x691   :  { %2321 = vmatpush1.bf16.msra.mxu1 %v7584_v30 }
 0x692   :  { %2322 = vmatprep.subr.bf16.mxu1 %v7592_v55  ;;  %v7664_v55 = vld [vmem:[%s10446_s3 + $0x264] ss:$8 sps:$4 sm:$0xff]  }
 0x695   :  { %2323 = vmatpush1.bf16.msra.mxu1 %v7590_v56 }
 0x696   :  { %2324 = vmatprep.subr.bf16.mxu1 %v7598_v57 }
 0x699   :  { %2325 = vmatpush1.bf16.msra.mxu1 %v7596_v58 }
 0x69a   :  { %2326 = vmatprep.subr.bf16.mxu1 %v7604_v59 }
 0x69d   :  { %2327 = vmatpush1.bf16.msra.mxu1 %v7602_v61 }
 0x69e   :  { %2328 = vmatprep.subr.bf16.mxu1 %v7610_v1 }
 0x6a1   :  { %2329 = vmatpush2.bf16.msra.mxu1 %v7608_v44 }
 0x6a2   :  { %2330 = vmatprep.subr.bf16.mxu1 %v7616_v63 }
 0x6a5   :  { %2331 = vmatpush2.bf16.msra.mxu1 %v7614_v25 }
 0x6a6   :  { %2332 = vmatprep.subr.bf16.mxu1 %v7622_v2  ;;  %v7662_v2 = vld [vmem:[%s10446_s3 + $0x260] ss:$8 sps:$4 sm:$0xff]  }
 0x6a9   :  { %2333 = vmatpush2.bf16.msra.mxu1 %v7620_v26 }
 0x6aa   :  { %2334 = vmatprep.subr.bf16.mxu1 %v7628_v3 }
 0x6ad   :  { %2335 = vmatpush2.bf16.msra.mxu1 %v7626_v4 }
 0x6ae   :  { %2336 = vmatprep.subr.bf16.mxu1 %v7634_v52 }
 0x6b1   :  { %2337 = vmatpush2.bf16.msra.mxu1 %v7632_v6 }
 0x6b2   :  { %2338 = vmatprep.subr.bf16.mxu1 %v7640_v8 }
 0x6b5   :  { %2339 = vmatpush2.bf16.msra.mxu1 %v7638_v10 }
 0x6b6   :  { %2340 = vmatprep.subr.bf16.mxu1 %v7646_v20 }
 0x6b9   :  { %2341 = vmatpush2.bf16.msra.mxu1 %v7644_v18 }
 0x6ba   :  { %2342 = vmatprep.subr.bf16.mxu1 %v7652_v21 }
 0x6bd   :  { %2343 = vmatpush2.bf16.msra.mxu1 %v7650_v27  ;;  %v7665_v27 = vld [vmem:[%s10446_s3 + $0x250] ss:$8 sps:$4 sm:$0xff]  }
 0x6be   :  { %2418 = vmatprep.subr.bf16.mxu1 %v7661_v29 }
 0x740   :  { %v9063_v34 = vpop.f32.mrf.mxu1 }
 0x741   :  { %v1608_v11 = vrot.slane %v9063_v34, 7 }
 0x742   :  { %v9066_v35 = vpop.f32.mrf.mxu1 }
 0x743   :  { %1632 = vst [vmem:[#allocation4] sm:$0xfe] %v1608_v11  ;;  %v1609_v37 = vrot.slane %v9066_v35, 7 }
 0x744   :  { %v9069_v38 = vpop.f32.mrf.mxu1 }
 0x745   :  { %1633 = vst [vmem:[#allocation4 + $0x8] sm:$0xfe] %v1609_v37  ;;  %v1610_v62 = vrot.slane %v9069_v38, 7 }
 0x746   :  { %v9072_v39 = vpop.f32.mrf.mxu1 }
 0x747   :  { %1636 = vst [vmem:[#allocation4 + $0x20] sm:$0x1] %v1610_v62  ;;  %v1612_v40 = vrot.slane %v9072_v39, 7  ;;  %v9087_v50 = vsel %vm647_vm15, %v1608_v11, %v1610_v62 }
 0x748   :  { %v9075_v41 = vpop.f32.mrf.mxu1  ;;  %v1669_v1 = vrot.slane %v9087_v50, 1 }
 0x749   :  { %1637 = vst [vmem:[#allocation4 + $0x28] sm:$0x1] %v1612_v40  ;;  %v1614_v42 = vrot.slane %v9075_v41, 7  ;;  %v1613_v47 = vsel %vm647_vm15, %v1609_v37, %v1612_v40 }
 0x74a   :  { %v9078_v43 = vpop.f32.mrf.mxu1  ;;  %v9081_v46 = vld [vmem:[#allocation4] sm:$0xff]  ;;  %v1672_v63 = vrot.slane %v1613_v47, 1  ;;  %v1700_v6 = vrot.slane %v1613_v47, 2 }
 0x74b   :  { %1638 = vst [vmem:[#allocation4 + $0x30] sm:$0xfe] %v1614_v42  ;;  %v1615_v45 = vrot.slane %v9078_v43, 7  ;;  %v1724_v22 = vpack.c.bf16 %v9087_v50, %v9081_v46  ;;  %v1668_v58 = vrot.slane %v9081_v46, 1 }
 0x74c   :  { %v9084_v48 = vpop.f32.mrf.mxu1  ;;  %v1645_v49 = vld [vmem:[#allocation4 + $0x8] sm:$0xff] }
 0x74d   :  { %1639 = vst [vmem:[#allocation4 + $0x38] sm:$0xfe] %v1615_v45  ;;  %v1616_v51 = vrot.slane %v9084_v48, 7  ;;  %v1725_v53 = vpack.c.bf16 %v1613_v47, %v1645_v49  ;;  %v1671_v57 = vrot.slane %v1645_v49, 1  ;;  %v1699_v5 = vrot.slane %v1645_v49, 2 }
 0x74e   :  { %v9093_v54 = vpop.f32.mrf.mxu1  ;;  %v9097_v30 = vld [vmem:[#allocation4 + $0x20] sm:$0x3]  ;;  %v1670_v9 = vsel %vm303_vm2, %v1668_v58, %v1669_v1  ;;  %v7679_v58 = vld [vmem:[%s10446_s3 + $0x214] ss:$8 sps:$4 sm:$0xff]  }
 0x74f   :  { %1642 = vst [vmem:[#allocation4 + $0x50] sm:$0x1] %v1616_v51  ;;  %v1618_v56 = vrot.slane %v9093_v54, 7  ;;  %2344 = vmatprep.mubr.bf16.mxu1 %v1725_v53  ;;  %v1674_v59 = vrot.slane %v9097_v30, 1  ;;  %v9107_v44 = vsel %vm647_vm15, %v1614_v42, %v1616_v51  ;;  %v1673_v7 = vsel %vm303_vm2, %v1671_v57, %v1672_v63  ;;  %v7668_v42 = vld [vmem:[%s10446_s3 + $0x240] ss:$8 sps:$4 sm:$0xff]  }
 0x750   :  { %2345 = vmatmul.mubr.bf16.vlgmr.msra.gmra.mxu1 %v1724_v22  ;;  %v1649_v61 = vld [vmem:[#allocation4 + $0x28] sm:$0x3]  ;;  %v1679_v10 = vrot.slane %v9107_v44, 1  ;;  %v1701_v31 = vsel %vm322_vm3, %v1699_v5, %v1700_v6  ;;  %v7673_v51 = vld [vmem:[%s10446_s3 + $0x234] ss:$8 sps:$4 sm:$0xff]  }
 0x751   :  { %1643 = vst [vmem:[#allocation4 + $0x58] sm:$0x1] %v1618_v56  ;;  %2419 = vmatpush1.bf16.msra.mxu1 %v7659_v60  ;;  %v1676_v25 = vrot.slane %v1649_v61, 1  ;;  %v1704_v26 = vrot.slane %v1649_v61, 2  ;;  %v9113_v3 = vsel %vm647_vm15, %v1615_v45, %v1618_v56  ;;  %v1675_v4 = vsel %vm303_vm2, %v1669_v1, %v1674_v59  ;;  %v7676_v56 = vld [vmem:[%s10446_s3 + $0x224] ss:$8 sps:$4 sm:$0xff]  }
 0x752   :  { %2420 = vmatprep.subr.bf16.mxu1 %v7664_v55  ;;  %v9119_v52 = vld [vmem:[#allocation4 + $0x30] sm:$0xff]  ;;  %v1726_v21 = vpack.c.bf16 %v1675_v4, %v1670_v9  ;;  %v1682_v29 = vrot.slane %v9113_v3, 1  ;;  %v7671_v55 = vld [vmem:[%s10446_s3 + $0x230] ss:$8 sps:$4 sm:$0xff]   ;;  %v7691_v4 = vld [vmem:[%s10446_s3 + $0x2d4] ss:$8 sps:$4 sm:$0xff]  }
 0x753   :  { %v1677_v8 = vsel %vm303_vm2, %v1672_v63, %v1676_v25  ;;  %v1730_v17 = vpack.c.bf16 %v9107_v44, %v9119_v52  ;;  %v1705_v18 = vsel %vm322_vm3, %v1700_v6, %v1704_v26  ;;  %v1678_v19 = vrot.slane %v9119_v52, 1  ;;  %v7674_v57 = vld [vmem:[%s10446_s3 + $0x220] ss:$8 sps:$4 sm:$0xff]   ;;  %v7677_v59 = vld [vmem:[%s10446_s3 + $0x210] ss:$8 sps:$4 sm:$0xff]  }
 0x754   :  { %v1727_v16 = vpack.c.bf16 %v1677_v8, %v1673_v7  ;;  %v9125_v20 = vld [vmem:[#allocation4 + $0x38] sm:$0xff]  ;;  %v1729_v11 = vpack.c.bf16 %v1705_v18, %v1701_v31  ;;  %v7685_v63 = vld [vmem:[%s10446_s3 + $0x2f4] ss:$8 sps:$4 sm:$0xff]   ;;  %v7683_v25 = vld [vmem:[%s10446_s3 + $0x2f0] ss:$8 sps:$4 sm:$0xff]   ;;  %v1697_v31 = vrot.slane %v9087_v50, 2 }
 0x755   :  { %2421 = vmatpush1.bf16.msra.mxu1 %v7662_v2  ;;  %v1731_v23 = vpack.c.bf16 %v9113_v3, %v9125_v20  ;;  %v1681_v28 = vrot.slane %v9125_v20, 1  ;;  %v1680_v40 = vsel %vm303_vm2, %v1678_v19, %v1679_v10  ;;  %v7682_v61 = vld [vmem:[%s10446_s3 + $0x204] ss:$8 sps:$4 sm:$0xff]   ;;  %v7680_v1 = vld [vmem:[%s10446_s3 + $0x200] ss:$8 sps:$4 sm:$0xff]   ;;  %v1702_v19 = vrot.slane %v9097_v30, 2 }
 0x756   :  { %2397 = vmatprep.mubr.bf16.mxu0 %v1727_v16  ;;  %2422 = vmatprep.subr.bf16.mxu1 %v7667_v36  ;;  %v9142_v33 = vld [vmem:[#allocation4 + $0x50] sm:$0x3]  ;;  %v7688_v2 = vld [vmem:[%s10446_s3 + $0x2e4] ss:$8 sps:$4 sm:$0xff]   ;;  %v7689_v36 = vld [vmem:[%s10446_s3 + $0x2d0] ss:$8 sps:$4 sm:$0xff]  }
 0x757   :  { %2398 = vmatmul.mubr.bf16.vlgmr.msra.gmra.mxu0 %v1726_v21  ;;  %2354 = vmatprep.mubr.bf16.mxu1 %v1731_v23  ;;  %v1684_v37 = vrot.slane %v9142_v33, 1  ;;  %v1683_v45 = vsel %vm303_vm2, %v1681_v28, %v1682_v29  ;;  %v7686_v26 = vld [vmem:[%s10446_s3 + $0x2e0] ss:$8 sps:$4 sm:$0xff]   ;;  %v7694_v5 = vld [vmem:[%s10446_s3 + $0x2c4] ss:$8 sps:$4 sm:$0xff]   ;;  %v1709_v21 = vrot.slane %v9125_v20, 2 }
 0x758   :  { %2355 = vmatmul.mubr.bf16.gmra.mxu1 %v1730_v17  ;;  %v9145_v62 = vld [vmem:[#allocation4 + $0x58] sm:$0x3]  ;;  %v7697_v7 = vld [vmem:[%s10446_s3 + $0x2b4] ss:$8 sps:$4 sm:$0xff]   ;;  %v7695_v8 = vld [vmem:[%s10446_s3 + $0x2b0] ss:$8 sps:$4 sm:$0xff]  }
 0x759   :  { %2423 = vmatpush1.bf16.msra.mxu1 %v7665_v27  ;;  %2450 = vmatprep.mubr.bf16.mxu1 %v1729_v11  ;;  %v1686_v47 = vrot.slane %v9145_v62, 1  ;;  %v1685_v49 = vsel %vm303_vm2, %v1679_v10, %v1684_v37  ;;  %v7692_v6 = vld [vmem:[%s10446_s3 + $0x2c0] ss:$8 sps:$4 sm:$0xff]   ;;  %v7700_v9 = vld [vmem:[%s10446_s3 + $0x2a4] ss:$8 sps:$4 sm:$0xff]   ;;  %v1710_v23 = vrot.slane %v9113_v3, 2 }
 0x75a   :  { %2424 = vmatprep.subr.bf16.mxu1 %v7670_v32  ;;  %v1732_v60 = vpack.c.bf16 %v1685_v49, %v1680_v40  ;;  %v7698_v10 = vld [vmem:[%s10446_s3 + $0x2a0] ss:$8 sps:$4 sm:$0xff]   ;;  %v7703_v16 = vld [vmem:[%s10446_s3 + $0x294] ss:$8 sps:$4 sm:$0xff]   ;;  %v7701_v17 = vld [vmem:[%s10446_s3 + $0x290] ss:$8 sps:$4 sm:$0xff]   ;;  %v1703_v32 = vsel %vm322_vm3, %v1697_v31, %v1702_v19 }
 0x75b   :  { %v1687_v53 = vsel %vm303_vm2, %v1682_v29, %v1686_v47  ;;  %v7706_v18 = vld [vmem:[%s10446_s3 + $0x284] ss:$8 sps:$4 sm:$0xff]   ;;  %v1714_v27 = vrot.slane %v9145_v62, 2  ;;  %v7704_v28 = vld [vmem:[%s10446_s3 + $0x280] ss:$8 sps:$4 sm:$0xff]   ;;  %v1696_v29 = vrot.slane %v9081_v46, 2  ;;  %v1711_v30 = vsel %vm322_vm3, %v1709_v21, %v1710_v23 }
 0x75c   :  { %v1733_v22 = vpack.c.bf16 %v1687_v53, %v1683_v45  ;;  %v1706_v62 = vrot.slane %v9119_v52, 2  ;;  %v1707_v40 = vrot.slane %v9107_v44, 2  ;;  %v1712_v46 = vrot.slane %v9142_v33, 2 }
 0x75d   :  { %2425 = vmatpush1.bf16.msra.mxu1 %v7668_v42  ;;  %v1715_v20 = vsel %vm322_vm3, %v1710_v23, %v1714_v27  ;;  %v1698_v3 = vsel %vm322_vm3, %v1696_v29, %v1697_v31 }
 0x75e   :  { %2426 = vmatprep.subr.bf16.mxu1 %v7673_v51  ;;  %2407 = vmatprep.mubr.bf16.mxu0 %v1733_v22  ;;  %v1728_v11 = vpack.c.bf16 %v1703_v32, %v1698_v3  ;;  %v1735_v37 = vpack.c.bf16 %v1715_v20, %v1711_v30  ;;  %v1708_v50 = vsel %vm322_vm3, %v1706_v62, %v1707_v40 }
 0x75f   :  { %2408 = vmatmul.mubr.bf16.gmra.mxu0 %v1732_v60  ;;  %v1713_v42 = vsel %vm322_vm3, %v1707_v40, %v1712_v46 }
 0x760   :  { %v1734_v45 = vpack.c.bf16 %v1713_v42, %v1708_v50 }
 0x761   :  { %2427 = vmatpush1.bf16.msra.mxu1 %v7671_v55 }
 0x762   :  { %2428 = vmatprep.subr.bf16.mxu1 %v7676_v56 }
 0x765   :  { %2429 = vmatpush1.bf16.msra.mxu1 %v7674_v57 }
 0x766   :  { %2430 = vmatprep.subr.bf16.mxu1 %v7679_v58 }
 0x769   :  { %2431 = vmatpush1.bf16.msra.mxu1 %v7677_v59 }
 0x76a   :  { %2432 = vmatprep.subr.bf16.mxu1 %v7682_v61 }
 0x76d   :  { %2433 = vmatpush1.bf16.msra.mxu1 %v7680_v1 }
 0x76e   :  { %2434 = vmatprep.subr.bf16.mxu1 %v7685_v63 }
 0x771   :  { %2435 = vmatpush2.bf16.msra.mxu1 %v7683_v25 }
 0x772   :  { %2436 = vmatprep.subr.bf16.mxu1 %v7688_v2 }
 0x775   :  { %2437 = vmatpush2.bf16.msra.mxu1 %v7686_v26 }
 0x776   :  { %2438 = vmatprep.subr.bf16.mxu1 %v7691_v4 }
 0x779   :  { %2439 = vmatpush2.bf16.msra.mxu1 %v7689_v36 }
 0x77a   :  { %2440 = vmatprep.subr.bf16.mxu1 %v7694_v5 }
 0x77d   :  { %2441 = vmatpush2.bf16.msra.mxu1 %v7692_v6 }
 0x77e   :  { %2442 = vmatprep.subr.bf16.mxu1 %v7697_v7 }
 0x781   :  { %2443 = vmatpush2.bf16.msra.mxu1 %v7695_v8 }
 0x782   :  { %2444 = vmatprep.subr.bf16.mxu1 %v7700_v9 }
 0x785   :  { %2445 = vmatpush2.bf16.msra.mxu1 %v7698_v10 }
 0x786   :  { %2446 = vmatprep.subr.bf16.mxu1 %v7703_v16 }
 0x789   :  { %2447 = vmatpush2.bf16.msra.mxu1 %v7701_v17 }
 0x78a   :  { %2448 = vmatprep.subr.bf16.mxu1 %v7706_v18 }
 0x78d   :  { %2449 = vmatpush2.bf16.msra.mxu1 %v7704_v28 }
 0x790   :  { %2451 = vmatmul.mubr.bf16.vlgmr.msra.gmra.mxu1 %v1728_v11 }
 0x791   :  { %2460 = vmatprep.mubr.bf16.mxu1 %v1735_v37 }
 0x798   :  { %2461 = vmatmul.mubr.bf16.gmra.mxu1 %v1734_v45 }
 0x810   :  { %v2346_v47 = vpop.f32.mrf.mxu1 }
 0x812   :  { %v2348_v49 = vpop.f32.mrf.mxu1 }
 0x814   :  { %v2350_v51 = vpop.f32.mrf.mxu1 }
 0x816   :  { %v2352_v60 = vpop.f32.mrf.mxu1 }
 0x817   :  { %v2399_v53 = vpop.f32.mrf.mxu0 }
 0x818   :  { %v2356_v22 = vpop.f32.mrf.mxu1  ;;  %v2400_v25 = vadd.f32 %v2399_v53, %v2346_v47 }
 0x819   :  { %v2401_v55 = vpop.f32.mrf.mxu0 }
 0x81a   :  { %v2358_v52 = vpop.f32.mrf.mxu1  ;;  %v2402_v5 = vadd.f32 %v2401_v55, %v2348_v49 }
 0x81b   :  { %v2403_v56 = vpop.f32.mrf.mxu0 }
 0x81c   :  { %v2360_v44 = vpop.f32.mrf.mxu1  ;;  %v2404_v63 = vadd.f32 %v2403_v56, %v2350_v51 }
 0x81d   :  { %v2405_v57 = vpop.f32.mrf.mxu0 }
 0x81e   :  { %v2362_v58 = vpop.f32.mrf.mxu1  ;;  %v2406_v26 = vadd.f32 %v2405_v57, %v2352_v60 }
 0x81f   :  { %v2409_v33 = vpop.f32.mrf.mxu0 }
 0x820   :  { %v2410_v8 = vadd.f32 %v2409_v33, %v2356_v22 }
 0x821   :  { %v2411_v61 = vpop.f32.mrf.mxu0 }
 0x822   :  { %v2412_v18 = vadd.f32 %v2411_v61, %v2358_v52 }
 0x823   :  { %v2413_v4 = vpop.f32.mrf.mxu0 }
 0x824   :  { %v2414_v29 = vadd.f32 %v2413_v4, %v2360_v44 }
 0x825   :  { %v2415_v19 = vpop.f32.mrf.mxu0 }
 0x826   :  { %v2416_v20 = vadd.f32 %v2415_v19, %v2362_v58 }
 0x850   :  { %v2452_v59 = vpop.f32.mrf.mxu1 }
 0x851   :  { %v9244_v6 = vadd.f32 %v2452_v59, %v2400_v25 }
 0x852   :  { %v2454_v1 = vpop.f32.mrf.mxu1 }
 0x853   :  { %v9248_v10 = vadd.f32 %v2454_v1, %v2402_v5  ;;  %v2507_v23 = vmul.f32 %v9244_v6, %v9244_v6 }
 0x854   :  { %v2456_v2 = vpop.f32.mrf.mxu1 }
 0x855   :  { %v9242_v36 = vadd.f32 %v2456_v2, %v2404_v63  ;;  %v2508_v3 = vmul.f32 %v9248_v10, %v9248_v10 }
 0x856   :  { %v2458_v7 = vpop.f32.mrf.mxu1 }
 0x857   :  { %v9246_v9 = vadd.f32 %v2458_v7, %v2406_v26  ;;  %v2509_v16 = vmul.f32 %v9242_v36, %v9242_v36  ;;  %v2473_v31 = vadd.f32 %v9242_v36, %v9244_v6 }
 0x858   :  { %v2462_v17 = vpop.f32.mrf.mxu1 }
 0x859   :  { %v9252_v21 = vadd.f32 %v2462_v17, %v2410_v8  ;;  %v2510_v27 = vmul.f32 %v9246_v9, %v9246_v9  ;;  %v2515_v11 = vadd.f32 %v2509_v16, %v2507_v23  ;;  %v2482_v62 = vadd.f32 %v9246_v9, %v9248_v10 }
 0x85a   :  { %v2464_v28 = vpop.f32.mrf.mxu1 }
 0x85b   :  { %v2511_v32 = vmul.f32 %v9252_v21, %v9252_v21  ;;  %v9262_v30 = vadd.f32 %v2464_v28, %v2412_v18  ;;  %v2474_v40 = vadd.f32 %v2473_v31, %v9252_v21  ;;  %v2524_v42 = vadd.f32 %v2510_v27, %v2508_v3 }
 0x85c   :  { %v2466_v37 = vpop.f32.mrf.mxu1 }
 0x85d   :  { %v2512_v46 = vmul.f32 %v9262_v30, %v9262_v30  ;;  %v9271_v50 = vadd.f32 %v2466_v37, %v2414_v29  ;;  %v2516_v45 = vadd.f32 %v2515_v11, %v2511_v32  ;;  %v2483_v49 = vadd.f32 %v2482_v62, %v9262_v30 }
 0x85e   :  { %v2468_v47 = vpop.f32.mrf.mxu1 }
 0x85f   :  { %v2475_v51 = vadd.f32 %v2474_v40, %v9271_v50  ;;  %v2513_v53 = vmul.f32 %v9271_v50, %v9271_v50  ;;  %v9277_v60 = vadd.f32 %v2468_v47, %v2416_v20  ;;  %v2525_v22 = vadd.f32 %v2524_v42, %v2512_v46 }
 0x861   :  { %v2476_v55 = vrot.slane %v2475_v51, 4  ;;  %v2517_v52 = vadd.f32 %v2516_v45, %v2513_v53  ;;  %v2484_v56 = vadd.f32 %v2483_v49, %v9277_v60  ;;  %v2514_v44 = vmul.f32 %v9277_v60, %v9277_v60  ;;  %v7707_v49 = vld [vmem:[#allocation6 + $0x70] ss:$8 sps:$4 sm:$0xff]   ;;  %v7712_v53 = vld [vmem:[#allocation6 + $0x64] ss:$8 sps:$4 sm:$0xff]  }
 0x863   :  { %v2477_v57 = vadd.f32 %v2476_v55, %v2475_v51  ;;  %v2518_v33 = vrot.slane %v2517_v52, 4  ;;  %v2485_v58 = vrot.slane %v2484_v56, 4  ;;  %v2526_v59 = vadd.f32 %v2525_v22, %v2514_v44  ;;  %v7709_v51 = vld [vmem:[#allocation6 + $0x74] ss:$8 sps:$4 sm:$0xff]   ;;  %v7713_v22 = vld [vmem:[#allocation6 + $0x170] ss:$8 sps:$4 sm:$0xff]  }
 0x864   :  { %v7715_v55 = vld [vmem:[#allocation6 + $0x174] ss:$8 sps:$4 sm:$0xff]   ;;  %3377 = vmatprep.subr.bf16.mxu0 %v7709_v51  ;;  %v2472_v51 = vld [vmem:[%s10454_s11 + $0x3] sm:$0x1] }
 0x865   :  { %v2478_v61 = vrot.slane %v2477_v57, 2  ;;  %v2519_v1 = vadd.f32 %v2518_v33, %v2517_v52  ;;  %v2486_v63 = vadd.f32 %v2485_v58, %v2484_v56  ;;  %v2527_v25 = vrot.slane %v2526_v59, 4  ;;  %3378 = vmatpush1.bf16.msra.mxu0 %v7707_v49  ;;  %v7710_v52 = vld [vmem:[#allocation6 + $0x60] ss:$8 sps:$4 sm:$0xff]   ;;  %3430 = vmatprep.subr.bf16.mxu1 %v7715_v55  ;;  %v7721_v56 = vld [vmem:[#allocation6 + $0x164] ss:$8 sps:$4 sm:$0xff]  }
 0x866   :  { %3379 = vmatprep.subr.bf16.mxu0 %v7712_v53  ;;  %3431 = vmatpush1.bf16.msra.mxu1 %v7713_v22  ;;  %v7718_v44 = vld [vmem:[#allocation6 + $0x54] ss:$8 sps:$4 sm:$0xff]   ;;  %v7716_v58 = vld [vmem:[#allocation6 + $0x50] ss:$8 sps:$4 sm:$0xff]   ;;  %v7755_v55 = vld [vmem:[#allocation6 + $0x100] ss:$8 sps:$4 sm:$0xff]  }
 0x867   :  { %v2487_v2 = vrot.slane %v2486_v63, 2  ;;  %v2528_v26 = vadd.f32 %v2527_v25, %v2526_v59  ;;  %v2479_v4 = vadd.f32 %v2478_v61, %v2477_v57  ;;  %v2520_v5 = vrot.slane %v2519_v1, 2  ;;  %v7719_v57 = vld [vmem:[#allocation6 + $0x160] ss:$8 sps:$4 sm:$0xff]   ;;  %3432 = vmatprep.subr.bf16.mxu1 %v7721_v56  ;;  %v7727_v33 = vld [vmem:[#allocation6 + $0x154] ss:$8 sps:$4 sm:$0xff]  }
 0x868   :  { %v7724_v59 = vld [vmem:[#allocation6 + $0x44] ss:$8 sps:$4 sm:$0xff]   ;;  %v7725_v61 = vld [vmem:[#allocation6 + $0x150] ss:$8 sps:$4 sm:$0xff]   ;;  %v7730_v25 = vld [vmem:[#allocation6 + $0x34] ss:$8 sps:$4 sm:$0xff]  }
 0x869   :  { %v2480_v7 = vrot.slane %v2479_v4, 1  ;;  %v2488_v8 = vadd.f32 %v2487_v2, %v2486_v63  ;;  %v2521_v16 = vadd.f32 %v2520_v5, %v2519_v1  ;;  %v2529_v17 = vrot.slane %v2528_v26, 2  ;;  %3380 = vmatpush1.bf16.msra.mxu0 %v7710_v52  ;;  %v7733_v1 = vld [vmem:[#allocation6 + $0x144] ss:$8 sps:$4 sm:$0xff]   ;;  %v7722_v63 = vld [vmem:[#allocation6 + $0x40] ss:$8 sps:$4 sm:$0xff]  }
 0x86a   :  { %3381 = vmatprep.subr.bf16.mxu0 %v7718_v44  ;;  %3433 = vmatpush1.bf16.msra.mxu1 %v7719_v57  ;;  %v7731_v2 = vld [vmem:[#allocation6 + $0x140] ss:$8 sps:$4 sm:$0xff]   ;;  %v7752_v53 = vld [vmem:[#allocation6 + $0xf0] ss:$8 sps:$4 sm:$0xff]   ;;  %v7754_v22 = vld [vmem:[#allocation6 + $0xf4] ss:$8 sps:$4 sm:$0xff]  }
 0x86b   :  { %v2489_v18 = vrot.slane %v2488_v8, 1  ;;  %v2522_v19 = vrot.slane %v2521_v16, 1  ;;  %v2530_v23 = vadd.f32 %v2529_v17, %v2528_v26  ;;  %v2481_v27 = vadd.f32 %v2480_v7, %v2479_v4  ;;  %3434 = vmatprep.subr.bf16.mxu1 %v7727_v33  ;;  %v7728_v26 = vld [vmem:[#allocation6 + $0x30] ss:$8 sps:$4 sm:$0xff]   ;;  %v7757_v56 = vld [vmem:[#allocation6 + $0x104] ss:$8 sps:$4 sm:$0xff]  }
 0x86c   :  { %v7758_v57 = vld [vmem:[#allocation6 + $0xe0] ss:$8 sps:$4 sm:$0xff]   ;;  %v7760_v33 = vld [vmem:[#allocation6 + $0xe4] ss:$8 sps:$4 sm:$0xff]  }
 0x86d   :  { %v2490_v28 = vadd.f32 %v2489_v18, %v2488_v8  ;;  %v2531_v29 = vrot.slane %v2530_v23, 1  ;;  %v2523_v32 = vadd.f32 %v2522_v19, %v2521_v16  ;;  %3382 = vmatpush1.bf16.msra.mxu0 %v7716_v58  ;;  %v7761_v58 = vld [vmem:[#allocation6 + $0x1f0] ss:$8 sps:$4 sm:$0xff]  }
 0x86e   :  { %3383 = vmatprep.subr.bf16.mxu0 %v7724_v59  ;;  %3435 = vmatpush1.bf16.msra.mxu1 %v7725_v61  ;;  %v7763_v59 = vld [vmem:[#allocation6 + $0x1f4] ss:$8 sps:$4 sm:$0xff]  }
 0x86f   :  { %v2491_v31 = vadd.f32 %v2490_v28, %v2481_v27  ;;  %v2532_v20 = vadd.f32 %v2531_v29, %v2530_v23  ;;  %3436 = vmatprep.subr.bf16.mxu1 %v7733_v1  ;;  %v7734_v28 = vld [vmem:[#allocation6 + $0x20] ss:$8 sps:$4 sm:$0xff]   ;;  %v7736_v29 = vld [vmem:[#allocation6 + $0x24] ss:$8 sps:$4 sm:$0xff]   ;;  %v7766_v61 = vld [vmem:[#allocation6 + $0xd4] ss:$8 sps:$4 sm:$0xff]  }
 0x870   :  { %v7769_v1 = vld [vmem:[#allocation6 + $0x1e4] ss:$8 sps:$4 sm:$0xff]  }
 0x871   :  { %2493 = vrot.lane.b32.xlu0 %v2491_v31, %s8254_s25  ;;  %v2533_v3 = vadd.f32 %v2532_v20, %v2523_v32  ;;  %3384 = vmatpush1.bf16.msra.mxu0 %v7722_v63  ;;  %v7739_v32 = vld [vmem:[#allocation6 + $0x134] ss:$8 sps:$4 sm:$0xff]   ;;  %v7740_v20 = vld [vmem:[#allocation6 + $0x10] ss:$8 sps:$4 sm:$0xff]  }
 0x872   :  { %3385 = vmatprep.subr.bf16.mxu0 %v7730_v25  ;;  %3437 = vmatpush1.bf16.msra.mxu1 %v7731_v2  ;;  %v7764_v63 = vld [vmem:[#allocation6 + $0xd0] ss:$8 sps:$4 sm:$0xff]   ;;  %v7767_v25 = vld [vmem:[#allocation6 + $0x1e0] ss:$8 sps:$4 sm:$0xff]   ;;  %v7772_v2 = vld [vmem:[#allocation6 + $0xc4] ss:$8 sps:$4 sm:$0xff]  }
 0x873   :  { %2535 = vrot.lane.b32.xlu1 %v2533_v3, %s8254_s25  ;;  %3438 = vmatprep.subr.bf16.mxu1 %v7739_v32  ;;  %v7793_v32 = vld [vmem:[#allocation6 + $0x1a4] ss:$8 sps:$4 sm:$0xff]  }
 0x875   :  { %3386 = vmatpush1.bf16.msra.mxu0 %v7728_v26  ;;  %v7775_v26 = vld [vmem:[#allocation6 + $0x1d4] ss:$8 sps:$4 sm:$0xff]  }
 0x876   :  { %3387 = vmatprep.subr.bf16.mxu0 %v7736_v29  ;;  %v7790_v29 = vld [vmem:[#allocation6 + $0x94] ss:$8 sps:$4 sm:$0xff]  }
 0x879   :  { %3388 = vmatpush1.bf16.msra.mxu0 %v7734_v28  ;;  %v7788_v28 = vld [vmem:[#allocation6 + $0x90] ss:$8 sps:$4 sm:$0xff]  }
 0x8e3   :  { %v2494_v11 = vpop.permute.xlu0 %2493 }
 0x8e4   :  { %v2496_v37 = vadd.f32 %v2494_v11, %v2491_v31  ;;  %v7737_v31 = vld [vmem:[#allocation6 + $0x130] ss:$8 sps:$4 sm:$0xff]   ;;  %v7743_v11 = vld [vmem:[#allocation6 + $0x120] ss:$8 sps:$4 sm:$0xff]  }
 0x8e5   :  { %v2536_v62 = vpop.permute.xlu1 %2535  ;;  %3439 = vmatpush1.bf16.msra.mxu1 %v7737_v31  ;;  %v7791_v31 = vld [vmem:[#allocation6 + $0x1a0] ss:$8 sps:$4 sm:$0xff]  }
 0x8e6   :  { %v2538_v40 = vadd.f32 %v2536_v62, %v2533_v3  ;;  %2498 = vrot.lane.b32.xlu0 %v2496_v37, %s8257_s1  ;;  %v7742_v3 = vld [vmem:[#allocation6 + $0x14] ss:$8 sps:$4 sm:$0xff]   ;;  %v2471_v62 = vld [vmem:[%s10454_s11 + $0x2] sm:$0x1] }
 0x8e7   :  { %3389 = vmatprep.subr.bf16.mxu0 %v7742_v3  ;;  %v7799_v3 = vld [vmem:[#allocation6 + $0x194] ss:$8 sps:$4 sm:$0xff]  }
 0x8e8   :  { %2540 = vrot.lane.b32.xlu1 %v2538_v40, %s8257_s1  ;;  %3390 = vmatpush1.bf16.msra.mxu0 %v7740_v20  ;;  %v7796_v20 = vld [vmem:[#allocation6 + $0x84] ss:$8 sps:$4 sm:$0xff]  }
 0x958   :  { %v2499_v46 = vpop.permute.xlu0 %2498 }
 0x959   :  { %v2501_v42 = vadd.f32 %v2499_v46, %v2496_v37  ;;  %v7745_v37 = vld [vmem:[#allocation6 + $0x124] ss:$8 sps:$4 sm:$0xff]  }
 0x95a   :  { %v2541_v45 = vpop.permute.xlu1 %2540  ;;  %3440 = vmatprep.subr.bf16.mxu1 %v7745_v37  ;;  %v7748_v46 = vld [vmem:[#allocation6 + $0x4] ss:$8 sps:$4 sm:$0xff]   ;;  %v7797_v37 = vld [vmem:[#allocation6 + $0x190] ss:$8 sps:$4 sm:$0xff]  }
 0x95b   :  { %v2543_v47 = vadd.f32 %v2541_v45, %v2538_v40  ;;  %2503 = vrot.lane.b32.xlu0 %v2501_v42, %s8259_s2  ;;  %3441 = vmatpush1.bf16.msra.mxu1 %v7743_v11  ;;  %v7746_v40 = vld [vmem:[#allocation6] ss:$8 sps:$4 sm:$0xff]   ;;  %v7751_v45 = vld [vmem:[#allocation6 + $0x114] ss:$8 sps:$4 sm:$0xff]  }
 0x95c   :  { %3391 = vmatprep.subr.bf16.mxu0 %v7748_v46  ;;  %3442 = vmatprep.subr.bf16.mxu1 %v7751_v45  ;;  %v7794_v11 = vld [vmem:[#allocation6 + $0x80] ss:$8 sps:$4 sm:$0xff]   ;;  %v7805_v46 = vld [vmem:[#allocation6 + $0x274] ss:$8 sps:$4 sm:$0xff]  }
 0x95d   :  { %2545 = vrot.lane.b32.xlu1 %v2543_v47, %s8259_s2  ;;  %3392 = vmatpush1.bf16.msra.mxu0 %v7746_v40  ;;  %v7802_v40 = vld [vmem:[#allocation6 + $0x184] ss:$8 sps:$4 sm:$0xff]  }
 0x95e   :  { %3393 = vmatprep.subr.bf16.mxu0 %v7754_v22 }
 0x961   :  { %3394 = vmatpush2.bf16.msra.mxu0 %v7752_v53 }
 0x962   :  { %3395 = vmatprep.subr.bf16.mxu0 %v7760_v33 }
 0x965   :  { %3396 = vmatpush2.bf16.msra.mxu0 %v7758_v57 }
 0x966   :  { %3397 = vmatprep.subr.bf16.mxu0 %v7766_v61 }
 0x969   :  { %3398 = vmatpush2.bf16.msra.mxu0 %v7764_v63 }
 0x96a   :  { %3399 = vmatprep.subr.bf16.mxu0 %v7772_v2 }
 0x9cd   :  { %v2504_v4 = vpop.permute.xlu0 %2503 }
 0x9ce   :  { %v2506_v5 = vadd.f32 %v2504_v4, %v2501_v42  ;;  %v7749_v42 = vld [vmem:[#allocation6 + $0x110] ss:$8 sps:$4 sm:$0xff]   ;;  %v7770_v4 = vld [vmem:[#allocation6 + $0xc0] ss:$8 sps:$4 sm:$0xff]  }
 0x9cf   :  { %v2546_v7 = vpop.permute.xlu1 %2545  ;;  %3443 = vmatpush1.bf16.msra.mxu1 %v7749_v42  ;;  %3400 = vmatpush2.bf16.msra.mxu0 %v7770_v4 }
 0x9d0   :  { %v2549_v8 = vmul.f32 0.001953125, %v2506_v5  ;;  %v2548_v16 = vadd.f32 %v2546_v7, %v2543_v47  ;;  %3444 = vmatprep.subr.bf16.mxu1 %v7757_v56  ;;  %v7773_v5 = vld [vmem:[#allocation6 + $0x1d0] ss:$8 sps:$4 sm:$0xff]   ;;  %v7778_v7 = vld [vmem:[#allocation6 + $0xb4] ss:$8 sps:$4 sm:$0xff]  }
 0x9d1   :  { %3401 = vmatprep.subr.bf16.mxu0 %v7778_v7 }
 0x9d2   :  { %v2551_v17 = vmul.f32 %v2549_v8, %v2549_v8  ;;  %v2550_v18 = vmul.f32 0.001953125, %v2548_v16  ;;  %v7776_v16 = vld [vmem:[#allocation6 + $0xb0] ss:$8 sps:$4 sm:$0xff]  }
 0x9d3   :  { %3445 = vmatpush1.bf16.msra.mxu1 %v7755_v55  ;;  %3402 = vmatpush2.bf16.msra.mxu0 %v7776_v16 }
 0x9d4   :  { %v2552_v19 = vsub.f32 %v2550_v18, %v2551_v17  ;;  %3446 = vmatprep.subr.bf16.mxu1 %v7763_v59  ;;  %v7779_v17 = vld [vmem:[#allocation6 + $0x1c0] ss:$8 sps:$4 sm:$0xff]   ;;  %v7784_v18 = vld [vmem:[#allocation6 + $0xa4] ss:$8 sps:$4 sm:$0xff]  }
 0x9d5   :  { %3403 = vmatprep.subr.bf16.mxu0 %v7784_v18 }
 0x9d6   :  { %v2553_v23 = vmax.f32 %v2552_v19, 0.0  ;;  %v7787_v19 = vld [vmem:[#allocation6 + $0x1b4] ss:$8 sps:$4 sm:$0xff]  }
 0x9d7   :  { %3447 = vmatpush2.bf16.msra.mxu1 %v7761_v58 }
 0x9d8   :  { %v2554_v27 = vadd.f32 1e-05, %v2553_v23  ;;  %3448 = vmatprep.subr.bf16.mxu1 %v7769_v1  ;;  %v7782_v23 = vld [vmem:[#allocation6 + $0xa0] ss:$8 sps:$4 sm:$0xff]  }
 0x9d9   :  { %3404 = vmatpush2.bf16.msra.mxu0 %v7782_v23 }
 0x9da   :  { %8127 = vrsqrt.f32 %v2554_v27  ;;  %v7785_v27 = vld [vmem:[#allocation6 + $0x1b0] ss:$8 sps:$4 sm:$0xff]   ;;  %3405 = vmatprep.subr.bf16.mxu0 %v7790_v29 }
 0x9db   :  { %3449 = vmatpush2.bf16.msra.mxu1 %v7767_v25 }
 0x9dc   :  { %3450 = vmatprep.subr.bf16.mxu1 %v7775_v26 }
 0x9dd   :  { %3406 = vmatpush2.bf16.msra.mxu0 %v7788_v28 }
 0x9de   :  { %3407 = vmatprep.subr.bf16.mxu0 %v7796_v20 }
 0x9df   :  { %3451 = vmatpush2.bf16.msra.mxu1 %v7773_v5 }
 0x9e1   :  { %3408 = vmatpush2.bf16.msra.mxu0 %v7794_v11 }
 0x9e2   :  { %3483 = vmatprep.subr.bf16.mxu0 %v7805_v46 }
 0x9e7   :  { %v8128_v47 = vpop.eup %8127 }
 0x9e8   :  { %v9291_v49 = vmul.f32 %v8128_v47, %v2471_v62  ;;  %v7800_v62 = vld [vmem:[#allocation6 + $0x180] ss:$8 sps:$4 sm:$0xff]  }
 0x9ea   :  { %2563 = vrot.lane.b32.xlu1 %v9291_v49, %s8253_s0  ;;  %2560 = vrot.lane.b32.xlu0 %v9291_v49, %s8252_s28  ;;  %v2557_v52 = vmul.f32 %v9291_v49, %v2549_v8  ;;  %v7781_v8 = vld [vmem:[#allocation6 + $0x1c4] ss:$8 sps:$4 sm:$0xff]  }
 0x9eb   :  { %3452 = vmatprep.subr.bf16.mxu1 %v7781_v8 }
 0x9ec   :  { %v9301_v44 = vsub.f32 %v2472_v51, %v2557_v52  ;;  %3453 = vmatpush2.bf16.msra.mxu1 %v7779_v17 }
 0x9ed   :  { %3454 = vmatprep.subr.bf16.mxu1 %v7787_v19 }
 0x9ee   :  { %2566 = vrot.lane.b32.xlu0 %v9291_v49, %s8251_s7  ;;  %2589 = vrot.lane.b32.xlu1 %v9301_v44, %s8252_s28 }
 0x9f0   :  { %3455 = vmatpush2.bf16.msra.mxu1 %v7785_v27 }
 0x9f1   :  { %3456 = vmatprep.subr.bf16.mxu1 %v7793_v32 }
 0x9f2   :  { %2569 = vrot.lane.b32.xlu0 %v9291_v49, %s8254_s25  ;;  %2592 = vrot.lane.b32.xlu1 %v9301_v44, %s8253_s0 }
 0x9f4   :  { %3457 = vmatpush2.bf16.msra.mxu1 %v7791_v31 }
 0x9f5   :  { %3458 = vmatprep.subr.bf16.mxu1 %v7799_v3 }
 0x9f6   :  { %2572 = vrot.lane.b32.xlu0 %v9291_v49, %s8255_s17  ;;  %2595 = vrot.lane.b32.xlu1 %v9301_v44, %s8251_s7 }
 0x9f8   :  { %3459 = vmatpush2.bf16.msra.mxu1 %v7797_v37 }
 0x9f9   :  { %3460 = vmatprep.subr.bf16.mxu1 %v7802_v40 }
 0x9fa   :  { %2575 = vrot.lane.b32.xlu0 %v9291_v49, %s8257_s1  ;;  %2598 = vrot.lane.b32.xlu1 %v9301_v44, %s8254_s25 }
 0x9fc   :  { %3461 = vmatpush2.bf16.msra.mxu1 %v7800_v62 }
 0x9fe   :  { %2578 = vrot.lane.b32.xlu0 %v9291_v49, %s8259_s2  ;;  %2601 = vrot.lane.b32.xlu1 %v9301_v44, %s8255_s17 }
 0xa02   :  { %2604 = vrot.lane.b32.xlu0 %v9301_v44, %s8257_s1  ;;  %2607 = vrot.lane.b32.xlu1 %v9301_v44, %s8259_s2 }
 0xa5c   :  { %v2564_v42 = vpop.permute.xlu1 %2563  ;;  %v2561_v45 = vpop.permute.xlu0 %2560 }
 0xa5d   :  { %v2581_v56 = vsel %vm161_vm1, %v9291_v49, %v2561_v45 }
 0xa5e   :  { %v2582_v57 = vsel %vm233_vm8, %v2581_v56, %v2564_v42 }
 0xa60   :  { %v2567_v47 = vpop.permute.xlu0 %2566  ;;  %v2590_v51 = vpop.permute.xlu1 %2589 }
 0xa61   :  { %v2583_v59 = vsel %vm435_vm9, %v2582_v57, %v2567_v47  ;;  %v2610_v26 = vsel %vm161_vm1, %v9301_v44, %v2590_v51 }
 0xa64   :  { %v2570_v53 = vpop.permute.xlu0 %2569  ;;  %v2593_v22 = vpop.permute.xlu1 %2592 }
 0xa65   :  { %v2584_v61 = vsel %vm440_vm10, %v2583_v59, %v2570_v53  ;;  %v2611_v49 = vsel %vm233_vm8, %v2610_v26, %v2593_v22 }
 0xa68   :  { %v2573_v55 = vpop.permute.xlu0 %2572  ;;  %v2596_v52 = vpop.permute.xlu1 %2595 }
 0xa69   :  { %v2585_v1 = vsel %vm445_vm11, %v2584_v61, %v2573_v55  ;;  %v2612_v5 = vsel %vm435_vm9, %v2611_v49, %v2596_v52 }
 0xa6c   :  { %v2576_v33 = vpop.permute.xlu0 %2575  ;;  %v2599_v58 = vpop.permute.xlu1 %2598 }
 0xa6d   :  { %v2586_v63 = vsel %vm10466_vm12, %v2585_v1, %v2576_v33  ;;  %v2613_v8 = vsel %vm440_vm10, %v2612_v5, %v2599_v58 }
 0xa70   :  { %v2579_v25 = vpop.permute.xlu0 %2578  ;;  %v2602_v2 = vpop.permute.xlu1 %2601 }
 0xa71   :  { %v2587_v4 = vsel %vm10465_vm13, %v2586_v63, %v2579_v25  ;;  %v2614_v18 = vsel %vm445_vm11, %v2613_v8, %v2602_v2 }
 0xa72   :  { %v2620_v7 = vrot.slane %v2587_v4, %v8828_v24 }
 0xa74   :  { %v2605_v16 = vpop.permute.xlu0 %2604  ;;  %v2608_v17 = vpop.permute.xlu1 %2607  ;;  %v2621_v23 = vmul.f32 %v2620_v7, %v9244_v6  ;;  %v2622_v27 = vmul.f32 %v2620_v7, %v9248_v10  ;;  %v2623_v28 = vmul.f32 %v2620_v7, %v9242_v36  ;;  %v2624_v29 = vmul.f32 %v2620_v7, %v9246_v9 }
 0xa75   :  { %v2615_v19 = vsel %vm10466_vm12, %v2614_v18, %v2605_v16  ;;  %v2625_v32 = vmul.f32 %v2620_v7, %v9252_v21  ;;  %v2626_v20 = vmul.f32 %v2620_v7, %v9262_v30  ;;  %v2627_v3 = vmul.f32 %v2620_v7, %v9271_v50 }
 0xa76   :  { %v2616_v44 = vsel %vm10465_vm13, %v2615_v19, %v2608_v17  ;;  %v2628_v11 = vmul.f32 %v2620_v7, %v9277_v60  ;;  %v7803_v7 = vld [vmem:[#allocation6 + $0x270] ss:$8 sps:$4 sm:$0xff]  }
 0xa77   :  { %v2632_v31 = vrot.slane %v2616_v44, %v8828_v24 }
 0xa79   :  { %v2633_v37 = vadd.f32 %v2632_v31, %v2621_v23  ;;  %v2634_v6 = vadd.f32 %v2632_v31, %v2622_v27  ;;  %v2635_v62 = vadd.f32 %v2632_v31, %v2623_v28  ;;  %v2636_v40 = vadd.f32 %v2632_v31, %v2624_v29  ;;  %v7808_v23 = vld [vmem:[#allocation6 + $0x264] ss:$8 sps:$4 sm:$0xff]  }
 0xa7a   :  { %v2637_v46 = vadd.f32 %v2632_v31, %v2625_v32  ;;  %v2638_v10 = vadd.f32 %v2632_v31, %v2626_v20  ;;  %v2639_v42 = vadd.f32 %v2632_v31, %v2627_v3  ;;  %v2640_v36 = vadd.f32 %v2632_v31, %v2628_v11 }
 0xa7b   :  { %vm2641_vm7 = vcmp.ge.f32.partialorder %v2633_v37, 0.0  ;;  %vm2642_vm14 = vcmp.ge.f32.partialorder %v2634_v6, 0.0  ;;  %vm2643_vm0 = vcmp.ge.f32.partialorder %v2635_v62, 0.0  ;;  %vm2644_vm5 = vcmp.ge.f32.partialorder %v2636_v40, 0.0 }
 0xa7c   :  { %vm2645_vm6 = vcmp.ge.f32.partialorder %v2637_v46, 0.0  ;;  %vm2646_vm4 = vcmp.ge.f32.partialorder %v2638_v10, 0.0  ;;  %vm2647_vm13 = vcmp.ge.f32.partialorder %v2639_v42, 0.0  ;;  %vm2648_vm12 = vcmp.ge.f32.partialorder %v2640_v36, 0.0 }
 0xa7d   :  { %v2649_v9 = vmul.f32 0.1, %v2633_v37  ;;  %v2650_v21 = vmul.f32 0.1, %v2634_v6  ;;  %v2651_v30 = vmul.f32 0.1, %v2635_v62 }
 0xa7e   :  { %v2652_v50 = vmul.f32 0.1, %v2636_v40  ;;  %v2653_v60 = vmul.f32 0.1, %v2637_v46  ;;  %v2654_v45 = vmul.f32 0.1, %v2638_v10 }
 0xa7f   :  { %v2655_v47 = vmul.f32 0.1, %v2639_v42  ;;  %v2656_v51 = vmul.f32 0.1, %v2640_v36  ;;  %v2657_v53 = vsel %vm2641_vm7, %v2633_v37, %v2649_v9  ;;  %v2658_v22 = vsel %vm2642_vm14, %v2634_v6, %v2650_v21 }
 0xa80   :  { %v2659_v55 = vsel %vm2643_vm0, %v2635_v62, %v2651_v30  ;;  %v2660_v52 = vsel %vm2644_vm5, %v2636_v40, %v2652_v50  ;;  %v9358_v56 = vsel %vm2645_vm6, %v2637_v46, %v2653_v60  ;;  %v2662_v57 = vsel %vm2646_vm4, %v2638_v10, %v2654_v45 }
 0xa81   :  { %v2663_v33 = vsel %vm2647_vm13, %v2639_v42, %v2655_v47  ;;  %v2664_v58 = vsel %vm2648_vm12, %v2640_v36, %v2656_v51  ;;  %v2673_v59 = vrot.slane %v2657_v53, 7  ;;  %v2674_v61 = vrot.slane %v2658_v22, 7  ;;  %v7806_v47 = vld [vmem:[#allocation6 + $0x260] ss:$8 sps:$4 sm:$0xff]  }
 0xa82   :  { %v2675_v1 = vrot.slane %v2659_v55, 7  ;;  %v2677_v63 = vrot.slane %v2660_v52, 7  ;;  %v2679_v25 = vrot.slane %v9358_v56, 7  ;;  %v2680_v2 = vrot.slane %v2662_v57, 7  ;;  %v7811_v55 = vld [vmem:[#allocation6 + $0x254] ss:$8 sps:$4 sm:$0xff]  }
 0xa83   :  { %v2681_v26 = vrot.slane %v2663_v33, 7  ;;  %v2683_v4 = vrot.slane %v2664_v58, 7  ;;  %2697 = vst [vmem:[#allocation4] sm:$0xfe] %v2673_v59  ;;  %2698 = vst [vmem:[#allocation4 + $0x8] sm:$0xfe] %v2674_v61 }
 0xa84   :  { %2701 = vst [vmem:[#allocation4 + $0x20] sm:$0x1] %v2675_v1  ;;  %2702 = vst [vmem:[#allocation4 + $0x28] sm:$0x1] %v2677_v63  ;;  %v9365_v49 = vsel %vm647_vm15, %v2673_v59, %v2675_v1  ;;  %v2678_v5 = vsel %vm647_vm15, %v2674_v61, %v2677_v63  ;;  %v7809_v1 = vld [vmem:[#allocation6 + $0x250] ss:$8 sps:$4 sm:$0xff]  }
 0xa85   :  { %2703 = vst [vmem:[#allocation4 + $0x30] sm:$0xfe] %v2679_v25  ;;  %2704 = vst [vmem:[#allocation4 + $0x38] sm:$0xfe] %v2680_v2  ;;  %v9369_v8 = vsel %vm647_vm15, %v2680_v2, %v2683_v4  ;;  %v2737_v18 = vrot.slane %v2678_v5, 1  ;;  %v2734_v19 = vrot.slane %v9365_v49, 1  ;;  %v9400_v52 = vsel %vm647_vm15, %v2679_v25, %v2681_v26 }
 0xa86   :  { %2707 = vst [vmem:[#allocation4 + $0x50] sm:$0x1] %v2681_v26  ;;  %2708 = vst [vmem:[#allocation4 + $0x58] sm:$0x1] %v2683_v4  ;;  %v2747_v6 = vrot.slane %v9369_v8, 1  ;;  %v2765_v56 = vrot.slane %v2678_v5, 2 }
 0xa87   :  { %v2744_v63 = vrot.slane %v9400_v52, 1  ;;  %v7814_v2 = vld [vmem:[#allocation6 + $0x244] ss:$8 sps:$4 sm:$0xff]   ;;  %vm10469_vm4 = vcmask 785408   ;;  %vm10470_vm12 = vcmask 916480   ;;  %vm10477_vm6 = vcmask 1042432  }
 0xa88   :  { %vm10471_vm13 = vmmov %vm10469_vm4 }
 0xa89   :  { %vm10472_vm7 = vmmov %vm10470_vm12 }
 0xa8a   :  { %v2710_v16 = vld [vmem:[#allocation4 + $0x8] sm:$0xff]  ;;  %v9371_v17 = vld [vmem:[#allocation4] sm:$0xff]  ;;  %vm10474_vm14 = vmmov %vm10472_vm7 }
 0xa8b   :  { %v2790_v44 = vpack.c.bf16 %v2678_v5, %v2710_v16  ;;  %v2789_v27 = vpack.c.bf16 %v9365_v49, %v9371_v17  ;;  %v2714_v29 = vld [vmem:[#allocation4 + $0x28] sm:$0x3]  ;;  %v2736_v31 = vrot.slane %v2710_v16, 1  ;;  %v9378_v32 = vld [vmem:[#allocation4 + $0x20] sm:$0x3]  ;;  %v2733_v3 = vrot.slane %v9371_v17, 1  ;;  %vm10475_vm0 = vmmov %vm10469_vm4 }
 0xa8c   :  { %v9376_v28 = vld [vmem:[#allocation4 + $0x38] sm:$0xff]  ;;  %v2741_v20 = vrot.slane %v2714_v29, 1  ;;  %v2739_v11 = vrot.slane %v9378_v32, 1  ;;  %v9393_v21 = vld [vmem:[#allocation4 + $0x30] sm:$0xff]  ;;  %v2764_v30 = vrot.slane %v2710_v16, 2  ;;  %v2769_v53 = vrot.slane %v2714_v29, 2  ;;  %vm10476_vm5 = vmmov %vm10472_vm7 }
 0xa8d   :  { %v9382_v37 = vld [vmem:[#allocation4 + $0x58] sm:$0x3]  ;;  %3409 = vmatprep.mubr.bf16.mxu0 %v2790_v44  ;;  %v2796_v62 = vpack.c.bf16 %v9369_v8, %v9376_v28  ;;  %v2738_v40 = vsel %vm303_vm2, %v2736_v31, %v2737_v18  ;;  %v2746_v46 = vrot.slane %v9376_v28, 1  ;;  %v2735_v36 = vsel %vm303_vm2, %v2733_v3, %v2734_v19  ;;  %v9395_v50 = vld [vmem:[#allocation4 + $0x50] sm:$0x3] }
 0xa8e   :  { %v2751_v10 = vrot.slane %v9382_v37, 1  ;;  %3410 = vmatmul.mubr.bf16.vlgmr.msra.gmra.mxu0 %v2789_v27  ;;  %v2742_v42 = vsel %vm303_vm2, %v2737_v18, %v2741_v20  ;;  %v2740_v9 = vsel %vm303_vm2, %v2734_v19, %v2739_v11  ;;  %v2743_v33 = vrot.slane %v9393_v21, 1  ;;  %v7817_v18 = vld [vmem:[#allocation6 + $0x234] ss:$8 sps:$4 sm:$0xff]   ;;  %v7815_v19 = vld [vmem:[#allocation6 + $0x230] ss:$8 sps:$4 sm:$0xff]  }
 0xa8f   :  { %3484 = vmatpush1.bf16.msra.mxu0 %v7803_v7  ;;  %3419 = vmatprep.mubr.bf16.mxu0 %v2796_v62  ;;  %v2792_v60 = vpack.c.bf16 %v2742_v42, %v2738_v40  ;;  %v2791_v45 = vpack.c.bf16 %v2740_v9, %v2735_v36  ;;  %v2748_v51 = vsel %vm303_vm2, %v2746_v46, %v2747_v6  ;;  %v2749_v58 = vrot.slane %v9395_v50, 1  ;;  %v7812_v7 = vld [vmem:[#allocation6 + $0x240] ss:$8 sps:$4 sm:$0xff]   ;;  %v7823_v27 = vld [vmem:[#allocation6 + $0x214] ss:$8 sps:$4 sm:$0xff]  }
 0xa90   :  { %3485 = vmatprep.subr.bf16.mxu0 %v7808_v23  ;;  %v2752_v22 = vsel %vm303_vm2, %v2747_v6, %v2751_v10  ;;  %v2766_v59 = vsel %vm322_vm3, %v2764_v30, %v2765_v56  ;;  %v2770_v61 = vsel %vm322_vm3, %v2765_v56, %v2769_v53  ;;  %v2795_v25 = vpack.c.bf16 %v9400_v52, %v9393_v21  ;;  %v7820_v23 = vld [vmem:[#allocation6 + $0x224] ss:$8 sps:$4 sm:$0xff]   ;;  %v7818_v44 = vld [vmem:[#allocation6 + $0x220] ss:$8 sps:$4 sm:$0xff]   ;;  %v7821_v29 = vld [vmem:[#allocation6 + $0x210] ss:$8 sps:$4 sm:$0xff]  }
 0xa91   :  { %3462 = vmatprep.mubr.bf16.mxu1 %v2792_v60  ;;  %v2798_v57 = vpack.c.bf16 %v2752_v22, %v2748_v51  ;;  %v2794_v26 = vpack.c.bf16 %v2770_v61, %v2766_v59  ;;  %v2745_v4 = vsel %vm303_vm2, %v2743_v33, %v2744_v63  ;;  %v2750_v5 = vsel %vm303_vm2, %v2744_v63, %v2749_v58  ;;  %v7826_v31 = vld [vmem:[#allocation6 + $0x204] ss:$8 sps:$4 sm:$0xff]   ;;  %v7824_v20 = vld [vmem:[#allocation6 + $0x200] ss:$8 sps:$4 sm:$0xff]   ;;  %v7829_v3 = vld [vmem:[#allocation6 + $0x2f4] ss:$8 sps:$4 sm:$0xff]  }
 0xa92   :  { %3463 = vmatmul.mubr.bf16.vlgmr.msra.gmra.mxu1 %v2791_v45  ;;  %v2797_v16 = vpack.c.bf16 %v2750_v5, %v2745_v4  ;;  %v7827_v11 = vld [vmem:[#allocation6 + $0x2f0] ss:$8 sps:$4 sm:$0xff]   ;;  %v7832_v6 = vld [vmem:[#allocation6 + $0x2e4] ss:$8 sps:$4 sm:$0xff]   ;;  %v7830_v62 = vld [vmem:[#allocation6 + $0x2e0] ss:$8 sps:$4 sm:$0xff]  }
 0xa93   :  { %3472 = vmatprep.mubr.bf16.mxu1 %v2798_v57  ;;  %3486 = vmatpush1.bf16.msra.mxu0 %v7806_v47  ;;  %v7835_v40 = vld [vmem:[#allocation6 + $0x2d4] ss:$8 sps:$4 sm:$0xff]   ;;  %v7833_v46 = vld [vmem:[#allocation6 + $0x2d0] ss:$8 sps:$4 sm:$0xff]   ;;  %v7838_v10 = vld [vmem:[#allocation6 + $0x2c4] ss:$8 sps:$4 sm:$0xff]  }
 0xa94   :  { %3487 = vmatprep.subr.bf16.mxu0 %v7811_v55  ;;  %v7836_v42 = vld [vmem:[#allocation6 + $0x2c0] ss:$8 sps:$4 sm:$0xff]   ;;  %v7841_v36 = vld [vmem:[#allocation6 + $0x2b4] ss:$8 sps:$4 sm:$0xff]   ;;  %v7839_v9 = vld [vmem:[#allocation6 + $0x2b0] ss:$8 sps:$4 sm:$0xff]  }
 0xa95   :  { %v7844_v30 = vld [vmem:[#allocation6 + $0x2a4] ss:$8 sps:$4 sm:$0xff]   ;;  %v7842_v60 = vld [vmem:[#allocation6 + $0x2a0] ss:$8 sps:$4 sm:$0xff]   ;;  %v7847_v45 = vld [vmem:[#allocation6 + $0x294] ss:$8 sps:$4 sm:$0xff]  }
 0xa96   :  { %3420 = vmatmul.mubr.bf16.gmra.mxu0 %v2795_v25  ;;  %v7845_v47 = vld [vmem:[#allocation6 + $0x290] ss:$8 sps:$4 sm:$0xff]   ;;  %v7850_v51 = vld [vmem:[#allocation6 + $0x284] ss:$8 sps:$4 sm:$0xff]   ;;  %v2761_v53 = vrot.slane %v9371_v17, 2  ;;  %v2767_v22 = vrot.slane %v9378_v32, 2 }
 0xa97   :  { %3488 = vmatpush1.bf16.msra.mxu0 %v7809_v1  ;;  %3515 = vmatprep.mubr.bf16.mxu0 %v2794_v26  ;;  %v2774_v55 = vrot.slane %v9376_v28, 2  ;;  %v2779_v56 = vrot.slane %v9382_v37, 2  ;;  %v7848_v57 = vld [vmem:[#allocation6 + $0x280] ss:$8 sps:$4 sm:$0xff]   ;;  %v2762_v33 = vrot.slane %v9365_v49, 2  ;;  %v2775_v58 = vrot.slane %v9369_v8, 2 }
 0xa98   :  { %3489 = vmatprep.subr.bf16.mxu0 %v7814_v2  ;;  %v2771_v37 = vrot.slane %v9393_v21, 2  ;;  %v2777_v63 = vrot.slane %v9395_v50, 2  ;;  %v2772_v49 = vrot.slane %v9400_v52, 2 }
 0xa99   :  { %v2763_v59 = vsel %vm322_vm3, %v2761_v53, %v2762_v33  ;;  %v2768_v61 = vsel %vm322_vm3, %v2762_v33, %v2767_v22  ;;  %v2776_v1 = vsel %vm322_vm3, %v2774_v55, %v2775_v58  ;;  %v2780_v17 = vsel %vm322_vm3, %v2775_v58, %v2779_v56 }
 0xa9a   :  { %3473 = vmatmul.mubr.bf16.gmra.mxu1 %v2797_v16  ;;  %v2793_v32 = vpack.c.bf16 %v2768_v61, %v2763_v59  ;;  %v2800_v28 = vpack.c.bf16 %v2780_v17, %v2776_v1  ;;  %v2773_v8 = vsel %vm322_vm3, %v2771_v37, %v2772_v49  ;;  %v2778_v25 = vsel %vm322_vm3, %v2772_v49, %v2777_v63 }
 0xa9b   :  { %3490 = vmatpush1.bf16.msra.mxu0 %v7812_v7  ;;  %v2799_v2 = vpack.c.bf16 %v2778_v25, %v2773_v8 }
 0xa9c   :  { %3491 = vmatprep.subr.bf16.mxu0 %v7817_v18 }
 0xa9f   :  { %3492 = vmatpush1.bf16.msra.mxu0 %v7815_v19 }
 0xaa0   :  { %3493 = vmatprep.subr.bf16.mxu0 %v7820_v23 }
 0xaa3   :  { %3494 = vmatpush1.bf16.msra.mxu0 %v7818_v44 }
 0xaa4   :  { %3495 = vmatprep.subr.bf16.mxu0 %v7823_v27 }
 0xaa7   :  { %3496 = vmatpush1.bf16.msra.mxu0 %v7821_v29 }
 0xaa8   :  { %3497 = vmatprep.subr.bf16.mxu0 %v7826_v31 }
 0xaab   :  { %3498 = vmatpush1.bf16.msra.mxu0 %v7824_v20 }
 0xaac   :  { %3499 = vmatprep.subr.bf16.mxu0 %v7829_v3 }
 0xaaf   :  { %3500 = vmatpush2.bf16.msra.mxu0 %v7827_v11 }
 0xab0   :  { %3501 = vmatprep.subr.bf16.mxu0 %v7832_v6 }
 0xab3   :  { %3502 = vmatpush2.bf16.msra.mxu0 %v7830_v62 }
 0xab4   :  { %3503 = vmatprep.subr.bf16.mxu0 %v7835_v40 }
 0xab7   :  { %3504 = vmatpush2.bf16.msra.mxu0 %v7833_v46 }
 0xab8   :  { %3505 = vmatprep.subr.bf16.mxu0 %v7838_v10 }
 0xabb   :  { %3506 = vmatpush2.bf16.msra.mxu0 %v7836_v42 }
 0xabc   :  { %3507 = vmatprep.subr.bf16.mxu0 %v7841_v36 }
 0xabf   :  { %3508 = vmatpush2.bf16.msra.mxu0 %v7839_v9 }
 0xac0   :  { %3509 = vmatprep.subr.bf16.mxu0 %v7844_v30 }
 0xac3   :  { %3510 = vmatpush2.bf16.msra.mxu0 %v7842_v60 }
 0xac4   :  { %3511 = vmatprep.subr.bf16.mxu0 %v7847_v45 }
 0xac7   :  { %3512 = vmatpush2.bf16.msra.mxu0 %v7845_v47 }
 0xac8   :  { %3513 = vmatprep.subr.bf16.mxu0 %v7850_v51 }
 0xacb   :  { %3514 = vmatpush2.bf16.msra.mxu0 %v7848_v57 }
 0xace   :  { %3516 = vmatmul.mubr.bf16.vlgmr.msra.gmra.mxu0 %v2793_v32 }
 0xacf   :  { %3525 = vmatprep.mubr.bf16.mxu0 %v2800_v28 }
 0xad6   :  { %3526 = vmatmul.mubr.bf16.gmra.mxu0 %v2799_v2 }
 0xb4e   :  { %v3411_v26 = vpop.f32.mrf.mxu0 }
 0xb50   :  { %v3413_v4 = vpop.f32.mrf.mxu0 }
 0xb52   :  { %v3415_v5 = vpop.f32.mrf.mxu0  ;;  %v3464_v7 = vpop.f32.mrf.mxu1 }
 0xb53   :  { %v3465_v11 = vadd.f32 %v3464_v7, %v3411_v26 }
 0xb54   :  { %v3417_v16 = vpop.f32.mrf.mxu0  ;;  %v3466_v18 = vpop.f32.mrf.mxu1 }
 0xb55   :  { %v3467_v10 = vadd.f32 %v3466_v18, %v3413_v4 }
 0xb56   :  { %v3421_v19 = vpop.f32.mrf.mxu0  ;;  %v3468_v21 = vpop.f32.mrf.mxu1 }
 0xb57   :  { %v3469_v3 = vadd.f32 %v3468_v21, %v3415_v5 }
 0xb58   :  { %v3423_v23 = vpop.f32.mrf.mxu0  ;;  %v3470_v50 = vpop.f32.mrf.mxu1 }
 0xb59   :  { %v3471_v62 = vadd.f32 %v3470_v50, %v3417_v16 }
 0xb5a   :  { %v3425_v44 = vpop.f32.mrf.mxu0  ;;  %v3474_v27 = vpop.f32.mrf.mxu1 }
 0xb5b   :  { %v3475_v9 = vadd.f32 %v3474_v27, %v3421_v19 }
 0xb5c   :  { %v3427_v29 = vpop.f32.mrf.mxu0  ;;  %v3476_v31 = vpop.f32.mrf.mxu1 }
 0xb5d   :  { %v3477_v51 = vadd.f32 %v3476_v31, %v3423_v23 }
 0xb5e   :  { %v3478_v40 = vpop.f32.mrf.mxu1 }
 0xb5f   :  { %v3479_v33 = vadd.f32 %v3478_v40, %v3425_v44 }
 0xb60   :  { %v3480_v53 = vpop.f32.mrf.mxu1 }
 0xb61   :  { %v3481_v1 = vadd.f32 %v3480_v53, %v3427_v29 }
 0xb8e   :  { %v3517_v52 = vpop.f32.mrf.mxu0 }
 0xb8f   :  { %v9428_v42 = vadd.f32 %v3517_v52, %v3465_v11 }
 0xb90   :  { %v3519_v20 = vpop.f32.mrf.mxu0 }
 0xb91   :  { %v9432_v60 = vadd.f32 %v3519_v20, %v3467_v10  ;;  %v3572_v55 = vmul.f32 %v9428_v42, %v9428_v42 }
 0xb92   :  { %v3521_v6 = vpop.f32.mrf.mxu0 }
 0xb93   :  { %v9426_v46 = vadd.f32 %v3521_v6, %v3469_v3  ;;  %v3573_v17 = vmul.f32 %v9432_v60, %v9432_v60 }
 0xb94   :  { %v3523_v36 = vpop.f32.mrf.mxu0 }
 0xb95   :  { %v9430_v30 = vadd.f32 %v3523_v36, %v3471_v62  ;;  %v3574_v45 = vmul.f32 %v9426_v46, %v9426_v46  ;;  %v3538_v58 = vadd.f32 %v9426_v46, %v9428_v42 }
 0xb96   :  { %v3527_v47 = vpop.f32.mrf.mxu0 }
 0xb97   :  { %v9436_v22 = vadd.f32 %v3527_v47, %v3475_v9  ;;  %v3575_v56 = vmul.f32 %v9430_v30, %v9430_v30  ;;  %v3580_v32 = vadd.f32 %v3574_v45, %v3572_v55  ;;  %v3547_v37 = vadd.f32 %v9430_v30, %v9432_v60 }
 0xb98   :  { %v3529_v57 = vpop.f32.mrf.mxu0 }
 0xb99   :  { %v3576_v59 = vmul.f32 %v9436_v22, %v9436_v22  ;;  %v9446_v61 = vadd.f32 %v3529_v57, %v3477_v51  ;;  %v3539_v63 = vadd.f32 %v3538_v58, %v9436_v22  ;;  %v3589_v25 = vadd.f32 %v3575_v56, %v3573_v17 }
 0xb9a   :  { %v3531_v28 = vpop.f32.mrf.mxu0 }
 0xb9b   :  { %v3577_v49 = vmul.f32 %v9446_v61, %v9446_v61  ;;  %v9455_v8 = vadd.f32 %v3531_v28, %v3479_v33  ;;  %v3581_v2 = vadd.f32 %v3580_v32, %v3576_v59  ;;  %v3548_v4 = vadd.f32 %v3547_v37, %v9446_v61 }
 0xb9c   :  { %v3533_v26 = vpop.f32.mrf.mxu0 }
 0xb9d   :  { %v3540_v5 = vadd.f32 %v3539_v63, %v9455_v8  ;;  %v3578_v7 = vmul.f32 %v9455_v8, %v9455_v8  ;;  %v9461_v16 = vadd.f32 %v3533_v26, %v3481_v1  ;;  %v3590_v18 = vadd.f32 %v3589_v25, %v3577_v49 }
 0xb9f   :  { %v3541_v19 = vrot.slane %v3540_v5, 4  ;;  %v3582_v21 = vadd.f32 %v3581_v2, %v3578_v7  ;;  %v3549_v23 = vadd.f32 %v3548_v4, %v9461_v16  ;;  %v3579_v50 = vmul.f32 %v9461_v16, %v9461_v16  ;;  %v7851_v4 = vld [vmem:[#allocation9 + $0x70] ss:$8 sps:$4 sm:$0xff]   ;;  %v7856_v7 = vld [vmem:[#allocation9 + $0x64] ss:$8 sps:$4 sm:$0xff]  }
 0xba1   :  { %v3542_v44 = vadd.f32 %v3541_v19, %v3540_v5  ;;  %v3583_v27 = vrot.slane %v3582_v21, 4  ;;  %v3550_v29 = vrot.slane %v3549_v23, 4  ;;  %v3591_v52 = vadd.f32 %v3590_v18, %v3579_v50  ;;  %v7853_v5 = vld [vmem:[#allocation9 + $0x74] ss:$8 sps:$4 sm:$0xff]   ;;  %v7857_v18 = vld [vmem:[#allocation9 + $0x170] ss:$8 sps:$4 sm:$0xff]  }
 0xba2   :  { %v7859_v19 = vld [vmem:[#allocation9 + $0x174] ss:$8 sps:$4 sm:$0xff]   ;;  %4426 = vmatprep.subr.bf16.mxu1 %v7853_v5 }
 0xba3   :  { %v3543_v31 = vrot.slane %v3542_v44, 2  ;;  %v3584_v20 = vadd.f32 %v3583_v27, %v3582_v21  ;;  %v3551_v3 = vadd.f32 %v3550_v29, %v3549_v23  ;;  %v3592_v11 = vrot.slane %v3591_v52, 4  ;;  %4427 = vmatpush1.bf16.msra.mxu1 %v7851_v4  ;;  %v7854_v21 = vld [vmem:[#allocation9 + $0x60] ss:$8 sps:$4 sm:$0xff]   ;;  %4479 = vmatprep.subr.bf16.mxu0 %v7859_v19  ;;  %v7865_v23 = vld [vmem:[#allocation9 + $0x164] ss:$8 sps:$4 sm:$0xff]  }
 0xba4   :  { %4428 = vmatprep.subr.bf16.mxu1 %v7856_v7  ;;  %4480 = vmatpush1.bf16.msra.mxu0 %v7857_v18  ;;  %v7862_v50 = vld [vmem:[#allocation9 + $0x54] ss:$8 sps:$4 sm:$0xff]   ;;  %v7860_v29 = vld [vmem:[#allocation9 + $0x50] ss:$8 sps:$4 sm:$0xff]   ;;  %v7899_v19 = vld [vmem:[#allocation9 + $0x100] ss:$8 sps:$4 sm:$0xff]  }
 0xba5   :  { %v3552_v6 = vrot.slane %v3551_v3, 2  ;;  %v3593_v62 = vadd.f32 %v3592_v11, %v3591_v52  ;;  %v3544_v40 = vadd.f32 %v3543_v31, %v3542_v44  ;;  %v3585_v10 = vrot.slane %v3584_v20, 2  ;;  %v7863_v44 = vld [vmem:[#allocation9 + $0x160] ss:$8 sps:$4 sm:$0xff]   ;;  %4481 = vmatprep.subr.bf16.mxu0 %v7865_v23  ;;  %v7871_v27 = vld [vmem:[#allocation9 + $0x154] ss:$8 sps:$4 sm:$0xff]  }
 0xba6   :  { %v7868_v52 = vld [vmem:[#allocation9 + $0x44] ss:$8 sps:$4 sm:$0xff]   ;;  %v7869_v31 = vld [vmem:[#allocation9 + $0x150] ss:$8 sps:$4 sm:$0xff]   ;;  %v7874_v11 = vld [vmem:[#allocation9 + $0x34] ss:$8 sps:$4 sm:$0xff]  }
 0xba7   :  { %v3545_v36 = vrot.slane %v3544_v40, 1  ;;  %v3553_v9 = vadd.f32 %v3552_v6, %v3551_v3  ;;  %v3586_v45 = vadd.f32 %v3585_v10, %v3584_v20  ;;  %v3594_v47 = vrot.slane %v3593_v62, 2  ;;  %4429 = vmatpush1.bf16.msra.mxu1 %v7854_v21  ;;  %v7877_v20 = vld [vmem:[#allocation9 + $0x144] ss:$8 sps:$4 sm:$0xff]   ;;  %v7866_v3 = vld [vmem:[#allocation9 + $0x40] ss:$8 sps:$4 sm:$0xff]  }
 0xba8   :  { %4430 = vmatprep.subr.bf16.mxu1 %v7862_v50  ;;  %4482 = vmatpush1.bf16.msra.mxu0 %v7863_v44  ;;  %v7875_v6 = vld [vmem:[#allocation9 + $0x140] ss:$8 sps:$4 sm:$0xff]   ;;  %v3537_v5 = vld [vmem:[%s10454_s11 + $0x5] sm:$0x1]  ;;  %v7896_v7 = vld [vmem:[#allocation9 + $0xf0] ss:$8 sps:$4 sm:$0xff]  }
 0xba9   :  { %v3554_v51 = vrot.slane %v3553_v9, 1  ;;  %v3587_v53 = vrot.slane %v3586_v45, 1  ;;  %v3595_v55 = vadd.f32 %v3594_v47, %v3593_v62  ;;  %v3546_v56 = vadd.f32 %v3545_v36, %v3544_v40  ;;  %4483 = vmatprep.subr.bf16.mxu0 %v7871_v27  ;;  %v7872_v62 = vld [vmem:[#allocation9 + $0x30] ss:$8 sps:$4 sm:$0xff]   ;;  %v7898_v18 = vld [vmem:[#allocation9 + $0xf4] ss:$8 sps:$4 sm:$0xff]  }
 0xbaa   :  { %v7901_v23 = vld [vmem:[#allocation9 + $0x104] ss:$8 sps:$4 sm:$0xff]   ;;  %v7902_v44 = vld [vmem:[#allocation9 + $0xe0] ss:$8 sps:$4 sm:$0xff]  }
 0xbab   :  { %v3555_v57 = vadd.f32 %v3554_v51, %v3553_v9  ;;  %v3596_v33 = vrot.slane %v3595_v55, 1  ;;  %v3588_v59 = vadd.f32 %v3587_v53, %v3586_v45  ;;  %4431 = vmatpush1.bf16.msra.mxu1 %v7860_v29  ;;  %v7904_v27 = vld [vmem:[#allocation9 + $0xe4] ss:$8 sps:$4 sm:$0xff]   ;;  %v7905_v29 = vld [vmem:[#allocation9 + $0x1f0] ss:$8 sps:$4 sm:$0xff]  }
 0xbac   :  { %4432 = vmatprep.subr.bf16.mxu1 %v7868_v52  ;;  %4484 = vmatpush1.bf16.msra.mxu0 %v7869_v31  ;;  %v7907_v52 = vld [vmem:[#allocation9 + $0x1f4] ss:$8 sps:$4 sm:$0xff]   ;;  %v7908_v31 = vld [vmem:[#allocation9 + $0xd0] ss:$8 sps:$4 sm:$0xff]  }
 0xbad   :  { %v3556_v58 = vadd.f32 %v3555_v57, %v3546_v56  ;;  %v3597_v1 = vadd.f32 %v3596_v33, %v3595_v55  ;;  %4485 = vmatprep.subr.bf16.mxu0 %v7877_v20  ;;  %v7878_v57 = vld [vmem:[#allocation9 + $0x20] ss:$8 sps:$4 sm:$0xff]   ;;  %v7880_v33 = vld [vmem:[#allocation9 + $0x24] ss:$8 sps:$4 sm:$0xff]   ;;  %v7910_v20 = vld [vmem:[#allocation9 + $0xd4] ss:$8 sps:$4 sm:$0xff]  }
 0xbaf   :  { %3558 = vrot.lane.b32.xlu0 %v3556_v58, %s8254_s25  ;;  %v3598_v17 = vadd.f32 %v3597_v1, %v3588_v59  ;;  %4433 = vmatpush1.bf16.msra.mxu1 %v7866_v3  ;;  %v7883_v59 = vld [vmem:[#allocation9 + $0x134] ss:$8 sps:$4 sm:$0xff]   ;;  %v7884_v1 = vld [vmem:[#allocation9 + $0x10] ss:$8 sps:$4 sm:$0xff]   ;;  %v7911_v3 = vld [vmem:[#allocation9 + $0x1e0] ss:$8 sps:$4 sm:$0xff]  }
 0xbb0   :  { %4434 = vmatprep.subr.bf16.mxu1 %v7874_v11  ;;  %4486 = vmatpush1.bf16.msra.mxu0 %v7875_v6  ;;  %v7913_v11 = vld [vmem:[#allocation9 + $0x1e4] ss:$8 sps:$4 sm:$0xff]  }
 0xbb1   :  { %3600 = vrot.lane.b32.xlu1 %v3598_v17, %s8254_s25  ;;  %4487 = vmatprep.subr.bf16.mxu0 %v7883_v59  ;;  %v7916_v6 = vld [vmem:[#allocation9 + $0xc4] ss:$8 sps:$4 sm:$0xff]   ;;  %v7935_v59 = vld [vmem:[#allocation9 + $0x1a0] ss:$8 sps:$4 sm:$0xff]  }
 0xbb3   :  { %4435 = vmatpush1.bf16.msra.mxu1 %v7872_v62  ;;  %v7919_v62 = vld [vmem:[#allocation9 + $0x1d4] ss:$8 sps:$4 sm:$0xff]  }
 0xbb4   :  { %4436 = vmatprep.subr.bf16.mxu1 %v7880_v33  ;;  %v7937_v33 = vld [vmem:[#allocation9 + $0x1a4] ss:$8 sps:$4 sm:$0xff]  }
 0xbb7   :  { %4437 = vmatpush1.bf16.msra.mxu1 %v7878_v57  ;;  %v7934_v57 = vld [vmem:[#allocation9 + $0x94] ss:$8 sps:$4 sm:$0xff]  }
 0xc21   :  { %v3559_v32 = vpop.permute.xlu0 %3558 }
 0xc22   :  { %v3561_v28 = vadd.f32 %v3559_v32, %v3556_v58  ;;  %v7881_v58 = vld [vmem:[#allocation9 + $0x130] ss:$8 sps:$4 sm:$0xff]   ;;  %v7887_v32 = vld [vmem:[#allocation9 + $0x120] ss:$8 sps:$4 sm:$0xff]  }
 0xc23   :  { %v3601_v37 = vpop.permute.xlu1 %3600  ;;  %4488 = vmatpush1.bf16.msra.mxu0 %v7881_v58  ;;  %v7932_v58 = vld [vmem:[#allocation9 + $0x90] ss:$8 sps:$4 sm:$0xff]  }
 0xc24   :  { %v3603_v63 = vadd.f32 %v3601_v37, %v3598_v17  ;;  %3563 = vrot.lane.b32.xlu0 %v3561_v28, %s8257_s1  ;;  %v7886_v17 = vld [vmem:[#allocation9 + $0x14] ss:$8 sps:$4 sm:$0xff]  }
 0xc25   :  { %4438 = vmatprep.subr.bf16.mxu1 %v7886_v17  ;;  %v3536_v37 = vld [vmem:[%s10454_s11 + $0x4] sm:$0x1] }
 0xc26   :  { %3605 = vrot.lane.b32.xlu1 %v3603_v63, %s8257_s1  ;;  %4439 = vmatpush1.bf16.msra.mxu1 %v7884_v1  ;;  %v7940_v1 = vld [vmem:[#allocation9 + $0x84] ss:$8 sps:$4 sm:$0xff]   ;;  %v7943_v17 = vld [vmem:[#allocation9 + $0x194] ss:$8 sps:$4 sm:$0xff]  }
 0xc96   :  { %v3564_v49 = vpop.permute.xlu0 %3563 }
 0xc97   :  { %v3566_v25 = vadd.f32 %v3564_v49, %v3561_v28  ;;  %v7889_v28 = vld [vmem:[#allocation9 + $0x124] ss:$8 sps:$4 sm:$0xff]  }
 0xc98   :  { %v3606_v2 = vpop.permute.xlu1 %3605  ;;  %4489 = vmatprep.subr.bf16.mxu0 %v7889_v28  ;;  %v7892_v49 = vld [vmem:[#allocation9 + $0x4] ss:$8 sps:$4 sm:$0xff]   ;;  %v7941_v28 = vld [vmem:[#allocation9 + $0x190] ss:$8 sps:$4 sm:$0xff]  }
 0xc99   :  { %v3608_v26 = vadd.f32 %v3606_v2, %v3603_v63  ;;  %3568 = vrot.lane.b32.xlu0 %v3566_v25, %s8259_s2  ;;  %4490 = vmatpush1.bf16.msra.mxu0 %v7887_v32  ;;  %v7890_v63 = vld [vmem:[#allocation9] ss:$8 sps:$4 sm:$0xff]   ;;  %v7895_v2 = vld [vmem:[#allocation9 + $0x114] ss:$8 sps:$4 sm:$0xff]  }
 0xc9a   :  { %4440 = vmatprep.subr.bf16.mxu1 %v7892_v49  ;;  %4491 = vmatprep.subr.bf16.mxu0 %v7895_v2  ;;  %v7938_v32 = vld [vmem:[#allocation9 + $0x80] ss:$8 sps:$4 sm:$0xff]  }
 0xc9b   :  { %3610 = vrot.lane.b32.xlu1 %v3608_v26, %s8259_s2  ;;  %4441 = vmatpush1.bf16.msra.mxu1 %v7890_v63  ;;  %v7949_v63 = vld [vmem:[#allocation9 + $0x274] ss:$8 sps:$4 sm:$0xff]   ;;  %v7944_v49 = vld [vmem:[#allocation9 + $0x180] ss:$8 sps:$4 sm:$0xff]  }
 0xc9c   :  { %4442 = vmatprep.subr.bf16.mxu1 %v7898_v18 }
 0xc9f   :  { %4443 = vmatpush2.bf16.msra.mxu1 %v7896_v7 }
 0xca0   :  { %4444 = vmatprep.subr.bf16.mxu1 %v7904_v27 }
 0xca3   :  { %4445 = vmatpush2.bf16.msra.mxu1 %v7902_v44 }
 0xca4   :  { %4446 = vmatprep.subr.bf16.mxu1 %v7910_v20 }
 0xca7   :  { %4447 = vmatpush2.bf16.msra.mxu1 %v7908_v31 }
 0xca8   :  { %4448 = vmatprep.subr.bf16.mxu1 %v7916_v6 }
 0xd0b   :  { %v3569_v40 = vpop.permute.xlu0 %3568 }
 0xd0c   :  { %v3571_v10 = vadd.f32 %v3569_v40, %v3566_v25  ;;  %v7893_v25 = vld [vmem:[#allocation9 + $0x110] ss:$8 sps:$4 sm:$0xff]   ;;  %v7914_v40 = vld [vmem:[#allocation9 + $0xc0] ss:$8 sps:$4 sm:$0xff]  }
 0xd0d   :  { %v3611_v36 = vpop.permute.xlu1 %3610  ;;  %4492 = vmatpush1.bf16.msra.mxu0 %v7893_v25  ;;  %4449 = vmatpush2.bf16.msra.mxu1 %v7914_v40 }
 0xd0e   :  { %v3614_v9 = vmul.f32 0.001953125, %v3571_v10  ;;  %v3613_v45 = vadd.f32 %v3611_v36, %v3608_v26  ;;  %4493 = vmatprep.subr.bf16.mxu0 %v7901_v23  ;;  %v7917_v10 = vld [vmem:[#allocation9 + $0x1d0] ss:$8 sps:$4 sm:$0xff]   ;;  %v7922_v36 = vld [vmem:[#allocation9 + $0xb4] ss:$8 sps:$4 sm:$0xff]  }
 0xd0f   :  { %4450 = vmatprep.subr.bf16.mxu1 %v7922_v36 }
 0xd10   :  { %v3616_v47 = vmul.f32 %v3614_v9, %v3614_v9  ;;  %v3615_v51 = vmul.f32 0.001953125, %v3613_v45  ;;  %v7920_v45 = vld [vmem:[#allocation9 + $0xb0] ss:$8 sps:$4 sm:$0xff]  }
 0xd11   :  { %4494 = vmatpush1.bf16.msra.mxu0 %v7899_v19  ;;  %4451 = vmatpush2.bf16.msra.mxu1 %v7920_v45 }
 0xd12   :  { %v3617_v53 = vsub.f32 %v3615_v51, %v3616_v47  ;;  %4495 = vmatprep.subr.bf16.mxu0 %v7907_v52  ;;  %v7923_v47 = vld [vmem:[#allocation9 + $0x1c0] ss:$8 sps:$4 sm:$0xff]   ;;  %v7928_v51 = vld [vmem:[#allocation9 + $0xa4] ss:$8 sps:$4 sm:$0xff]  }
 0xd13   :  { %4452 = vmatprep.subr.bf16.mxu1 %v7928_v51 }
 0xd14   :  { %v3618_v55 = vmax.f32 %v3617_v53, 0.0  ;;  %v7926_v53 = vld [vmem:[#allocation9 + $0xa0] ss:$8 sps:$4 sm:$0xff]  }
 0xd15   :  { %4496 = vmatpush2.bf16.msra.mxu0 %v7905_v29  ;;  %4453 = vmatpush2.bf16.msra.mxu1 %v7926_v53 }
 0xd16   :  { %v3619_v56 = vadd.f32 1e-05, %v3618_v55  ;;  %4497 = vmatprep.subr.bf16.mxu0 %v7913_v11  ;;  %v7929_v55 = vld [vmem:[#allocation9 + $0x1b0] ss:$8 sps:$4 sm:$0xff]   ;;  %4454 = vmatprep.subr.bf16.mxu1 %v7934_v57 }
 0xd18   :  { %8129 = vrsqrt.f32 %v3619_v56  ;;  %v7931_v56 = vld [vmem:[#allocation9 + $0x1b4] ss:$8 sps:$4 sm:$0xff]  }
 0xd19   :  { %4498 = vmatpush2.bf16.msra.mxu0 %v7911_v3  ;;  %4455 = vmatpush2.bf16.msra.mxu1 %v7932_v58 }
 0xd1a   :  { %4499 = vmatprep.subr.bf16.mxu0 %v7919_v62  ;;  %4456 = vmatprep.subr.bf16.mxu1 %v7940_v1 }
 0xd1d   :  { %4500 = vmatpush2.bf16.msra.mxu0 %v7917_v10  ;;  %4457 = vmatpush2.bf16.msra.mxu1 %v7938_v32 }
 0xd1e   :  { %4532 = vmatprep.subr.bf16.mxu1 %v7949_v63 }
 0xd25   :  { %v8130_v26 = vpop.eup %8129 }
 0xd26   :  { %v9475_v4 = vmul.f32 %v8130_v26, %v3536_v37  ;;  %v7946_v37 = vld [vmem:[#allocation9 + $0x184] ss:$8 sps:$4 sm:$0xff]  }
 0xd28   :  { %3628 = vrot.lane.b32.xlu1 %v9475_v4, %s8253_s0  ;;  %3625 = vrot.lane.b32.xlu0 %v9475_v4, %s8252_s28  ;;  %v3622_v21 = vmul.f32 %v9475_v4, %v3614_v9  ;;  %v7925_v9 = vld [vmem:[#allocation9 + $0x1c4] ss:$8 sps:$4 sm:$0xff]  }
 0xd29   :  { %4501 = vmatprep.subr.bf16.mxu0 %v7925_v9 }
 0xd2a   :  { %v9485_v50 = vsub.f32 %v3537_v5, %v3622_v21  ;;  %4502 = vmatpush2.bf16.msra.mxu0 %v7923_v47 }
 0xd2b   :  { %4503 = vmatprep.subr.bf16.mxu0 %v7931_v56 }
 0xd2c   :  { %3631 = vrot.lane.b32.xlu0 %v9475_v4, %s8251_s7  ;;  %3654 = vrot.lane.b32.xlu1 %v9485_v50, %s8252_s28 }
 0xd2e   :  { %4504 = vmatpush2.bf16.msra.mxu0 %v7929_v55 }
 0xd2f   :  { %4505 = vmatprep.subr.bf16.mxu0 %v7937_v33 }
 0xd30   :  { %3634 = vrot.lane.b32.xlu0 %v9475_v4, %s8254_s25  ;;  %3657 = vrot.lane.b32.xlu1 %v9485_v50, %s8253_s0 }
 0xd32   :  { %4506 = vmatpush2.bf16.msra.mxu0 %v7935_v59 }
 0xd33   :  { %4507 = vmatprep.subr.bf16.mxu0 %v7943_v17 }
 0xd34   :  { %3637 = vrot.lane.b32.xlu0 %v9475_v4, %s8255_s17  ;;  %3660 = vrot.lane.b32.xlu1 %v9485_v50, %s8251_s7 }
 0xd36   :  { %4508 = vmatpush2.bf16.msra.mxu0 %v7941_v28 }
 0xd37   :  { %4509 = vmatprep.subr.bf16.mxu0 %v7946_v37 }
 0xd38   :  { %3640 = vrot.lane.b32.xlu0 %v9475_v4, %s8257_s1  ;;  %3663 = vrot.lane.b32.xlu1 %v9485_v50, %s8254_s25 }
 0xd3a   :  { %4510 = vmatpush2.bf16.msra.mxu0 %v7944_v49 }
 0xd3c   :  { %3643 = vrot.lane.b32.xlu0 %v9475_v4, %s8259_s2  ;;  %3666 = vrot.lane.b32.xlu1 %v9485_v50, %s8255_s17 }
 0xd40   :  { %3669 = vrot.lane.b32.xlu0 %v9485_v50, %s8257_s1  ;;  %3672 = vrot.lane.b32.xlu1 %v9485_v50, %s8259_s2 }
 0xd9a   :  { %v3629_v25 = vpop.permute.xlu1 %3628  ;;  %v3626_v2 = vpop.permute.xlu0 %3625 }
 0xd9b   :  { %v3646_v23 = vsel %vm161_vm1, %v9475_v4, %v3626_v2 }
 0xd9c   :  { %v3647_v44 = vsel %vm233_vm8, %v3646_v23, %v3629_v25 }
 0xd9e   :  { %v3632_v26 = vpop.permute.xlu0 %3631  ;;  %v3655_v5 = vpop.permute.xlu1 %3654 }
 0xd9f   :  { %v3648_v52 = vsel %vm435_vm9, %v3647_v44, %v3632_v26  ;;  %v3675_v62 = vsel %vm161_vm1, %v9485_v50, %v3655_v5 }
 0xda2   :  { %v3635_v7 = vpop.permute.xlu0 %3634  ;;  %v3658_v18 = vpop.permute.xlu1 %3657 }
 0xda3   :  { %v3649_v31 = vsel %vm440_vm10, %v3648_v52, %v3635_v7  ;;  %v3676_v4 = vsel %vm233_vm8, %v3675_v62, %v3658_v18 }
 0xda6   :  { %v3638_v19 = vpop.permute.xlu0 %3637  ;;  %v3661_v21 = vpop.permute.xlu1 %3660 }
 0xda7   :  { %v3650_v20 = vsel %vm445_vm11, %v3649_v31, %v3638_v19  ;;  %v3677_v10 = vsel %vm435_vm9, %v3676_v4, %v3661_v21 }
 0xdaa   :  { %v3641_v27 = vpop.permute.xlu0 %3640  ;;  %v3664_v29 = vpop.permute.xlu1 %3663 }
 0xdab   :  { %v3651_v3 = vsel %vm10469_vm4, %v3650_v20, %v3641_v27  ;;  %v3678_v9 = vsel %vm440_vm10, %v3677_v10, %v3664_v29 }
 0xdae   :  { %v3644_v11 = vpop.permute.xlu0 %3643  ;;  %v3667_v6 = vpop.permute.xlu1 %3666 }
 0xdaf   :  { %v3652_v40 = vsel %vm10470_vm12, %v3651_v3, %v3644_v11  ;;  %v3679_v51 = vsel %vm445_vm11, %v3678_v9, %v3667_v6  ;;  %v7947_v11 = vld [vmem:[#allocation9 + $0x270] ss:$8 sps:$4 sm:$0xff]  }
 0xdb0   :  { %v3685_v36 = vrot.slane %v3652_v40, %v8828_v24 }
 0xdb2   :  { %v3670_v45 = vpop.permute.xlu0 %3669  ;;  %v3673_v47 = vpop.permute.xlu1 %3672  ;;  %v3686_v55 = vmul.f32 %v3685_v36, %v9428_v42  ;;  %v3687_v56 = vmul.f32 %v3685_v36, %v9432_v60  ;;  %v3688_v57 = vmul.f32 %v3685_v36, %v9426_v46  ;;  %v3689_v33 = vmul.f32 %v3685_v36, %v9430_v30 }
 0xdb3   :  { %v3680_v53 = vsel %vm10471_vm13, %v3679_v51, %v3670_v45  ;;  %v3690_v59 = vmul.f32 %v3685_v36, %v9436_v22  ;;  %v3691_v1 = vmul.f32 %v3685_v36, %v9446_v61  ;;  %v3692_v17 = vmul.f32 %v3685_v36, %v9455_v8 }
 0xdb4   :  { %v3681_v50 = vsel %vm10472_vm7, %v3680_v53, %v3673_v47  ;;  %v3693_v32 = vmul.f32 %v3685_v36, %v9461_v16  ;;  %vm10481_vm7 = vcmask 1043456  }
 0xdb5   :  { %v3697_v58 = vrot.slane %v3681_v50, %v8828_v24  ;;  %v7952_v50 = vld [vmem:[#allocation9 + $0x264] ss:$8 sps:$4 sm:$0xff]  }
 0xdb7   :  { %v3698_v28 = vadd.f32 %v3697_v58, %v3686_v55  ;;  %v3699_v42 = vadd.f32 %v3697_v58, %v3687_v56  ;;  %v3700_v37 = vadd.f32 %v3697_v58, %v3688_v57  ;;  %v3701_v63 = vadd.f32 %v3697_v58, %v3689_v33 }
 0xdb8   :  { %v3702_v49 = vadd.f32 %v3697_v58, %v3690_v59  ;;  %v3703_v60 = vadd.f32 %v3697_v58, %v3691_v1  ;;  %v3704_v25 = vadd.f32 %v3697_v58, %v3692_v17  ;;  %v3705_v46 = vadd.f32 %v3697_v58, %v3693_v32 }
 0xdb9   :  { %v3706_v30 = vadd.f32 %v3698_v28, %v9063_v34  ;;  %v3707_v2 = vadd.f32 %v3699_v42, %v9066_v35  ;;  %v3708_v22 = vadd.f32 %v3700_v37, %v9069_v38  ;;  %v3709_v61 = vadd.f32 %v3701_v63, %v9072_v39 }
 0xdba   :  { %v3710_v8 = vadd.f32 %v3702_v49, %v9075_v41  ;;  %v3711_v16 = vadd.f32 %v3703_v60, %v9078_v43  ;;  %v3712_v26 = vadd.f32 %v3704_v25, %v9084_v48  ;;  %v3713_v5 = vadd.f32 %v3705_v46, %v9093_v54  ;;  %v7950_v49 = vld [vmem:[#allocation9 + $0x260] ss:$8 sps:$4 sm:$0xff]  }
 0xdbb   :  { %v3722_v7 = vrot.slane %v3706_v30, 7  ;;  %v3723_v18 = vrot.slane %v3707_v2, 7  ;;  %v3724_v19 = vrot.slane %v3708_v22, 7  ;;  %v3726_v21 = vrot.slane %v3709_v61, 7  ;;  %v7955_v22 = vld [vmem:[#allocation9 + $0x254] ss:$8 sps:$4 sm:$0xff]  }
 0xdbc   :  { %v3728_v23 = vrot.slane %v3710_v8, 7  ;;  %v3729_v44 = vrot.slane %v3711_v16, 7  ;;  %v3730_v27 = vrot.slane %v3712_v26, 7  ;;  %v3732_v29 = vrot.slane %v3713_v5, 7 }
 0xdbd   :  { %v9546_v52 = vsel %vm647_vm15, %v3722_v7, %v3724_v19  ;;  %v3727_v31 = vsel %vm647_vm15, %v3723_v18, %v3726_v21  ;;  %3750 = vst [vmem:[#allocation4 + $0x20] sm:$0x1] %v3724_v19  ;;  %3746 = vst [vmem:[#allocation4] sm:$0xfe] %v3722_v7  ;;  %v7953_v19 = vld [vmem:[#allocation9 + $0x250] ss:$8 sps:$4 sm:$0xff]  }
 0xdbe   :  { %3747 = vst [vmem:[#allocation4 + $0x8] sm:$0xfe] %v3723_v18  ;;  %3751 = vst [vmem:[#allocation4 + $0x28] sm:$0x1] %v3726_v21  ;;  %v9550_v20 = vsel %vm647_vm15, %v3728_v23, %v3730_v27  ;;  %v9553_v3 = vsel %vm647_vm15, %v3729_v44, %v3732_v29  ;;  %v3786_v10 = vrot.slane %v3727_v31, 1  ;;  %v3783_v51 = vrot.slane %v9546_v52, 1 }
 0xdbf   :  { %3752 = vst [vmem:[#allocation4 + $0x30] sm:$0xfe] %v3728_v23  ;;  %3753 = vst [vmem:[#allocation4 + $0x38] sm:$0xfe] %v3729_v44  ;;  %v3796_v57 = vrot.slane %v9553_v3, 1  ;;  %v3814_v37 = vrot.slane %v3727_v31, 2 }
 0xdc0   :  { %3756 = vst [vmem:[#allocation4 + $0x50] sm:$0x1] %v3730_v27  ;;  %3757 = vst [vmem:[#allocation4 + $0x58] sm:$0x1] %v3732_v29  ;;  %v3793_v21 = vrot.slane %v9550_v20, 1 }
 0xdc1   :  { %v7958_v44 = vld [vmem:[#allocation9 + $0x244] ss:$8 sps:$4 sm:$0xff]   ;;  %vm10473_vm15 = vmmov %vm10469_vm4 }
 0xdc2   :  { %vm10478_vm4 = vmmov %vm10477_vm6 }
 0xdc3   :  { %vm10479_vm12 = vmmov %vm10478_vm4 }
 0xdc4   :  { %v9555_v62 = vld [vmem:[#allocation4] sm:$0xff]  ;;  %vm10480_vm13 = vmmov %vm10478_vm4 }
 0xdc5   :  { %v3759_v6 = vld [vmem:[#allocation4 + $0x8] sm:$0xff]  ;;  %v3782_v9 = vrot.slane %v9555_v62, 1  ;;  %v9560_v47 = vld [vmem:[#allocation4 + $0x20] sm:$0x3]  ;;  %v3838_v53 = vpack.c.bf16 %v9546_v52, %v9555_v62 }
 0xdc6   :  { %v3763_v40 = vld [vmem:[#allocation4 + $0x28] sm:$0x3]  ;;  %v3785_v4 = vrot.slane %v3759_v6, 1  ;;  %v3839_v36 = vpack.c.bf16 %v3727_v31, %v3759_v6  ;;  %v9558_v45 = vld [vmem:[#allocation4 + $0x38] sm:$0xff]  ;;  %v3813_v1 = vrot.slane %v3759_v6, 2  ;;  %v3788_v32 = vrot.slane %v9560_v47, 1 }
 0xdc7   :  { %v3795_v55 = vrot.slane %v9558_v45, 1  ;;  %v9566_v56 = vld [vmem:[#allocation4 + $0x58] sm:$0x3]  ;;  %v3845_v33 = vpack.c.bf16 %v9553_v3, %v9558_v45  ;;  %v3790_v59 = vrot.slane %v3763_v40, 1  ;;  %v3784_v17 = vsel %vm303_vm2, %v3782_v9, %v3783_v51  ;;  %v9575_v42 = vld [vmem:[#allocation4 + $0x30] sm:$0xff] }
 0xdc8   :  { %4458 = vmatprep.mubr.bf16.mxu1 %v3839_v36  ;;  %v3787_v58 = vsel %vm303_vm2, %v3785_v4, %v3786_v10  ;;  %v3800_v28 = vrot.slane %v9566_v56, 1  ;;  %v9579_v25 = vld [vmem:[#allocation4 + $0x50] sm:$0x3]  ;;  %v3789_v30 = vsel %vm303_vm2, %v3783_v51, %v3788_v32  ;;  %v3818_v61 = vrot.slane %v3763_v40, 2  ;;  %v7961_v6 = vld [vmem:[#allocation9 + $0x234] ss:$8 sps:$4 sm:$0xff]  }
 0xdc9   :  { %4459 = vmatmul.mubr.bf16.vlgmr.msra.gmra.mxu1 %v3838_v53  ;;  %v3791_v63 = vsel %vm303_vm2, %v3786_v10, %v3790_v59  ;;  %v3797_v60 = vsel %vm303_vm2, %v3795_v55, %v3796_v57  ;;  %v3840_v8 = vpack.c.bf16 %v3789_v30, %v3784_v17  ;;  %v3792_v16 = vrot.slane %v9575_v42, 1  ;;  %v7959_v4 = vld [vmem:[#allocation9 + $0x230] ss:$8 sps:$4 sm:$0xff]   ;;  %v7964_v10 = vld [vmem:[#allocation9 + $0x224] ss:$8 sps:$4 sm:$0xff]  }
 0xdca   :  { %4533 = vmatpush1.bf16.msra.mxu1 %v7947_v11  ;;  %4468 = vmatprep.mubr.bf16.mxu1 %v3845_v33  ;;  %v3841_v46 = vpack.c.bf16 %v3791_v63, %v3787_v58  ;;  %v3801_v2 = vsel %vm303_vm2, %v3796_v57, %v3800_v28  ;;  %v3815_v5 = vsel %vm322_vm3, %v3813_v1, %v3814_v37  ;;  %v3798_v18 = vrot.slane %v9579_v25, 1  ;;  %v7956_v11 = vld [vmem:[#allocation9 + $0x240] ss:$8 sps:$4 sm:$0xff]   ;;  %v7967_v9 = vld [vmem:[#allocation9 + $0x214] ss:$8 sps:$4 sm:$0xff]  }
 0xdcb   :  { %4534 = vmatprep.subr.bf16.mxu1 %v7952_v50  ;;  %v3847_v26 = vpack.c.bf16 %v3801_v2, %v3797_v60  ;;  %v3819_v7 = vsel %vm322_vm3, %v3814_v37, %v3818_v61  ;;  %v3844_v23 = vpack.c.bf16 %v9550_v20, %v9575_v42  ;;  %v3794_v29 = vsel %vm303_vm2, %v3792_v16, %v3793_v21  ;;  %v7962_v36 = vld [vmem:[#allocation9 + $0x220] ss:$8 sps:$4 sm:$0xff]   ;;  %v7965_v51 = vld [vmem:[#allocation9 + $0x210] ss:$8 sps:$4 sm:$0xff]   ;;  %v7970_v53 = vld [vmem:[#allocation9 + $0x204] ss:$8 sps:$4 sm:$0xff]  }
 0xdcc   :  { %4511 = vmatprep.mubr.bf16.mxu0 %v3841_v46  ;;  %v3843_v27 = vpack.c.bf16 %v3819_v7, %v3815_v5  ;;  %v3799_v31 = vsel %vm303_vm2, %v3793_v21, %v3798_v18  ;;  %v7968_v55 = vld [vmem:[#allocation9 + $0x200] ss:$8 sps:$4 sm:$0xff]   ;;  %v7973_v50 = vld [vmem:[#allocation9 + $0x2f4] ss:$8 sps:$4 sm:$0xff]   ;;  %v7971_v57 = vld [vmem:[#allocation9 + $0x2f0] ss:$8 sps:$4 sm:$0xff]  }
 0xdcd   :  { %4512 = vmatmul.mubr.bf16.vlgmr.msra.gmra.mxu0 %v3840_v8  ;;  %v3846_v40 = vpack.c.bf16 %v3799_v31, %v3794_v29  ;;  %v7976_v33 = vld [vmem:[#allocation9 + $0x2e4] ss:$8 sps:$4 sm:$0xff]   ;;  %v7974_v58 = vld [vmem:[#allocation9 + $0x2e0] ss:$8 sps:$4 sm:$0xff]   ;;  %v7979_v59 = vld [vmem:[#allocation9 + $0x2d4] ss:$8 sps:$4 sm:$0xff]  }
 0xdce   :  { %4535 = vmatpush1.bf16.msra.mxu1 %v7950_v49  ;;  %4521 = vmatprep.mubr.bf16.mxu0 %v3847_v26  ;;  %v7977_v1 = vld [vmem:[#allocation9 + $0x2d0] ss:$8 sps:$4 sm:$0xff]   ;;  %v7982_v17 = vld [vmem:[#allocation9 + $0x2c4] ss:$8 sps:$4 sm:$0xff]   ;;  %v7980_v32 = vld [vmem:[#allocation9 + $0x2c0] ss:$8 sps:$4 sm:$0xff]  }
 0xdcf   :  { %4536 = vmatprep.subr.bf16.mxu1 %v7955_v22  ;;  %v7985_v28 = vld [vmem:[#allocation9 + $0x2b4] ss:$8 sps:$4 sm:$0xff]   ;;  %v7983_v37 = vld [vmem:[#allocation9 + $0x2b0] ss:$8 sps:$4 sm:$0xff]   ;;  %v7988_v63 = vld [vmem:[#allocation9 + $0x2a4] ss:$8 sps:$4 sm:$0xff]  }
 0xdd0   :  { %v7986_v49 = vld [vmem:[#allocation9 + $0x2a0] ss:$8 sps:$4 sm:$0xff]   ;;  %v7991_v60 = vld [vmem:[#allocation9 + $0x294] ss:$8 sps:$4 sm:$0xff]   ;;  %v7989_v46 = vld [vmem:[#allocation9 + $0x290] ss:$8 sps:$4 sm:$0xff]  }
 0xdd1   :  { %4469 = vmatmul.mubr.bf16.gmra.mxu1 %v3844_v23  ;;  %v7994_v30 = vld [vmem:[#allocation9 + $0x284] ss:$8 sps:$4 sm:$0xff]   ;;  %v3810_v2 = vrot.slane %v9555_v62, 2  ;;  %v3816_v22 = vrot.slane %v9560_v47, 2  ;;  %v3823_v61 = vrot.slane %v9558_v45, 2  ;;  %v3828_v8 = vrot.slane %v9566_v56, 2 }
 0xdd2   :  { %4537 = vmatpush1.bf16.msra.mxu1 %v7953_v19  ;;  %4564 = vmatprep.mubr.bf16.mxu1 %v3843_v27  ;;  %v3811_v16 = vrot.slane %v9546_v52, 2  ;;  %v7992_v26 = vld [vmem:[#allocation9 + $0x280] ss:$8 sps:$4 sm:$0xff]   ;;  %v3824_v5 = vrot.slane %v9553_v3, 2  ;;  %v3820_v45 = vrot.slane %v9575_v42, 2  ;;  %v3826_v52 = vrot.slane %v9579_v25, 2 }
 0xdd3   :  { %4538 = vmatprep.subr.bf16.mxu1 %v7958_v44  ;;  %v3821_v21 = vrot.slane %v9550_v20, 2 }
 0xdd4   :  { %v3812_v7 = vsel %vm322_vm3, %v3810_v2, %v3811_v16  ;;  %v3817_v18 = vsel %vm322_vm3, %v3811_v16, %v3816_v22  ;;  %v3825_v19 = vsel %vm322_vm3, %v3823_v61, %v3824_v5  ;;  %v3829_v62 = vsel %vm322_vm3, %v3824_v5, %v3828_v8 }
 0xdd5   :  { %4522 = vmatmul.mubr.bf16.gmra.mxu0 %v3846_v40  ;;  %v3842_v47 = vpack.c.bf16 %v3817_v18, %v3812_v7  ;;  %v3849_v56 = vpack.c.bf16 %v3829_v62, %v3825_v19  ;;  %v3822_v3 = vsel %vm322_vm3, %v3820_v45, %v3821_v21  ;;  %v3827_v23 = vsel %vm322_vm3, %v3821_v21, %v3826_v52 }
 0xdd6   :  { %4539 = vmatpush1.bf16.msra.mxu1 %v7956_v11  ;;  %v3848_v44 = vpack.c.bf16 %v3827_v23, %v3822_v3 }
 0xdd7   :  { %4540 = vmatprep.subr.bf16.mxu1 %v7961_v6 }
 0xdda   :  { %4541 = vmatpush1.bf16.msra.mxu1 %v7959_v4 }
 0xddb   :  { %4542 = vmatprep.subr.bf16.mxu1 %v7964_v10 }
 0xdde   :  { %4543 = vmatpush1.bf16.msra.mxu1 %v7962_v36 }
 0xddf   :  { %4544 = vmatprep.subr.bf16.mxu1 %v7967_v9 }
 0xde2   :  { %4545 = vmatpush1.bf16.msra.mxu1 %v7965_v51 }
 0xde3   :  { %4546 = vmatprep.subr.bf16.mxu1 %v7970_v53 }
 0xde6   :  { %4547 = vmatpush1.bf16.msra.mxu1 %v7968_v55 }
 0xde7   :  { %4548 = vmatprep.subr.bf16.mxu1 %v7973_v50 }
 0xdea   :  { %4549 = vmatpush2.bf16.msra.mxu1 %v7971_v57 }
 0xdeb   :  { %4550 = vmatprep.subr.bf16.mxu1 %v7976_v33 }
 0xdee   :  { %4551 = vmatpush2.bf16.msra.mxu1 %v7974_v58 }
 0xdef   :  { %4552 = vmatprep.subr.bf16.mxu1 %v7979_v59 }
 0xdf2   :  { %4553 = vmatpush2.bf16.msra.mxu1 %v7977_v1 }
 0xdf3   :  { %4554 = vmatprep.subr.bf16.mxu1 %v7982_v17 }
 0xdf6   :  { %4555 = vmatpush2.bf16.msra.mxu1 %v7980_v32 }
 0xdf7   :  { %4556 = vmatprep.subr.bf16.mxu1 %v7985_v28 }
 0xdfa   :  { %4557 = vmatpush2.bf16.msra.mxu1 %v7983_v37 }
 0xdfb   :  { %4558 = vmatprep.subr.bf16.mxu1 %v7988_v63 }
 0xdfe   :  { %4559 = vmatpush2.bf16.msra.mxu1 %v7986_v49 }
 0xdff   :  { %4560 = vmatprep.subr.bf16.mxu1 %v7991_v60 }
 0xe02   :  { %4561 = vmatpush2.bf16.msra.mxu1 %v7989_v46 }
 0xe03   :  { %4562 = vmatprep.subr.bf16.mxu1 %v7994_v30 }
 0xe06   :  { %4563 = vmatpush2.bf16.msra.mxu1 %v7992_v26 }
 0xe09   :  { %4565 = vmatmul.mubr.bf16.vlgmr.msra.gmra.mxu1 %v3842_v47 }
 0xe0a   :  { %4574 = vmatprep.mubr.bf16.mxu1 %v3849_v56 }
 0xe11   :  { %4575 = vmatmul.mubr.bf16.gmra.mxu1 %v3848_v44 }
 0xe89   :  { %v4460_v27 = vpop.f32.mrf.mxu1 }
 0xe8b   :  { %v4462_v29 = vpop.f32.mrf.mxu1 }
 0xe8d   :  { %v4464_v31 = vpop.f32.mrf.mxu1  ;;  %v4513_v11 = vpop.f32.mrf.mxu0 }
 0xe8e   :  { %v4514_v57 = vadd.f32 %v4513_v11, %v4460_v27 }
 0xe8f   :  { %v4466_v6 = vpop.f32.mrf.mxu1  ;;  %v4515_v40 = vpop.f32.mrf.mxu0 }
 0xe90   :  { %v4516_v17 = vadd.f32 %v4515_v40, %v4462_v29 }
 0xe91   :  { %v4470_v42 = vpop.f32.mrf.mxu1  ;;  %v4517_v4 = vpop.f32.mrf.mxu0 }
 0xe92   :  { %v4518_v50 = vadd.f32 %v4517_v4, %v4464_v31 }
 0xe93   :  { %v4472_v10 = vpop.f32.mrf.mxu1  ;;  %v4519_v25 = vpop.f32.mrf.mxu0 }
 0xe94   :  { %v4520_v58 = vadd.f32 %v4519_v25, %v4466_v6 }
 0xe95   :  { %v4474_v36 = vpop.f32.mrf.mxu1  ;;  %v4523_v9 = vpop.f32.mrf.mxu0 }
 0xe96   :  { %v4524_v37 = vadd.f32 %v4523_v9, %v4470_v42 }
 0xe97   :  { %v4476_v20 = vpop.f32.mrf.mxu1  ;;  %v4525_v53 = vpop.f32.mrf.mxu0 }
 0xe98   :  { %v4526_v30 = vadd.f32 %v4525_v53, %v4472_v10 }
 0xe99   :  { %v4527_v59 = vpop.f32.mrf.mxu0 }
 0xe9a   :  { %v4528_v26 = vadd.f32 %v4527_v59, %v4474_v36 }
 0xe9b   :  { %v4529_v2 = vpop.f32.mrf.mxu0 }
 0xe9c   :  { %v4530_v19 = vadd.f32 %v4529_v2, %v4476_v20 }
 0xec9   :  { %v4566_v51 = vpop.f32.mrf.mxu1 }
 0xeca   :  { %v9609_v32 = vadd.f32 %v4566_v51, %v4514_v57 }
 0xecb   :  { %v4568_v55 = vpop.f32.mrf.mxu1 }
 0xecc   :  { %v9613_v49 = vadd.f32 %v4568_v55, %v4516_v17  ;;  %v4621_v61 = vmul.f32 %v9609_v32, %v9609_v32 }
 0xecd   :  { %v4570_v33 = vpop.f32.mrf.mxu1 }
 0xece   :  { %v9607_v1 = vadd.f32 %v4570_v33, %v4518_v50  ;;  %v4622_v62 = vmul.f32 %v9613_v49, %v9613_v49 }
 0xecf   :  { %v4572_v28 = vpop.f32.mrf.mxu1 }
 0xed0   :  { %v9611_v63 = vadd.f32 %v4572_v28, %v4520_v58  ;;  %v4623_v60 = vmul.f32 %v9607_v1, %v9607_v1  ;;  %v4587_v5 = vadd.f32 %v9607_v1, %v9609_v32 }
 0xed1   :  { %v4576_v46 = vpop.f32.mrf.mxu1 }
 0xed2   :  { %v9617_v22 = vadd.f32 %v4576_v46, %v4524_v37  ;;  %v4624_v8 = vmul.f32 %v9611_v63, %v9611_v63  ;;  %v4629_v47 = vadd.f32 %v4623_v60, %v4621_v61  ;;  %v4596_v56 = vadd.f32 %v9611_v63, %v9613_v49 }
 0xed3   :  { %v4578_v16 = vpop.f32.mrf.mxu1 }
 0xed4   :  { %v4625_v7 = vmul.f32 %v9617_v22, %v9617_v22  ;;  %v9627_v18 = vadd.f32 %v4578_v16, %v4526_v30  ;;  %v4588_v52 = vadd.f32 %v4587_v5, %v9617_v22  ;;  %v4638_v23 = vadd.f32 %v4624_v8, %v4622_v62 }
 0xed5   :  { %v4580_v45 = vpop.f32.mrf.mxu1 }
 0xed6   :  { %v4626_v21 = vmul.f32 %v9627_v18, %v9627_v18  ;;  %v9636_v3 = vadd.f32 %v4580_v45, %v4528_v26  ;;  %v4630_v44 = vadd.f32 %v4629_v47, %v4625_v7  ;;  %v4597_v29 = vadd.f32 %v4596_v56, %v9627_v18 }
 0xed7   :  { %v4582_v27 = vpop.f32.mrf.mxu1 }
 0xed8   :  { %v4589_v31 = vadd.f32 %v4588_v52, %v9636_v3  ;;  %v4627_v11 = vmul.f32 %v9636_v3, %v9636_v3  ;;  %v9642_v6 = vadd.f32 %v4582_v27, %v4530_v19  ;;  %v4639_v40 = vadd.f32 %v4638_v23, %v4626_v21 }
 0xeda   :  { %v4590_v42 = vrot.slane %v4589_v31, 4  ;;  %v4631_v4 = vadd.f32 %v4630_v44, %v4627_v11  ;;  %v4598_v10 = vadd.f32 %v4597_v29, %v9642_v6  ;;  %v4628_v25 = vmul.f32 %v9642_v6, %v9642_v6 }
 0xedc   :  { %v4591_v36 = vadd.f32 %v4590_v42, %v4589_v31  ;;  %v4632_v9 = vrot.slane %v4631_v4, 4  ;;  %v4599_v20 = vrot.slane %v4598_v10, 4  ;;  %v4640_v51 = vadd.f32 %v4639_v40, %v4628_v25 }
 0xede   :  { %v4592_v53 = vrot.slane %v4591_v36, 2  ;;  %v4633_v55 = vadd.f32 %v4632_v9, %v4631_v4  ;;  %v4600_v50 = vadd.f32 %v4599_v20, %v4598_v10  ;;  %v4641_v57 = vrot.slane %v4640_v51, 4  ;;  %v4585_v20 = vld [vmem:[%s10454_s11 + $0x6] sm:$0x1] }
 0xee0   :  { %v4601_v33 = vrot.slane %v4600_v50, 2  ;;  %v4642_v58 = vadd.f32 %v4641_v57, %v4640_v51  ;;  %v4593_v59 = vadd.f32 %v4592_v53, %v4591_v36  ;;  %v4634_v17 = vrot.slane %v4633_v55, 2  ;;  %v7996_v57 = vld [vmem:[%s10449_s6 + $0x38] sm:$0xff]  }
 0xee2   :  { %v4594_v28 = vrot.slane %v4593_v59, 1  ;;  %v4602_v37 = vadd.f32 %v4601_v33, %v4600_v50  ;;  %v4635_v60 = vadd.f32 %v4634_v17, %v4633_v55  ;;  %v4643_v46 = vrot.slane %v4642_v58, 2  ;;  %v4586_v55 = vld [vmem:[%s10454_s11 + $0x7] sm:$0x1]  ;;  %v7995_v50 = vld [vmem:[%s10449_s6 + $0x78] sm:$0xff]   ;;  %v7998_v17 = vld [vmem:[%s10449_s6 + $0x70] sm:$0xff]  }
 0xee3   :  { %7152 = vmatprep.subr.bf16.mxu0 %v7995_v50 }
 0xee4   :  { %v4603_v30 = vrot.slane %v4602_v37, 1  ;;  %v4636_v2 = vrot.slane %v4635_v60, 1  ;;  %v4644_v61 = vadd.f32 %v4643_v46, %v4642_v58  ;;  %v4595_v8 = vadd.f32 %v4594_v28, %v4593_v59  ;;  %7153 = vmatpush3.bf16.msra.mxu0 %v7996_v57  ;;  %v7997_v59 = vld [vmem:[%s10449_s6 + $0x178] sm:$0xff]   ;;  %v8002_v46 = vld [vmem:[%s10449_s6 + $0x68] sm:$0xff]  }
 0xee5   :  { %v7999_v28 = vld [vmem:[%s10449_s6 + $0x138] sm:$0xff]   ;;  %7208 = vmatprep.subr.bf16.mxu1 %v7997_v59  ;;  %7154 = vmatprep.subr.bf16.mxu0 %v7998_v17 }
 0xee6   :  { %v4604_v16 = vadd.f32 %v4603_v30, %v4602_v37  ;;  %v4645_v26 = vrot.slane %v4644_v61, 1  ;;  %v4637_v7 = vadd.f32 %v4636_v2, %v4635_v60  ;;  %v8000_v37 = vld [vmem:[%s10449_s6 + $0x30] sm:$0xff]   ;;  %7209 = vmatpush3.bf16.msra.mxu1 %v7999_v28  ;;  %v8004_v2 = vld [vmem:[%s10449_s6 + $0x28] sm:$0xff]  }
 0xee7   :  { %v8001_v60 = vld [vmem:[%s10449_s6 + $0x170] sm:$0xff]  }
 0xee8   :  { %v4605_v5 = vadd.f32 %v4604_v16, %v4595_v8  ;;  %v4646_v19 = vadd.f32 %v4645_v26, %v4644_v61  ;;  %7155 = vmatpush3.bf16.msra.mxu0 %v8000_v37  ;;  %v8003_v30 = vld [vmem:[%s10449_s6 + $0x130] sm:$0xff]   ;;  %7210 = vmatprep.subr.bf16.mxu1 %v8001_v60  ;;  %v8005_v61 = vld [vmem:[%s10449_s6 + $0x168] sm:$0xff]   ;;  %v8006_v8 = vld [vmem:[%s10449_s6 + $0x60] sm:$0xff]  }
 0xee9   :  { %7156 = vmatprep.subr.bf16.mxu0 %v8002_v46  ;;  %v8007_v16 = vld [vmem:[%s10449_s6 + $0x128] sm:$0xff]   ;;  %v8008_v26 = vld [vmem:[%s10449_s6 + $0x20] sm:$0xff]  }
 0xeea   :  { %4607 = vrot.lane.b32.xlu0 %v4605_v5, %s8254_s25  ;;  %v4647_v62 = vadd.f32 %v4646_v19, %v4637_v7  ;;  %7211 = vmatpush3.bf16.msra.mxu1 %v8003_v30  ;;  %v8010_v7 = vld [vmem:[%s10449_s6 + $0x58] sm:$0xff]   ;;  %v8011_v19 = vld [vmem:[%s10449_s6 + $0x120] sm:$0xff]  }
 0xeeb   :  { %7212 = vmatprep.subr.bf16.mxu1 %v8005_v61 }
 0xeec   :  { %4649 = vrot.lane.b32.xlu1 %v4647_v62, %s8254_s25  ;;  %7157 = vmatpush3.bf16.msra.mxu0 %v8004_v2 }
 0xeed   :  { %7158 = vmatprep.subr.bf16.mxu0 %v8006_v8 }
 0xeee   :  { %7213 = vmatpush3.bf16.msra.mxu1 %v8007_v16 }
 0xef0   :  { %7159 = vmatpush3.bf16.msra.mxu0 %v8008_v26 }
 0xef1   :  { %7160 = vmatprep.subr.bf16.mxu0 %v8010_v7 }
 0xf5c   :  { %v4608_v47 = vpop.permute.xlu0 %4607 }
 0xf5d   :  { %v4610_v45 = vadd.f32 %v4608_v47, %v4605_v5  ;;  %v8009_v5 = vld [vmem:[%s10449_s6 + $0x160] sm:$0xff]   ;;  %v8013_v47 = vld [vmem:[%s10449_s6 + $0x158] sm:$0xff]  }
 0xf5e   :  { %v4650_v56 = vpop.permute.xlu1 %4649  ;;  %7214 = vmatprep.subr.bf16.mxu1 %v8009_v5 }
 0xf5f   :  { %v4652_v52 = vadd.f32 %v4650_v56, %v4647_v62  ;;  %4612 = vrot.lane.b32.xlu0 %v4610_v45, %s8257_s1  ;;  %v8012_v62 = vld [vmem:[%s10449_s6 + $0x18] sm:$0xff]   ;;  %7215 = vmatpush3.bf16.msra.mxu1 %v8011_v19 }
 0xf60   :  { %7161 = vmatpush3.bf16.msra.mxu0 %v8012_v62  ;;  %v8015_v56 = vld [vmem:[%s10449_s6 + $0x118] sm:$0xff]   ;;  %7216 = vmatprep.subr.bf16.mxu1 %v8013_v47 }
 0xf61   :  { %4654 = vrot.lane.b32.xlu1 %v4652_v52, %s8257_s1 }
 0xf63   :  { %7217 = vmatpush3.bf16.msra.mxu1 %v8015_v56 }
 0xfd1   :  { %v4613_v21 = vpop.permute.xlu0 %4612 }
 0xfd2   :  { %v4615_v23 = vadd.f32 %v4613_v21, %v4610_v45  ;;  %v8014_v45 = vld [vmem:[%s10449_s6 + $0x50] sm:$0xff]  }
 0xfd3   :  { %v4655_v44 = vpop.permute.xlu1 %4654  ;;  %v8017_v21 = vld [vmem:[%s10449_s6 + $0x150] sm:$0xff]   ;;  %7162 = vmatprep.subr.bf16.mxu0 %v8014_v45 }
 0xfd4   :  { %v4657_v27 = vadd.f32 %v4655_v44, %v4652_v52  ;;  %4617 = vrot.lane.b32.xlu0 %v4615_v23, %s8259_s2  ;;  %v8016_v52 = vld [vmem:[%s10449_s6 + $0x10] sm:$0xff]   ;;  %7218 = vmatprep.subr.bf16.mxu1 %v8017_v21 }
 0xfd5   :  { %v8019_v44 = vld [vmem:[%s10449_s6 + $0x110] sm:$0xff]   ;;  %7163 = vmatpush3.bf16.msra.mxu0 %v8016_v52 }
 0xfd6   :  { %4659 = vrot.lane.b32.xlu1 %v4657_v27, %s8259_s2  ;;  %7219 = vmatpush3.bf16.msra.mxu1 %v8019_v44 }
0x1046   :  { %v4618_v29 = vpop.permute.xlu0 %4617 }
0x1047   :  { %v4620_v31 = vadd.f32 %v4618_v29, %v4615_v23  ;;  %v8018_v23 = vld [vmem:[%s10449_s6 + $0x48] sm:$0xff]  }
0x1048   :  { %v4660_v11 = vpop.permute.xlu1 %4659  ;;  %v8020_v29 = vld [vmem:[%s10449_s6 + $0x8] sm:$0xff]   ;;  %7164 = vmatprep.subr.bf16.mxu0 %v8018_v23 }
0x1049   :  { %v4663_v40 = vmul.f32 0.001953125, %v4620_v31  ;;  %v4662_v42 = vadd.f32 %v4660_v11, %v4657_v27  ;;  %v8021_v27 = vld [vmem:[%s10449_s6 + $0x148] sm:$0xff]   ;;  %v8022_v31 = vld [vmem:[%s10449_s6 + $0x40] sm:$0xff]   ;;  %7165 = vmatpush3.bf16.msra.mxu0 %v8020_v29 }
0x104a   :  { %v8023_v11 = vld [vmem:[%s10449_s6 + $0x108] sm:$0xff]   ;;  %7220 = vmatprep.subr.bf16.mxu1 %v8021_v27  ;;  %7166 = vmatprep.subr.bf16.mxu0 %v8022_v31 }
0x104b   :  { %v4665_v4 = vmul.f32 %v4663_v40, %v4663_v40  ;;  %v4664_v10 = vmul.f32 0.001953125, %v4662_v42  ;;  %v8024_v42 = vld [vmem:[%s10449_s6] sm:$0xff]   ;;  %7221 = vmatpush3.bf16.msra.mxu1 %v8023_v11 }
0x104d   :  { %v4666_v25 = vsub.f32 %v4664_v10, %v4665_v4  ;;  %v8026_v4 = vld [vmem:[%s10449_s6 + $0xf8] sm:$0xff]   ;;  %v8027_v10 = vld [vmem:[%s10449_s6 + $0x100] sm:$0xff]   ;;  %7167 = vmatpush3.bf16.msra.mxu0 %v8024_v42 }
0x104e   :  { %7180 = vmatprep.subr.bf16.mxu0 %v8026_v4 }
0x104f   :  { %v4667_v36 = vmax.f32 %v4666_v25, 0.0  ;;  %v8029_v25 = vld [vmem:[%s10449_s6 + $0x278] sm:$0xff]  }
0x1051   :  { %v4668_v9 = vadd.f32 1e-05, %v4667_v36 }
0x1053   :  { %8131 = vrsqrt.f32 %v4668_v9 }
0x1060   :  { %v8132_v51 = vpop.eup %8131 }
0x1061   :  { %v9656_v53 = vmul.f32 %v8132_v51, %v4585_v20 }
0x1063   :  { %4677 = vrot.lane.b32.xlu1 %v9656_v53, %s8253_s0  ;;  %4674 = vrot.lane.b32.xlu0 %v9656_v53, %s8252_s28  ;;  %v4671_v33 = vmul.f32 %v9656_v53, %v4663_v40  ;;  %v8025_v40 = vld [vmem:[%s10449_s6 + $0x140] sm:$0xff]  }
0x1064   :  { %7222 = vmatprep.subr.bf16.mxu1 %v8025_v40 }
0x1065   :  { %v9672_v58 = vsub.f32 %v4586_v55, %v4671_v33  ;;  %7223 = vmatpush3.bf16.msra.mxu1 %v8027_v10 }
0x1066   :  { %7264 = vmatprep.subr.bf16.mxu1 %v8029_v25 }
0x1067   :  { %4680 = vrot.lane.b32.xlu0 %v9656_v53, %s8251_s7  ;;  %4703 = vrot.lane.b32.xlu1 %v9672_v58, %s8252_s28 }
0x106b   :  { %4683 = vrot.lane.b32.xlu0 %v9656_v53, %s8254_s25  ;;  %4706 = vrot.lane.b32.xlu1 %v9672_v58, %s8253_s0 }
0x106f   :  { %4686 = vrot.lane.b32.xlu0 %v9656_v53, %s8255_s17  ;;  %4709 = vrot.lane.b32.xlu1 %v9672_v58, %s8251_s7 }
0x1073   :  { %4689 = vrot.lane.b32.xlu0 %v9656_v53, %s8257_s1  ;;  %4712 = vrot.lane.b32.xlu1 %v9672_v58, %s8254_s25 }
0x1077   :  { %4692 = vrot.lane.b32.xlu0 %v9656_v53, %s8259_s2  ;;  %4715 = vrot.lane.b32.xlu1 %v9672_v58, %s8255_s17 }
0x107b   :  { %4718 = vrot.lane.b32.xlu0 %v9672_v58, %s8257_s1  ;;  %4721 = vrot.lane.b32.xlu1 %v9672_v58, %s8259_s2 }
0x10d5   :  { %v4678_v36 = vpop.permute.xlu1 %4677  ;;  %v4675_v9 = vpop.permute.xlu0 %4674 }
0x10d6   :  { %v4695_v59 = vsel %vm161_vm1, %v9656_v53, %v4675_v9 }
0x10d7   :  { %v4696_v17 = vsel %vm233_vm8, %v4695_v59, %v4678_v36 }
0x10d9   :  { %v4681_v20 = vpop.permute.xlu0 %4680  ;;  %v4704_v51 = vpop.permute.xlu1 %4703 }
0x10da   :  { %v4697_v60 = vsel %vm435_vm9, %v4696_v17, %v4681_v20  ;;  %v4724_v16 = vsel %vm161_vm1, %v9672_v58, %v4704_v51 }
0x10dd   :  { %v4684_v55 = vpop.permute.xlu0 %4683  ;;  %v4707_v50 = vpop.permute.xlu1 %4706 }
0x10de   :  { %v4698_v46 = vsel %vm440_vm10, %v4697_v60, %v4684_v55  ;;  %v4725_v53 = vsel %vm233_vm8, %v4724_v16, %v4707_v50  ;;  %v8030_v16 = vld [vmem:[%s10449_s6 + $0xf0] sm:$0xff]  }
0x10e1   :  { %v4687_v57 = vpop.permute.xlu0 %4686  ;;  %v4710_v33 = vpop.permute.xlu1 %4709 }
0x10e2   :  { %v4699_v30 = vsel %vm445_vm11, %v4698_v46, %v4687_v57  ;;  %v4726_v5 = vsel %vm435_vm9, %v4725_v53, %v4710_v33 }
0x10e5   :  { %v4690_v28 = vpop.permute.xlu0 %4689  ;;  %v4713_v37 = vpop.permute.xlu1 %4712 }
0x10e6   :  { %v4700_v2 = vsel %vm10473_vm15, %v4699_v30, %v4690_v28  ;;  %v4727_v19 = vsel %vm440_vm10, %v4726_v5, %v4713_v37  ;;  %vm10482_vm15 = vmmov %vm10481_vm7 }
0x10e9   :  { %v4693_v61 = vpop.permute.xlu0 %4692  ;;  %v4716_v8 = vpop.permute.xlu1 %4715 }
0x10ea   :  { %v4701_v26 = vsel %vm10474_vm14, %v4700_v2, %v4693_v61  ;;  %v4728_v45 = vsel %vm445_vm11, %v4727_v19, %v4716_v8 }
0x10eb   :  { %v4734_v7 = vrot.slane %v4701_v26, %v8828_v24 }
0x10ed   :  { %v4719_v62 = vpop.permute.xlu0 %4718  ;;  %v4722_v47 = vpop.permute.xlu1 %4721  ;;  %v4735_v52 = vmul.f32 %v4734_v7, %v9609_v32  ;;  %v4736_v21 = vmul.f32 %v4734_v7, %v9613_v49  ;;  %v4737_v23 = vmul.f32 %v4734_v7, %v9607_v1  ;;  %v4738_v44 = vmul.f32 %v4734_v7, %v9611_v63 }
0x10ee   :  { %v4729_v56 = vsel %vm10475_vm0, %v4728_v45, %v4719_v62  ;;  %v4739_v29 = vmul.f32 %v4734_v7, %v9617_v22  ;;  %v4740_v31 = vmul.f32 %v4734_v7, %v9627_v18  ;;  %v4741_v11 = vmul.f32 %v4734_v7, %v9636_v3 }
0x10ef   :  { %v4730_v58 = vsel %vm10476_vm5, %v4729_v56, %v4722_v47  ;;  %v4742_v40 = vmul.f32 %v4734_v7, %v9642_v6 }
0x10f0   :  { %v4746_v27 = vrot.slane %v4730_v58, %v8828_v24 }
0x10f2   :  { %v4747_v42 = vadd.f32 %v4746_v27, %v4735_v52  ;;  %v4748_v32 = vadd.f32 %v4746_v27, %v4736_v21  ;;  %v4749_v4 = vadd.f32 %v4746_v27, %v4737_v23  ;;  %v4750_v10 = vadd.f32 %v4746_v27, %v4738_v44 }
0x10f3   :  { %v4751_v25 = vadd.f32 %v4746_v27, %v4739_v29  ;;  %v4752_v49 = vadd.f32 %v4746_v27, %v4740_v31  ;;  %v4753_v36 = vadd.f32 %v4746_v27, %v4741_v11  ;;  %v4754_v1 = vadd.f32 %v4746_v27, %v4742_v40  ;;  %v8031_v29 = vld [vmem:[%s10449_s6 + $0x238] sm:$0xff]   ;;  %v8032_v40 = vld [vmem:[%s10449_s6 + $0xb0] sm:$0xff]  }
0x10f4   :  { %v4755_v63 = vadd.f32 %v4747_v42, %v9063_v34  ;;  %v4756_v24 = vadd.f32 %v4748_v32, %v9066_v35  ;;  %v4757_v22 = vadd.f32 %v4749_v4, %v9069_v38  ;;  %v4758_v18 = vadd.f32 %v4750_v10, %v9072_v39  ;;  %v8033_v32 = vld [vmem:[%s10449_s6 + $0x270] sm:$0xff]  }
0x10f5   :  { %v4759_v3 = vadd.f32 %v4751_v25, %v9075_v41  ;;  %v4760_v6 = vadd.f32 %v4752_v49, %v9078_v43  ;;  %v4761_v9 = vadd.f32 %v4753_v36, %v9084_v48  ;;  %v4762_v20 = vadd.f32 %v4754_v1, %v9093_v54  ;;  %v8028_v48 = vld [vmem:[%s10449_s6 + $0xb8] sm:$0xff]   ;;  %v8034_v49 = vld [vmem:[%s10449_s6 + $0xe8] sm:$0xff]  }
0x10f6   :  { %v4771_v51 = vrot.slane %v4755_v63, 5  ;;  %v4772_v55 = vrot.slane %v4756_v24, 5  ;;  %v4773_v50 = vrot.slane %v4757_v22, 5  ;;  %v4775_v57 = vrot.slane %v4758_v18, 5  ;;  %v8035_v18 = vld [vmem:[%s10449_s6 + $0x230] sm:$0xff]  }
0x10f7   :  { %v4777_v33 = vrot.slane %v4759_v3, 5  ;;  %v4778_v34 = vrot.slane %v4760_v6, 5  ;;  %v4779_v59 = vrot.slane %v4761_v9, 5  ;;  %v4781_v35 = vrot.slane %v4762_v20, 5  ;;  %v8036_v20 = vld [vmem:[%s10449_s6 + $0xa8] sm:$0xff]  }
0x10f8   :  { %v9829_v38 = vsel %vm10477_vm6, %v4771_v51, %v4773_v50  ;;  %v9832_v39 = vsel %vm10478_vm4, %v4772_v55, %v4775_v57  ;;  %4795 = vst [vmem:[#allocation5 + $0x50] sm:$0xf8] %v4771_v51  ;;  %4796 = vst [vmem:[#allocation5] sm:$0xf8] %v4772_v55 }
0x10f9   :  { %4799 = vst [vmem:[#allocation5 + $0x40] sm:$0x7] %v4773_v50  ;;  %4800 = vst [vmem:[#allocation5 + $0x20] sm:$0x7] %v4775_v57  ;;  %v9835_v41 = vsel %vm10479_vm12, %v4777_v33, %v4779_v59  ;;  %v9838_v43 = vsel %vm10480_vm13, %v4778_v34, %v4781_v35  ;;  %v4863_v37 = vrot.slane %v9832_v39, 2  ;;  %v4860_v60 = vrot.slane %v9829_v38, 2 }
0x10fa   :  { %4801 = vst [vmem:[#allocation5 + $0x48] sm:$0xf8] %v4777_v33  ;;  %4802 = vst [vmem:[#allocation5 + $0x38] sm:$0xf8] %v4778_v34  ;;  %v4873_v62 = vrot.slane %v9838_v43, 2  ;;  %v4835_v36 = vrot.slane %v9832_v39, 1 }
0x10fb   :  { %4805 = vst [vmem:[#allocation5 + $0x8] sm:$0x7] %v4779_v59  ;;  %4806 = vst [vmem:[#allocation5 + $0x58] sm:$0x7] %v4781_v35  ;;  %v4870_v9 = vrot.slane %v9835_v41, 2  ;;  %v4919_v51 = vrot.slane %v9832_v39, 4 }
0x10fc   :  { %v8037_v50 = vld [vmem:[%s10449_s6 + $0x268] sm:$0xff]   ;;  %v8038_v57 = vld [vmem:[%s10449_s6 + $0xe0] sm:$0xff]   ;;  %vm10487_vm6 = vmmov %vm10478_vm4 }
0x10ff   :  { %v9843_v54 = vld [vmem:[#allocation5] sm:$0xff]  ;;  %v9845_v17 = vld [vmem:[#allocation5 + $0x50] sm:$0xff] }
0x1100   :  { %v9847_v28 = vld [vmem:[#allocation5 + $0x20] sm:$0x3f]  ;;  %v5000_v46 = vpack.c.bf16 %v9832_v39, %v9843_v54  ;;  %v4999_v30 = vpack.c.bf16 %v9829_v38, %v9845_v17  ;;  %v4862_v61 = vrot.slane %v9843_v54, 2  ;;  %v4859_v53 = vrot.slane %v9845_v17, 2 }
0x1101   :  { %v9855_v2 = vld [vmem:[#allocation5 + $0x38] sm:$0xff]  ;;  %v4867_v8 = vrot.slane %v9847_v28, 2  ;;  %v9862_v26 = vld [vmem:[#allocation5 + $0x40] sm:$0x3f]  ;;  %v9875_v58 = vld [vmem:[#allocation5 + $0x48] sm:$0xff]  ;;  %v4834_v4 = vrot.slane %v9843_v54, 1 }
0x1102   :  { %v4865_v5 = vrot.slane %v9862_v26, 2  ;;  %v9866_v7 = vld [vmem:[#allocation5 + $0x58] sm:$0x3f]  ;;  %v4872_v19 = vrot.slane %v9855_v2, 2  ;;  %5955 = vmatprep.mubr.bf16.mxu0 %v5000_v46  ;;  %v5014_v47 = vpack.c.bf16 %v9838_v43, %v9855_v2  ;;  %v4864_v45 = vsel %vm322_vm3, %v4862_v61, %v4863_v37  ;;  %v9877_v21 = vld [vmem:[#allocation5 + $0x8] sm:$0x3f] }
0x1103   :  { %v4868_v56 = vsel %vm322_vm3, %v4863_v37, %v4867_v8  ;;  %v4877_v52 = vrot.slane %v9866_v7, 2  ;;  %5956 = vmatmul.mubr.bf16.vlgmr.msra.gmra.mxu0 %v4999_v30  ;;  %v4861_v44 = vsel %vm322_vm3, %v4859_v53, %v4860_v60  ;;  %v4839_v10 = vrot.slane %v9847_v28, 1  ;;  %v8039_v37 = vld [vmem:[%s10449_s6 + $0x228] sm:$0xff]   ;;  %v8040_v46 = vld [vmem:[%s10449_s6 + $0xa0] sm:$0xff]   ;;  %v8042_v8 = vld [vmem:[%s10449_s6 + $0xd8] sm:$0xff]  }
0x1104   :  { %v5004_v23 = vpack.c.bf16 %v4868_v56, %v4864_v45  ;;  %v4866_v27 = vsel %vm322_vm3, %v4860_v60, %v4865_v5  ;;  %v4874_v31 = vsel %vm322_vm3, %v4872_v19, %v4873_v62  ;;  %7181 = vmatpush3.bf16.msra.mxu0 %v8028_v48  ;;  %5963 = vmatprep.mubr.bf16.mxu0 %v5014_v47  ;;  %v4869_v1 = vrot.slane %v9875_v58, 2  ;;  %v8041_v30 = vld [vmem:[%s10449_s6 + $0x260] sm:$0xff]   ;;  %v8044_v53 = vld [vmem:[%s10449_s6 + $0x98] sm:$0xff]   ;;  %v8046_v19 = vld [vmem:[%s10449_s6 + $0xd0] sm:$0xff]  }
0x1105   :  { %v5003_v11 = vpack.c.bf16 %v4866_v27, %v4861_v44  ;;  %v4878_v42 = vsel %vm322_vm3, %v4873_v62, %v4877_v52  ;;  %7182 = vmatprep.subr.bf16.mxu0 %v8030_v16  ;;  %v4875_v63 = vrot.slane %v9877_v21, 2  ;;  %v4918_v24 = vrot.slane %v9843_v54, 4  ;;  %v8043_v16 = vld [vmem:[%s10449_s6 + $0x220] sm:$0xff]   ;;  %v8045_v5 = vld [vmem:[%s10449_s6 + $0x258] sm:$0xff]  }
0x1106   :  { %6053 = vmatprep.mubr.bf16.mxu1 %v5004_v23  ;;  %v5018_v25 = vpack.c.bf16 %v4878_v42, %v4874_v31  ;;  %v4923_v22 = vrot.slane %v9847_v28, 4  ;;  %v4836_v3 = vsel %vm303_vm2, %v4834_v4, %v4835_v36  ;;  %v4840_v6 = vsel %vm303_vm2, %v4835_v36, %v4839_v10  ;;  %v8047_v52 = vld [vmem:[%s10449_s6 + $0x218] sm:$0xff]   ;;  %v8048_v31 = vld [vmem:[%s10449_s6 + $0x90] sm:$0xff]   ;;  %v8050_v10 = vld [vmem:[%s10449_s6 + $0xc8] sm:$0xff]  }
0x1107   :  { %6054 = vmatmul.mubr.bf16.vlgmr.msra.gmra.mxu1 %v5003_v11  ;;  %v5013_v55 = vpack.c.bf16 %v9835_v41, %v9875_v58  ;;  %v4871_v33 = vsel %vm322_vm3, %v4869_v1, %v4870_v9  ;;  %v4876_v34 = vsel %vm322_vm3, %v4870_v9, %v4875_v63  ;;  %v5002_v59 = vpack.c.bf16 %v4840_v6, %v4836_v3  ;;  %v8049_v11 = vld [vmem:[%s10449_s6 + $0x250] sm:$0xff]  }
0x1108   :  { %7265 = vmatpush3.bf16.msra.mxu1 %v8031_v29  ;;  %6061 = vmatprep.mubr.bf16.mxu1 %v5018_v25  ;;  %v4920_v35 = vsel %vm10481_vm7, %v4918_v24, %v4919_v51  ;;  %v4924_v48 = vsel %vm10482_vm15, %v4919_v51, %v4923_v22  ;;  %v5017_v60 = vpack.c.bf16 %v4876_v34, %v4871_v33  ;;  %v4832_v62 = vrot.slane %v9829_v38, 1  ;;  %v8051_v3 = vld [vmem:[%s10449_s6 + $0x210] sm:$0xff]   ;;  %vm10490_vm7 = vmmov %vm10478_vm4 }
0x1109   :  { %7183 = vmatpush3.bf16.msra.mxu0 %v8032_v40  ;;  %7266 = vmatprep.subr.bf16.mxu1 %v8033_v32  ;;  %v5008_v61 = vpack.c.bf16 %v4924_v48, %v4920_v35  ;;  %v4845_v47 = vrot.slane %v9838_v43, 1  ;;  %v4916_v45 = vrot.slane %v9829_v38, 4  ;;  %v4972_v56 = vrot.slane %v9829_v38, 6  ;;  %v8054_v35 = vld [vmem:[%s10449_s6 + $0xc0] sm:$0xff]   ;;  %vm10491_vm15 = vmmov %vm10478_vm4 }
0x110a   :  { %7184 = vmatprep.subr.bf16.mxu0 %v8034_v49  ;;  %v4831_v23 = vrot.slane %v9845_v17, 1  ;;  %v4837_v44 = vrot.slane %v9862_v26, 1  ;;  %v4985_v27 = vrot.slane %v9838_v43, 6  ;;  %v4947_v29 = vrot.slane %v9832_v39, 5 }
0x110b   :  { %5964 = vmatmul.mubr.bf16.gmra.mxu0 %v5013_v55  ;;  %v4971_v40 = vrot.slane %v9845_v17, 6  ;;  %v4977_v42 = vrot.slane %v9862_v26, 6  ;;  %v4984_v32 = vrot.slane %v9855_v2, 6  ;;  %v4982_v4 = vrot.slane %v9835_v41, 6  ;;  %v8052_v55 = vld [vmem:[%s10449_s6 + $0x88] sm:$0xff]  }
0x110c   :  { %7267 = vmatpush3.bf16.msra.mxu1 %v8035_v18  ;;  %6004 = vmatprep.mubr.bf16.mxu0 %v5002_v59  ;;  %v4989_v25 = vrot.slane %v9866_v7, 6  ;;  %v4944_v49 = vrot.slane %v9829_v38, 5  ;;  %v4957_v36 = vrot.slane %v9838_v43, 5  ;;  %v4954_v1 = vrot.slane %v9835_v41, 5 }
0x110d   :  { %7185 = vmatpush3.bf16.msra.mxu0 %v8036_v20  ;;  %7268 = vmatprep.subr.bf16.mxu1 %v8037_v50  ;;  %v4844_v63 = vrot.slane %v9855_v2, 1  ;;  %vm10483_vm3 = vcmask 1041408   ;;  %v9990_v6 = vsel %vm303_vm2, %v4831_v23, %v4832_v62  ;;  %v9993_v9 = vsel %vm303_vm2, %v4832_v62, %v4837_v44  ;;  %v8053_v50 = vld [vmem:[%s10449_s6 + $0x248] sm:$0xff]   ;;  %v8057_v23 = vld [vmem:[%s10449_s6 + $0x240] sm:$0xff]  }
0x110e   :  { %7186 = vmatprep.subr.bf16.mxu0 %v8038_v57  ;;  %v9978_v24 = vsel %vm10483_vm3, %v4971_v40, %v4972_v56  ;;  %vm10484_vm14 = vmmov %vm10483_vm3  ;;  %v4946_v33 = vrot.slane %v9843_v54, 5  ;;  %v4951_v34 = vrot.slane %v9847_v28, 5  ;;  %v4981_v59 = vrot.slane %v9875_v58, 6 }
0x110f   :  { %6062 = vmatmul.mubr.bf16.gmra.mxu1 %v5017_v60  ;;  %v9981_v22 = vsel %vm10484_vm14, %v4972_v56, %v4977_v42  ;;  %vm10485_vm0 = vmmov %vm10483_vm3  ;;  %v4849_v48 = vrot.slane %v9866_v7, 1  ;;  %v4943_v60 = vrot.slane %v9845_v17, 5  ;;  %v4915_v40 = vrot.slane %v9845_v17, 4 }
0x1110   :  { %7269 = vmatpush3.bf16.msra.mxu1 %v8039_v37  ;;  %6151 = vmatprep.mubr.bf16.mxu1 %v5008_v61  ;;  %v9984_v18 = vsel %vm10485_vm0, %v4984_v32, %v4985_v27  ;;  %v5011_v20 = vpack.c.bf16 %v9981_v22, %v9978_v24  ;;  %vm10486_vm5 = vmmov %vm10485_vm0  ;;  %v4987_v37 = vrot.slane %v9877_v21, 6  ;;  %v10022_v61 = vsel %vm10487_vm6, %v4946_v33, %v4947_v29  ;;  %v8097_v24 = vld [vmem:[%s10449_s6 + $0x2e0] sm:$0xff]  }
0x1111   :  { %7187 = vmatpush3.bf16.msra.mxu0 %v8040_v46  ;;  %7270 = vmatprep.subr.bf16.mxu1 %v8041_v30  ;;  %v9998_v51 = vsel %vm10486_vm5, %v4985_v27, %v4989_v25  ;;  %v4949_v46 = vrot.slane %v9862_v26, 5  ;;  %v4846_v30 = vsel %vm303_vm2, %v4844_v63, %v4845_v47  ;;  %vm10488_vm12 = vmmov %vm10485_vm0  ;;  %v10039_v62 = vsel %vm10490_vm7, %v4943_v60, %v4944_v49  ;;  %v8062_v60 = vld [vmem:[%s10449_s6 + $0x1f0] sm:$0xff]   ;;  %v8098_v22 = vld [vmem:[%s10449_s6 + $0x2a0] sm:$0xff]  }
0x1112   :  { %7188 = vmatprep.subr.bf16.mxu0 %v8042_v8  ;;  %v5026_v57 = vpack.c.bf16 %v9998_v51, %v9984_v18  ;;  %v10025_v8 = vsel %vm10478_vm4, %v4947_v29, %v4951_v34  ;;  %vm10489_vm13 = vmmov %vm10485_vm0  ;;  %v4956_v29 = vrot.slane %v9855_v2, 5  ;;  %v4921_v42 = vrot.slane %v9862_v26, 4  ;;  %v8099_v18 = vld [vmem:[%s10449_s6 + $0x2d8] sm:$0xff]   ;;  %v8101_v51 = vld [vmem:[%s10449_s6 + $0x2d0] sm:$0xff]  }
0x1113   :  { %v10042_v56 = vsel %vm10491_vm15, %v4944_v49, %v4949_v46  ;;  %v4953_v32 = vrot.slane %v9875_v58, 5  ;;  %v4933_v25 = vrot.slane %v9866_v7, 4  ;;  %vm10492_vm3 = vmmov %vm10478_vm4  ;;  %vm10496_vm6 = vcmask 1043456  }
0x1114   :  { %7271 = vmatpush3.bf16.msra.mxu1 %v8043_v16  ;;  %v10028_v16 = vsel %vm10488_vm12, %v4981_v59, %v4982_v4  ;;  %v5009_v27 = vpack.c.bf16 %v10042_v56, %v10039_v62  ;;  %v10066_v49 = vsel %vm10492_vm3, %v4956_v29, %v4957_v36  ;;  %vm10493_vm14 = vmmov %vm10492_vm3  ;;  %v4929_v59 = vrot.slane %v9838_v43, 4  ;;  %v8109_v62 = vld [vmem:[%s10455_s12 + $0x70] sm:$0xff]  }
0x1115   :  { %7189 = vmatpush3.bf16.msra.mxu0 %v8044_v53  ;;  %7272 = vmatprep.subr.bf16.mxu1 %v8045_v5  ;;  %v8055_v53 = vld [vmem:[%s10449_s6 + $0x208] sm:$0xff]   ;;  %v5010_v5 = vpack.c.bf16 %v10025_v8, %v10022_v61  ;;  %vm10494_vm0 = vmmov %vm10492_vm3  ;;  %v4841_v46 = vrot.slane %v9875_v58, 1  ;;  %v4895_v29 = vrot.slane %v9847_v28, 3  ;;  %vm10500_vm7 = vcmask 1044480  }
0x1116   :  { %7190 = vmatprep.subr.bf16.mxu0 %v8046_v19  ;;  %v10036_v19 = vsel %vm10489_vm13, %v4982_v4, %v4987_v37  ;;  %v4959_v4 = vrot.slane %v9877_v21, 5  ;;  %v10080_v33 = vsel %vm10494_vm0, %v4953_v32, %v4954_v1  ;;  %vm10495_vm5 = vmmov %vm10494_vm0  ;;  %v8061_v37 = vld [vmem:[%s10449_s6 + $0x378] sm:$0xff]   ;;  %v8066_v32 = vld [vmem:[%s10449_s6 + $0x1e8] sm:$0xff]  }
0x1117   :  { %v5025_v44 = vpack.c.bf16 %v10036_v19, %v10028_v16  ;;  %vm10497_vm4 = vmmov %vm10496_vm6  ;;  %v8103_v61 = vld [vmem:[%s10449_s6 + $0x2c8] sm:$0xff]   ;;  %v8105_v16 = vld [vmem:[%s10449_s6 + $0x2c0] sm:$0xff]  }
0x1118   :  { %7273 = vmatpush3.bf16.msra.mxu1 %v8047_v52  ;;  %v8056_v52 = vld [vmem:[%s10449_s6 + $0x80] sm:$0xff]   ;;  %v10083_v34 = vsel %vm10495_vm5, %v4954_v1, %v4959_v4  ;;  %v4917_v1 = vsel %vm10496_vm6, %v4915_v40, %v4916_v45  ;;  %vm10498_vm12 = vmmov %vm10497_vm4  ;;  %v4842_v40 = vrot.slane %v9835_v41, 1  ;;  %v4891_v4 = vrot.slane %v9832_v39, 3  ;;  %v8104_v8 = vld [vmem:[%s10449_s6 + $0x288] sm:$0xff]  }
0x1119   :  { %7191 = vmatpush3.bf16.msra.mxu0 %v8048_v31  ;;  %7274 = vmatprep.subr.bf16.mxu1 %v8049_v11  ;;  %v4961_v31 = vrot.slane %v9866_v7, 5  ;;  %v8058_v11 = vld [vmem:[%s10449_s6 + $0x1f8] sm:$0xff]   ;;  %vm10499_vm13 = vmmov %vm10497_vm4 }
0x111a   :  { %7192 = vmatprep.subr.bf16.mxu0 %v8050_v10  ;;  %v4928_v10 = vrot.slane %v9855_v2, 4  ;;  %vm10501_vm15 = vmmov %vm10500_vm7  ;;  %v8107_v19 = vld [vmem:[%s10455_s12 + $0x78] sm:$0xff]  }
0x111b   :  { %v10069_v63 = vsel %vm10493_vm14, %v4957_v36, %v4961_v31  ;;  %v8060_v36 = vld [vmem:[%s10449_s6 + $0x1b8] sm:$0xff]   ;;  %vm10504_vm14 = vcmask 1041408   ;;  %vm10506_vm5 = vmmov %vm10500_vm7 }
0x111c   :  { %7275 = vmatpush3.bf16.msra.mxu1 %v8051_v3  ;;  %v8059_v3 = vld [vmem:[%s10449_s6 + $0x200] sm:$0xff]   ;;  %vm10505_vm0 = vmmov %vm10504_vm14 }
0x111d   :  { %7193 = vmatpush3.bf16.msra.mxu0 %v8052_v55  ;;  %7276 = vmatprep.subr.bf16.mxu1 %v8053_v50  ;;  %v4850_v55 = vsel %vm303_vm2, %v4845_v47, %v4849_v48  ;;  %v5024_v50 = vpack.c.bf16 %v10069_v63, %v10066_v49  ;;  %v5023_v47 = vpack.c.bf16 %v10083_v34, %v10080_v33  ;;  %vm10507_vm6 = vmmov %vm10506_vm5  ;;  %v8111_v49 = vld [vmem:[%s10455_s12 + $0x68] sm:$0xff]   ;;  %v8113_v33 = vld [vmem:[%s10455_s12 + $0x60] sm:$0xff]  }
0x111e   :  { %7194 = vmatprep.subr.bf16.mxu0 %v8054_v35  ;;  %v5001_v35 = vpack.c.bf16 %v9993_v9, %v9990_v6  ;;  %v4922_v48 = vsel %vm10497_vm4, %v4916_v45, %v4921_v42  ;;  %v5016_v6 = vpack.c.bf16 %v4850_v55, %v4846_v30  ;;  %v4930_v9 = vsel %vm10498_vm12, %v4928_v10, %v4929_v59  ;;  %v8063_v45 = vld [vmem:[%s10449_s6 + $0x338] sm:$0xff]   ;;  %v8064_v30 = vld [vmem:[%s10449_s6 + $0x1b0] sm:$0xff]  }
0x111f   :  { %v5007_v31 = vpack.c.bf16 %v4922_v48, %v4917_v1  ;;  %v4925_v10 = vrot.slane %v9875_v58, 4  ;;  %v4896_v48 = vsel %vm10501_vm15, %v4891_v4, %v4895_v29  ;;  %vm6269_vm15 = vcmask 1041409  }
0x1120   :  { %7277 = vmatpush3.bf16.msra.mxu1 %v8055_v53  ;;  %v4934_v53 = vsel %vm10499_vm13, %v4929_v59, %v4933_v25  ;;  %v4931_v25 = vrot.slane %v9877_v21, 4  ;;  %v4979_v59 = vrot.slane %v9847_v28, 6  ;;  %v4975_v28 = vrot.slane %v9832_v39, 6  ;;  %v8071_v39 = vld [vmem:[%s10449_s6 + $0x328] sm:$0xff]  }
0x1121   :  { %7195 = vmatpush3.bf16.msra.mxu0 %v8056_v52  ;;  %7278 = vmatprep.subr.bf16.mxu1 %v8057_v23  ;;  %v4847_v52 = vrot.slane %v9877_v21, 1  ;;  %v4890_v23 = vrot.slane %v9843_v54, 3  ;;  %v5022_v42 = vpack.c.bf16 %v4934_v53, %v4930_v9  ;;  %v8069_v9 = vld [vmem:[%s10449_s6 + $0x368] sm:$0xff]   ;;  %v8070_v53 = vld [vmem:[%s10449_s6 + $0x1e0] sm:$0xff]  }
0x1122   :  { %7236 = vmatprep.subr.bf16.mxu0 %v8058_v11  ;;  %v8065_v11 = vld [vmem:[%s10449_s6 + $0x370] sm:$0xff]  }
0x1123   :  { %v4848_v55 = vsel %vm303_vm2, %v4842_v40, %v4847_v52  ;;  %v4892_v1 = vsel %vm10500_vm7, %v4890_v23, %v4891_v4  ;;  %v4980_v23 = vsel %vm10505_vm0, %v4975_v28, %v4979_v59  ;;  %v8077_v4 = vld [vmem:[%s10449_s6 + $0x358] sm:$0xff]   ;;  %v8083_v59 = vld [vmem:[%s10449_s6 + $0x310] sm:$0xff]  }
0x1124   :  { %6005 = vmatmul.mubr.bf16.vlgmr.msra.gmra.mxu0 %v5001_v35  ;;  %7279 = vmatpush3.bf16.msra.mxu1 %v8059_v3  ;;  %v4843_v3 = vsel %vm303_vm2, %v4841_v46, %v4842_v40  ;;  %v8067_v35 = vld [vmem:[%s10449_s6 + $0x330] sm:$0xff]   ;;  %vm10502_vm2 = vmmov %vm10497_vm4  ;;  %v5006_v52 = vpack.c.bf16 %v4896_v48, %v4892_v1  ;;  %v8074_v40 = vld [vmem:[%s10449_s6 + $0x1d8] sm:$0xff]  }
0x1125   :  { %6012 = vmatprep.mubr.bf16.mxu0 %v5016_v6  ;;  %7237 = vmatpush3.bf16.msra.mxu0 %v8060_v36  ;;  %v4974_v36 = vrot.slane %v9843_v54, 6  ;;  %v8068_v54 = vld [vmem:[%s10449_s6 + $0x1a8] sm:$0xff]   ;;  %vm10503_vm3 = vmmov %vm10502_vm2  ;;  %v8086_v48 = vld [vmem:[%s10449_s6 + $0x1c0] sm:$0xff]  }
0x1126   :  { %7320 = vmatprep.subr.bf16.mxu1 %v8061_v37  ;;  %7238 = vmatprep.subr.bf16.mxu0 %v8062_v60  ;;  %v4926_v37 = vrot.slane %v9835_v41, 4  ;;  %v5015_v60 = vpack.c.bf16 %v4848_v55, %v4843_v3  ;;  %v8080_v3 = vld [vmem:[%s10449_s6 + $0x190] sm:$0xff]   ;;  %v8085_v1 = vld [vmem:[%s10449_s6 + $0x348] sm:$0xff]   ;;  %vm10508_vm4 = vmmov %vm10506_vm5 }
0x1127   :  { %6152 = vmatmul.mubr.bf16.vlgmr.msra.gmra.mxu1 %v5007_v31  ;;  %v8072_v31 = vld [vmem:[%s10449_s6 + $0x1a0] sm:$0xff]   ;;  %v8081_v55 = vld [vmem:[%s10449_s6 + $0x350] sm:$0xff]   ;;  %vm10509_vm12 = vmmov %vm10508_vm4 }
0x1128   :  { %6159 = vmatprep.mubr.bf16.mxu1 %v5022_v42  ;;  %7321 = vmatpush3.bf16.msra.mxu1 %v8063_v45  ;;  %v4927_v46 = vsel %vm10502_vm2, %v4925_v10, %v4926_v37  ;;  %v4932_v6 = vsel %vm10503_vm3, %v4926_v37, %v4931_v25  ;;  %v4976_v45 = vsel %vm10504_vm14, %v4974_v36, %v4975_v28  ;;  %v8075_v42 = vld [vmem:[%s10449_s6 + $0x320] sm:$0xff]   ;;  %v8078_v10 = vld [vmem:[%s10449_s6 + $0x1d0] sm:$0xff]   ;;  %v8079_v25 = vld [vmem:[%s10449_s6 + $0x318] sm:$0xff]   ;;  %v4887_v37 = vrot.slane %v9845_v17, 3 }
0x1129   :  { %7239 = vmatpush3.bf16.msra.mxu0 %v8064_v30  ;;  %7322 = vmatprep.subr.bf16.mxu1 %v8065_v11  ;;  %v5021_v29 = vpack.c.bf16 %v4932_v6, %v4927_v46  ;;  %v8073_v30 = vld [vmem:[%s10449_s6 + $0x360] sm:$0xff]   ;;  %v5012_v11 = vpack.c.bf16 %v4980_v23, %v4976_v45  ;;  %v8082_v36 = vld [vmem:[%s10449_s6 + $0x1c8] sm:$0xff]   ;;  %v4905_v46 = vrot.slane %v9866_v7, 3  ;;  %v8092_v23 = vld [vmem:[%s10449_s6 + $0x2b8] sm:$0xff]   ;;  %vm10514_vm2 = vcmask 916480  }
0x112a   :  { %7240 = vmatprep.subr.bf16.mxu0 %v8066_v32  ;;  %v8076_v32 = vld [vmem:[%s10449_s6 + $0x198] sm:$0xff]   ;;  %v8087_v28 = vld [vmem:[%s10449_s6 + $0x308] sm:$0xff]   ;;  %v8088_v6 = vld [vmem:[%s10449_s6 + $0x180] sm:$0xff]  }
0x112b   :  { %v8089_v17 = vld [vmem:[%s10449_s6 + $0x340] sm:$0xff]   ;;  %vm10510_vm13 = vmmov %vm10508_vm4 }
0x112c   :  { %6013 = vmatmul.mubr.bf16.gmra.mxu0 %v5015_v60  ;;  %7323 = vmatpush3.bf16.msra.mxu1 %v8067_v35  ;;  %v8084_v35 = vld [vmem:[%s10449_s6 + $0x188] sm:$0xff]   ;;  %v4900_v60 = vrot.slane %v9855_v2, 3  ;;  %v4901_v2 = vrot.slane %v9838_v43, 3  ;;  %vm10511_vm7 = vmmov %vm10508_vm4 }
0x112d   :  { %7241 = vmatpush3.bf16.msra.mxu0 %v8068_v54  ;;  %6102 = vmatprep.mubr.bf16.mxu0 %v5006_v52  ;;  %v4893_v54 = vrot.slane %v9862_v26, 3  ;;  %v4888_v26 = vrot.slane %v9829_v38, 3  ;;  %v8091_v52 = vld [vmem:[%s10449_s6 + $0x300] sm:$0xff]   ;;  %vm10515_vm3 = vmmov %vm10514_vm2 }
0x112e   :  { %7324 = vmatprep.subr.bf16.mxu1 %v8069_v9  ;;  %7242 = vmatprep.subr.bf16.mxu0 %v8070_v53  ;;  %v8090_v9 = vld [vmem:[%s10449_s6 + $0x2f8] sm:$0xff]   ;;  %v4902_v45 = vsel %vm10508_vm4, %v4900_v60, %v4901_v2  ;;  %v4906_v38 = vsel %vm10509_vm12, %v4901_v2, %v4905_v46 }
0x112f   :  { %6160 = vmatmul.mubr.bf16.gmra.mxu1 %v5021_v29  ;;  %v4889_v7 = vsel %vm10506_vm5, %v4887_v37, %v4888_v26  ;;  %v4894_v53 = vsel %vm10507_vm6, %v4888_v26, %v4893_v54  ;;  %v5020_v29 = vpack.c.bf16 %v4906_v38, %v4902_v45 }
0x1130   :  { %7325 = vmatpush3.bf16.msra.mxu1 %v8071_v39  ;;  %6249 = vmatprep.mubr.bf16.mxu1 %v5012_v11  ;;  %v5005_v43 = vpack.c.bf16 %v4894_v53, %v4889_v7  ;;  %v8093_v39 = vld [vmem:[%s10449_s6 + $0x2f0] sm:$0xff]  }
0x1131   :  { %7243 = vmatpush3.bf16.msra.mxu0 %v8072_v31  ;;  %7326 = vmatprep.subr.bf16.mxu1 %v8073_v30  ;;  %v4897_v31 = vrot.slane %v9875_v58, 3  ;;  %v4903_v30 = vrot.slane %v9877_v21, 3  ;;  %v8094_v11 = vld [vmem:[%s10449_s6 + $0x2b0] sm:$0xff]  }
0x1132   :  { %7244 = vmatprep.subr.bf16.mxu0 %v8074_v40  ;;  %v4898_v40 = vrot.slane %v9835_v41, 3  ;;  %v8096_v41 = vld [vmem:[%s10449_s6 + $0x2a8] sm:$0xff]  }
0x1134   :  { %7327 = vmatpush3.bf16.msra.mxu1 %v8075_v42  ;;  %v8095_v42 = vld [vmem:[%s10449_s6 + $0x2e8] sm:$0xff]   ;;  %v4899_v58 = vsel %vm10510_vm13, %v4897_v31, %v4898_v40  ;;  %v4904_v21 = vsel %vm10511_vm7, %v4898_v40, %v4903_v30 }
0x1135   :  { %7245 = vmatpush3.bf16.msra.mxu0 %v8076_v32  ;;  %7328 = vmatprep.subr.bf16.mxu1 %v8077_v4  ;;  %v5019_v32 = vpack.c.bf16 %v4904_v21, %v4899_v58 }
0x1136   :  { %7246 = vmatprep.subr.bf16.mxu0 %v8078_v10 }
0x1138   :  { %7329 = vmatpush3.bf16.msra.mxu1 %v8079_v25 }
0x1139   :  { %7247 = vmatpush3.bf16.msra.mxu0 %v8080_v3  ;;  %7330 = vmatprep.subr.bf16.mxu1 %v8081_v55 }
0x113a   :  { %7248 = vmatprep.subr.bf16.mxu0 %v8082_v36 }
0x113c   :  { %7331 = vmatpush3.bf16.msra.mxu1 %v8083_v59 }
0x113d   :  { %7249 = vmatpush3.bf16.msra.mxu0 %v8084_v35  ;;  %7332 = vmatprep.subr.bf16.mxu1 %v8085_v1 }
0x113e   :  { %7250 = vmatprep.subr.bf16.mxu0 %v8086_v48 }
0x1140   :  { %7333 = vmatpush3.bf16.msra.mxu1 %v8087_v28 }
0x1141   :  { %7251 = vmatpush3.bf16.msra.mxu0 %v8088_v6  ;;  %7334 = vmatprep.subr.bf16.mxu1 %v8089_v17 }
0x1142   :  { %7292 = vmatprep.subr.bf16.mxu0 %v8090_v9 }
0x1144   :  { %6103 = vmatmul.mubr.bf16.vlgmr.msra.gmra.mxu0 %v5005_v43  ;;  %7335 = vmatpush3.bf16.msra.mxu1 %v8091_v52 }
0x1145   :  { %6110 = vmatprep.mubr.bf16.mxu0 %v5020_v29  ;;  %7293 = vmatpush3.bf16.msra.mxu0 %v8092_v23 }
0x1146   :  { %7294 = vmatprep.subr.bf16.mxu0 %v8093_v39  ;;  %7387 = vmatprep.subr.bf16.mxu1 %v8250_v0 }
0x1147   :  { %6250 = vmatmul.mubr.bf16.vlgmr.msra.gmra.mxu1 %v5011_v20  ;;  %v8100_v20 = vld [vmem:[%s10449_s6 + $0x298] sm:$0xff]  }
0x1148   :  { %6257 = vmatprep.mubr.bf16.mxu1 %v5026_v57  ;;  %v8102_v57 = vld [vmem:[%s10449_s6 + $0x290] sm:$0xff]  }
0x1149   :  { %7295 = vmatpush3.bf16.msra.mxu0 %v8094_v11 }
0x114a   :  { %7296 = vmatprep.subr.bf16.mxu0 %v8095_v42 }
0x114c   :  { %6111 = vmatmul.mubr.bf16.gmra.mxu0 %v5019_v32 }
0x114d   :  { %7297 = vmatpush3.bf16.msra.mxu0 %v8096_v41  ;;  %6200 = vmatprep.mubr.bf16.mxu0 %v5010_v5  ;;  %v8106_v5 = vld [vmem:[%s10449_s6 + $0x280] sm:$0xff]  }
0x114e   :  { %7298 = vmatprep.subr.bf16.mxu0 %v8097_v24 }
0x114f   :  { %6258 = vmatmul.mubr.bf16.gmra.mxu1 %v5025_v44  ;;  %v8108_v44 = vld [vmem:[%s10455_s12 + $0x38] sm:$0xff]  }
0x1151   :  { %7299 = vmatpush3.bf16.msra.mxu0 %v8098_v22 }
0x1152   :  { %7300 = vmatprep.subr.bf16.mxu0 %v8099_v18 }
0x1155   :  { %7301 = vmatpush3.bf16.msra.mxu0 %v8100_v20 }
0x1156   :  { %7302 = vmatprep.subr.bf16.mxu0 %v8101_v51 }
0x1159   :  { %7303 = vmatpush3.bf16.msra.mxu0 %v8102_v57 }
0x115a   :  { %7304 = vmatprep.subr.bf16.mxu0 %v8103_v61 }
0x115d   :  { %7305 = vmatpush3.bf16.msra.mxu0 %v8104_v8 }
0x115e   :  { %7306 = vmatprep.subr.bf16.mxu0 %v8105_v16 }
0x1161   :  { %7307 = vmatpush3.bf16.msra.mxu0 %v8106_v5 }
0x1162   :  { %7348 = vmatprep.subr.bf16.mxu0 %v8107_v19 }
0x1164   :  { %6201 = vmatmul.mubr.bf16.vlgmr.msra.gmra.mxu0 %v5009_v27  ;;  %v8110_v27 = vld [vmem:[%s10455_s12 + $0x30] sm:$0xff]  }
0x1165   :  { %6208 = vmatprep.mubr.bf16.mxu0 %v5024_v50  ;;  %7349 = vmatpush3.bf16.msra.mxu0 %v8108_v44  ;;  %v8112_v50 = vld [vmem:[%s10455_s12 + $0x28] sm:$0xff]  }
0x1166   :  { %7350 = vmatprep.subr.bf16.mxu0 %v8109_v62 }
0x1169   :  { %7351 = vmatpush3.bf16.msra.mxu0 %v8110_v27 }
0x116a   :  { %7352 = vmatprep.subr.bf16.mxu0 %v8111_v49 }
0x116c   :  { %6209 = vmatmul.mubr.bf16.gmra.mxu0 %v5023_v47  ;;  %v8114_v47 = vld [vmem:[%s10455_s12 + $0x20] sm:$0xff]  }
0x116d   :  { %7353 = vmatpush3.bf16.msra.mxu0 %v8112_v50 }
0x116e   :  { %7354 = vmatprep.subr.bf16.mxu0 %v8113_v33 }
0x1171   :  { %7355 = vmatpush3.bf16.msra.mxu0 %v8114_v47 }
0x11c3   :  { %v7168_v56 = vpop.f32.mrf.mxu0 }
0x11c5   :  { %v7169_v63 = vpop.f32.mrf.mxu0 }
0x11c6   :  { %v7170_v32 = vadd.f32 %v7169_v63, %v7168_v56 }
0x11c7   :  { %v7171_v34 = vpop.f32.mrf.mxu0  ;;  %v7224_v10 = vpop.f32.mrf.mxu1 }
0x11c8   :  { %v5958_v61 = vadd.f32 %v7170_v32, %v8645_v14 }
0x11c9   :  { %v7172_v4 = vpop.f32.mrf.mxu0  ;;  %v7225_v3 = vpop.f32.mrf.mxu1 }
0x11ca   :  { %v7173_v24 = vadd.f32 %v7172_v4, %v7171_v34  ;;  %v7226_v50 = vadd.f32 %v7225_v3, %v7224_v10 }
0x11cb   :  { %v7174_v25 = vpop.f32.mrf.mxu0  ;;  %v7227_v36 = vpop.f32.mrf.mxu1 }
0x11cc   :  { %v5961_v8 = vadd.f32 %v7173_v24, %v8649_v15 }
0x11cd   :  { %v7175_v55 = vpop.f32.mrf.mxu0  ;;  %v7228_v35 = vpop.f32.mrf.mxu1 }
0x11ce   :  { %v7176_v51 = vadd.f32 %v7175_v55, %v7174_v25  ;;  %v7229_v33 = vadd.f32 %v7228_v35, %v7227_v36 }
0x11cf   :  { %v7177_v59 = vpop.f32.mrf.mxu0  ;;  %v7230_v37 = vpop.f32.mrf.mxu1 }
0x11d0   :  { %v5966_v62 = vadd.f32 %v8643_v13, %v7176_v51 }
0x11d1   :  { %v7178_v1 = vpop.f32.mrf.mxu0  ;;  %v7231_v28 = vpop.f32.mrf.mxu1 }
0x11d2   :  { %v7179_v27 = vadd.f32 %v7178_v1, %v7177_v59 }
0x11d3   :  { %v7233_v46 = vpop.f32.mrf.mxu1 }
0x11d4   :  { %v5969_v15 = vadd.f32 %v8647_v12, %v7179_v27 }
0x11d5   :  { %v7234_v17 = vpop.f32.mrf.mxu1 }
0x11d6   :  { %v7235_v10 = vadd.f32 %v7234_v17, %v7233_v46 }
0x11e4   :  { %v7196_v48 = vpop.f32.mrf.mxu0 }
0x11e6   :  { %v7197_v54 = vpop.f32.mrf.mxu0 }
0x11e7   :  { %v7280_v26 = vpop.f32.mrf.mxu1  ;;  %v7198_v22 = vadd.f32 %v7197_v54, %v7196_v48  ;;  %v7232_v48 = vadd.f32 %v7231_v28, %v7230_v37 }
0x11e8   :  { %v7199_v60 = vpop.f32.mrf.mxu0 }
0x11e9   :  { %v7281_v2 = vpop.f32.mrf.mxu1  ;;  %v6007_v5 = vadd.f32 %v7198_v22, %v5958_v61 }
0x11ea   :  { %v7200_v6 = vpop.f32.mrf.mxu0  ;;  %v7282_v3 = vadd.f32 %v7281_v2, %v7280_v26 }
0x11eb   :  { %v7283_v53 = vpop.f32.mrf.mxu1  ;;  %v7201_v57 = vadd.f32 %v7200_v6, %v7199_v60  ;;  %v6056_v25 = vadd.f32 %v7226_v50, %v6007_v5 }
0x11ec   :  { %v7202_v9 = vpop.f32.mrf.mxu0 }
0x11ed   :  { %v7284_v45 = vpop.f32.mrf.mxu1  ;;  %v6010_v49 = vadd.f32 %v7201_v57, %v5961_v8 }
0x11ee   :  { %v7203_v7 = vpop.f32.mrf.mxu0 }
0x11ef   :  { %v7286_v43 = vpop.f32.mrf.mxu1  ;;  %v7204_v16 = vadd.f32 %v7203_v7, %v7202_v9  ;;  %v6059_v54 = vadd.f32 %v7229_v33, %v6010_v49 }
0x11f0   :  { %v7205_v52 = vpop.f32.mrf.mxu0 }
0x11f1   :  { %v7287_v29 = vpop.f32.mrf.mxu1  ;;  %v6015_v34 = vadd.f32 %v7204_v16, %v5966_v62 }
0x11f2   :  { %v7206_v38 = vpop.f32.mrf.mxu0  ;;  %v7288_v28 = vadd.f32 %v7287_v29, %v7286_v43 }
0x11f3   :  { %v10320_v30 = vpop.f32.mrf.mxu1  ;;  %v7207_v47 = vadd.f32 %v7206_v38, %v7205_v52  ;;  %v6064_v1 = vadd.f32 %v7232_v48, %v6015_v34  ;;  %v7285_v52 = vadd.f32 %v7284_v45, %v7283_v53 }
0x11f5   :  { %v10322_v40 = vpop.f32.mrf.mxu1  ;;  %v6018_v13 = vadd.f32 %v7207_v47, %v5969_v15 }
0x11f6   :  { %v7291_v2 = vadd.f32 %v10322_v40, %v10320_v30  ;;  %v8116_v30 = vld [vmem:[%s10455_s12 + $0x18] sm:$0xff]  }
0x11f7   :  { %v6067_v12 = vadd.f32 %v7235_v10, %v6018_v13  ;;  %v8119_v10 = vld [vmem:[%s10455_s12 + $0x48] sm:$0xff]  }
0x1204   :  { %v7252_v23 = vpop.f32.mrf.mxu0 }
0x1206   :  { %v7253_v39 = vpop.f32.mrf.mxu0 }
0x1207   :  { %v7336_v42 = vpop.f32.mrf.mxu1  ;;  %v7254_v56 = vadd.f32 %v7253_v39, %v7252_v23 }
0x1208   :  { %v7255_v31 = vpop.f32.mrf.mxu0 }
0x1209   :  { %v7337_v21 = vpop.f32.mrf.mxu1  ;;  %v6105_v6 = vadd.f32 %v7254_v56, %v6056_v25  ;;  %v8117_v56 = vld [vmem:[%s10455_s12 + $0x50] sm:$0xff]  }
0x120a   :  { %v7256_v11 = vpop.f32.mrf.mxu0  ;;  %v7338_v17 = vadd.f32 %v7337_v21, %v7336_v42  ;;  %v8115_v42 = vld [vmem:[%s10455_s12 + $0x58] sm:$0xff]  }
0x120b   :  { %v7339_v18 = vpop.f32.mrf.mxu1  ;;  %v7257_v4 = vadd.f32 %v7256_v11, %v7255_v31  ;;  %v6154_v31 = vadd.f32 %v7282_v3, %v6105_v6  ;;  %7356 = vmatprep.subr.bf16.mxu0 %v8115_v42  ;;  %v8120_v3 = vld [vmem:[%s10455_s12 + $0x8] sm:$0xff]  }
0x120c   :  { %v7258_v58 = vpop.f32.mrf.mxu0  ;;  %7357 = vmatpush3.bf16.msra.mxu0 %v8116_v30 }
0x120d   :  { %v7340_v19 = vpop.f32.mrf.mxu1  ;;  %v6108_v59 = vadd.f32 %v7257_v4, %v6059_v54  ;;  %7358 = vmatprep.subr.bf16.mxu0 %v8117_v56 }
0x120e   :  { %v7259_v41 = vpop.f32.mrf.mxu0  ;;  %v7341_v53 = vadd.f32 %v7340_v19, %v7339_v18 }
0x120f   :  { %v7342_v55 = vpop.f32.mrf.mxu1  ;;  %v7260_v60 = vadd.f32 %v7259_v41, %v7258_v58  ;;  %v6157_v11 = vadd.f32 %v7285_v52, %v6108_v59 }
0x1210   :  { %v7261_v20 = vpop.f32.mrf.mxu0 }
0x1211   :  { %v7343_v7 = vpop.f32.mrf.mxu1  ;;  %v6113_v38 = vadd.f32 %v7260_v60, %v6064_v1 }
0x1212   :  { %v7262_v44 = vpop.f32.mrf.mxu0  ;;  %v7344_v45 = vadd.f32 %v7343_v7, %v7342_v55 }
0x1213   :  { %v7263_v23 = vadd.f32 %v7262_v44, %v7261_v20  ;;  %v7345_v58 = vpop.f32.mrf.mxu1  ;;  %v6162_v51 = vadd.f32 %v7288_v28, %v6113_v38 }
0x1215   :  { %v6116_v24 = vadd.f32 %v7263_v23, %v6067_v12  ;;  %v7346_v57 = vpop.f32.mrf.mxu1 }
0x1216   :  { %v7347_v40 = vadd.f32 %v7346_v57, %v7345_v58  ;;  %v8121_v58 = vld [vmem:[%s10455_s12 + $0x40] sm:$0xff]  }
0x1217   :  { %v6165_v16 = vadd.f32 %v7291_v2, %v6116_v24 }
0x1224   :  { %v7308_v63 = vpop.f32.mrf.mxu0 }
0x1226   :  { %v7309_v14 = vpop.f32.mrf.mxu0 }
0x1227   :  { %v7310_v36 = vadd.f32 %v7309_v14, %v7308_v63  ;;  %v8118_v63 = vld [vmem:[%s10455_s12 + $0x10] sm:$0xff]  }
0x1228   :  { %v7311_v9 = vpop.f32.mrf.mxu0  ;;  %7359 = vmatpush3.bf16.msra.mxu0 %v8118_v63 }
0x1229   :  { %v6203_v41 = vadd.f32 %v7310_v36, %v6154_v31  ;;  %7360 = vmatprep.subr.bf16.mxu0 %v8119_v10 }
0x122a   :  { %v7312_v35 = vpop.f32.mrf.mxu0 }
0x122b   :  { %v7313_v39 = vadd.f32 %v7312_v35, %v7311_v9  ;;  %v10330_v61 = vadd.f32 %v7338_v17, %v6203_v41  ;;  %v8122_v41 = vld [vmem:[%s10455_s12] sm:$0xff]  }
0x122c   :  { %v7314_v37 = vpop.f32.mrf.mxu0  ;;  %7361 = vmatpush3.bf16.msra.mxu0 %v8120_v3 }
0x122d   :  { %v6206_v22 = vadd.f32 %v7313_v39, %v6157_v11  ;;  %v6272_v18 = vrot.slane %v10330_v61, 1  ;;  %v6277_v19 = vrot.slane %v10330_v61, 2  ;;  %v6283_v50 = vrot.slane %v10330_v61, 3  ;;  %7362 = vmatprep.subr.bf16.mxu0 %v8121_v58 }
0x122e   :  { %v7315_v32 = vpop.f32.mrf.mxu0  ;;  %v6289_v36 = vrot.slane %v10330_v61, 4  ;;  %v6295_v28 = vrot.slane %v10330_v61, 5  ;;  %v6301_v17 = vrot.slane %v10330_v61, 6 }
0x122f   :  { %v7316_v46 = vadd.f32 %v7315_v32, %v7314_v37  ;;  %v10332_v29 = vadd.f32 %v7341_v53, %v6206_v22 }
0x1230   :  { %v7317_v26 = vpop.f32.mrf.mxu0  ;;  %7363 = vmatpush3.bf16.msra.mxu0 %v8122_v41 }
0x1231   :  { %v6211_v20 = vadd.f32 %v7316_v46, %v6162_v51  ;;  %v6318_v27 = vrot.slane %v10332_v29, 1  ;;  %v6323_v49 = vrot.slane %v10332_v29, 2  ;;  %v6329_v47 = vrot.slane %v10332_v29, 3 }
0x1232   :  { %v7318_v43 = vpop.f32.mrf.mxu0  ;;  %v6335_v4 = vrot.slane %v10332_v29, 4  ;;  %v6341_v52 = vrot.slane %v10332_v29, 5  ;;  %v6347_v12 = vrot.slane %v10332_v29, 6 }
0x1233   :  { %v10334_v8 = vadd.f32 %v7344_v45, %v6211_v20  ;;  %v7319_v5 = vadd.f32 %v7318_v43, %v7317_v26  ;;  %v6353_v45 = vrot.slane %v10332_v29, 7  ;;  %v6307_v43 = vrot.slane %v10330_v61, 7 }
0x1235   :  { %v6214_v21 = vadd.f32 %v7319_v5, %v6165_v16  ;;  %v6278_v44 = vrot.slane %v10334_v8, 1  ;;  %v6273_v33 = vsel %vm6269_vm15, %v10334_v8, %v6272_v18  ;;  %v6284_v34 = vrot.slane %v10334_v8, 2 }
0x1236   :  { %v6290_v60 = vrot.slane %v10334_v8, 3  ;;  %v6268_v6 = vrot.slane %v10334_v8, 7  ;;  %v6296_v35 = vrot.slane %v10334_v8, 4  ;;  %v6302_v22 = vrot.slane %v10334_v8, 5 }
0x1237   :  { %v10345_v62 = vadd.f32 %v7347_v40, %v6214_v21  ;;  %v6279_v54 = vsel %vm6269_vm15, %v6278_v44, %v6277_v19  ;;  %v6285_v38 = vsel %vm6269_vm15, %v6284_v34, %v6283_v50  ;;  %v6308_v53 = vrot.slane %v10334_v8, 6 }
0x1238   :  { %v6270_v11 = vsel %vm6269_vm15, %v6268_v6, %v10330_v61  ;;  %v6291_v32 = vsel %vm6269_vm15, %v6290_v60, %v6289_v36  ;;  %v6297_v26 = vsel %vm6269_vm15, %v6296_v35, %v6295_v28  ;;  %v6303_v57 = vsel %vm6269_vm15, %v6302_v22, %v6301_v17 }
0x1239   :  { %v6319_v25 = vsel %vm6269_vm15, %v10345_v62, %v6318_v27  ;;  %v6324_v55 = vrot.slane %v10345_v62, 1  ;;  %v6330_v14 = vrot.slane %v10345_v62, 2  ;;  %v6336_v48 = vrot.slane %v10345_v62, 3 }
0x123a   :  { %v7413_v15 = vpack.i.bf16 %v6273_v33, %v6319_v25  ;;  %v6342_v59 = vrot.slane %v10345_v62, 4  ;;  %v6315_v1 = vrot.slane %v10345_v62, 7  ;;  %v6348_v39 = vrot.slane %v10345_v62, 5 }
0x123b   :  { %v6325_v9 = vsel %vm6269_vm15, %v6324_v55, %v6323_v49  ;;  %v6331_v13 = vsel %vm6269_vm15, %v6330_v14, %v6329_v47  ;;  %v6337_v23 = vsel %vm6269_vm15, %v6336_v48, %v6335_v4  ;;  %v6354_v51 = vrot.slane %v10345_v62, 6 }
0x123c   :  { %7414 = vrot.lane.b32.xlu0 %v7413_v15, %s8252_s28  ;;  %v7418_v7 = vpack.i.bf16 %v6279_v54, %v6325_v9  ;;  %v6316_v31 = vsel %vm6269_vm15, %v6315_v1, %v10332_v29  ;;  %v7423_v37 = vpack.i.bf16 %v6285_v38, %v6331_v13  ;;  %v6343_v24 = vsel %vm6269_vm15, %v6342_v59, %v6341_v52 }
0x123d   :  { %v7428_v46 = vpack.i.bf16 %v6291_v32, %v6337_v23  ;;  %v6349_v2 = vsel %vm6269_vm15, %v6348_v39, %v6347_v12  ;;  %v7433_v20 = vpack.i.bf16 %v6297_v26, %v6343_v24  ;;  %v6355_v16 = vsel %vm6269_vm15, %v6354_v51, %v6353_v45  ;;  %v8123_v23 = vld [vmem:[%s10457_s14 + $0x8] sm:$0xff]   ;;  %v8124_v39 = vld [vmem:[%s10457_s14] sm:$0xff]   ;;  %v7141_v24 = vld [vmem:[#allocation12] ss:$0 sm:$0xff] }
0x123e   :  { %7419 = vrot.lane.b32.xlu1 %v7418_v7, %s8253_s0  ;;  %v7438_v5 = vpack.i.bf16 %v6303_v57, %v6349_v2  ;;  %v6309_v42 = vsel %vm6269_vm15, %v6308_v53, %v6307_v43  ;;  %7388 = vmatpush3.bf16.msra.mxu1 %v8123_v23 }
0x123f   :  { %v7443_v8 = vpack.i.bf16 %v6309_v42, %v6355_v16  ;;  %7389 = vmatprep.subr.bf16.mxu1 %v8250_v0 }
0x1240   :  { %7424 = vrot.lane.b32.xlu0 %v7423_v37, %s8251_s7  ;;  %v7124_v37 = vld [vmem:[#allocation11] ss:$0 sm:$0xff] }
0x1242   :  { %7429 = vrot.lane.b32.xlu1 %v7428_v46, %s8254_s25  ;;  %7390 = vmatpush3.bf16.msra.mxu1 %v8124_v39 }
0x1244   :  { %7434 = vrot.lane.b32.xlu0 %v7433_v20, %s8255_s17  ;;  %s8261_s17 = smov [#allocation14]  }
0x1246   :  { %7439 = vrot.lane.b32.xlu1 %v7438_v5, %s8257_s1  ;;  %s6625_s1 = sshll.u32 %s8261_s17, 4  ;;  %s6626_s1 = int_to_ptr.vmem [resolvable:$true] %s6625_s1 }
0x1247   :  { %s8216_s14 = scalar_lea.vmem %s6626_s1, 32  ;;  %p8221_p7 = scmp.lt.s32.totalorder %s6626_s1, %s6626_s1 }
0x1248   :  { %7444 = vrot.lane.b32.xlu0 %v7443_v8, %s8259_s2  ;;  %p8217_p6 = scmp.ne.s32.totalorder %s6626_s1, %s8216_s14  ;;  %p8222_p8 = scmp.lt.s32.totalorder %s8216_s14, %s8216_s14 }
0x124a   :  { %p8223_p9 = por %p8222_p8, %p8221_p7 }
0x124c   :  { %p8224_p10 = pnand %p8223_p9, %p8217_p6 }
0x12ae   :  { %v7415_v29 = vpop.permute.xlu0 %7414 }
0x12af   :  { %v7417_v30 = vunpack.i.h.bf16 %v7415_v29  ;;  %v7416_v40 = vunpack.i.l.bf16 %v7415_v29 }
0x12b0   :  { %v7420_v21 = vpop.permute.xlu1 %7419 }
0x12b1   :  { %v6359_v18 = vsel %vm161_vm1, %v6270_v11, %v7417_v30  ;;  %v6366_v61 = vsel %vm161_vm1, %v6316_v31, %v7416_v40  ;;  %v7422_v19 = vunpack.i.h.bf16 %v7420_v21  ;;  %v7421_v44 = vunpack.i.l.bf16 %v7420_v21 }
0x12b2   :  { %v7425_v62 = vpop.permute.xlu0 %7424  ;;  %vm10512_vm1 = vcmask 785408  }
0x12b3   :  { %v6360_v27 = vsel %vm233_vm8, %v6359_v18, %v7422_v19  ;;  %v6367_v49 = vsel %vm233_vm8, %v6366_v61, %v7421_v44  ;;  %v7427_v50 = vunpack.i.h.bf16 %v7425_v62  ;;  %v7426_v56 = vunpack.i.l.bf16 %v7425_v62 }
0x12b4   :  { %v7430_v63 = vpop.permute.xlu1 %7429 }
0x12b5   :  { %v6361_v33 = vsel %vm435_vm9, %v6360_v27, %v7427_v50  ;;  %v6368_v34 = vsel %vm435_vm9, %v6367_v49, %v7426_v56  ;;  %v7432_v47 = vunpack.i.h.bf16 %v7430_v63  ;;  %v7431_v4 = vunpack.i.l.bf16 %v7430_v63  ;;  %vm10513_vm9 = vmmov %vm10512_vm1 }
0x12b6   :  { %v7435_v25 = vpop.permute.xlu0 %7434 }
0x12b7   :  { %v6362_v55 = vsel %vm440_vm10, %v6361_v33, %v7432_v47  ;;  %v6369_v14 = vsel %vm440_vm10, %v6368_v34, %v7431_v4  ;;  %v7437_v48 = vunpack.i.h.bf16 %v7435_v25  ;;  %v7436_v15 = vunpack.i.l.bf16 %v7435_v25 }
0x12b8   :  { %v7440_v54 = vpop.permute.xlu1 %7439  ;;  %vm8260_vm10 = vmmov 0  }
0x12b9   :  { %v6363_v60 = vsel %vm445_vm11, %v6362_v55, %v7437_v48  ;;  %v6370_v6 = vsel %vm445_vm11, %v6369_v14, %v7436_v15  ;;  %v7442_v9 = vunpack.i.h.bf16 %v7440_v54  ;;  %v7441_v13 = vunpack.i.l.bf16 %v7440_v54  ;;  %7391 = vmatprep.mubr.msk.bf16.mxu1 %vm8260_vm10, %v8250_v0 }
0x12ba   :  { %v7445_v59 = vpop.permute.xlu0 %7444  ;;  %vm6617_vm11 = vcmask 58368  }
0x12bb   :  { %v6364_v1 = vsel %vm10512_vm1, %v6363_v60, %v7442_v9  ;;  %v6371_v10 = vsel %vm10513_vm9, %v6370_v6, %v7441_v13  ;;  %v7447_v3 = vunpack.i.h.bf16 %v7445_v59  ;;  %v7446_v7 = vunpack.i.l.bf16 %v7445_v59 }
0x12bd   :  { %v6365_v36 = vsel %vm10514_vm2, %v6364_v1, %v7447_v3  ;;  %v6372_v35 = vsel %vm10515_vm3, %v6371_v10, %v7446_v7 }
0x12be   :  { %v6373_v52 = vpack.c.bf16 %v6365_v36, %v6365_v36  ;;  %v6374_v38 = vpack.c.bf16 %v6372_v35, %v6372_v35 }
0x12c0   :  { %6542 = vmatprep.mubr.bf16.mxu0 %v6374_v38 }
0x12c1   :  { %6543 = vmatmul.mubr.bf16.vlgmr.msra.gmra.mxu0 %v6373_v52 }
0x1381   :  { %v7364_v31 = vpop.f32.mrf.mxu0 }
0x1383   :  { %v7365_v28 = vpop.f32.mrf.mxu0 }
0x1384   :  { %v7366_v12 = vadd.f32 %v7365_v28, %v7364_v31 }
0x1385   :  { %v7367_v11 = vpop.f32.mrf.mxu0 }
0x1386   :  { %v6545_v58 = vadd.f32 %v7366_v12, %v7124_v37 }
0x1387   :  { %v7368_v41 = vpop.f32.mrf.mxu0 }
0x1388   :  { %v6550_v32 = vpack.c.bf16 %v6545_v58, %v6545_v58 }
0x138a   :  { %7392 = vmatmul.mubr.msk.bf16.vlgmr.msra.gmra.mxu1 %vm233_vm8, %v6550_v32 }
0x144a   :  { %v6611_v22 = vpop.f32.mrf.mxu1 }
0x144b   :  { %v6612_v51 = vadd.f32 %v7141_v24, %v6611_v22 }
0x144c   :  { %v7393_v46 = vpop.f32.mrf.mxu1 }
0x144d   :  { %6618 = vst.msk [vmem:[#allocation14] sm:$0x3] %vm6617_vm11, %v6612_v51 }
0x144e   :  { %v6614_v0 = vpop.f32.mrf.mxu1 }
0x144f   :  { %8227 = shalt.err (!%p8224_p10)
}
0x1450   :  { %6628 = dma.vmem_to_hbm [thread:$0]  %s6626_s1, 32, %s10459_s16, [#allocation8]   ;;  %v7394_v17 = vpop.f32.mrf.mxu1 }
0x1451   :  { %8242 = dma.done.wait [#allocation8], 32  }
0x1452   :  { %8243 = vsyncadd [#allocation8], 4294967264 }
0x1453   :  { %6632 = vsyncpa [#allocation7], 1 }
0x1454   :  { %6633 = vsyncpa [#allocation10], 1 }
0x1455   :  { %6634 = vsyncpa [#allocation13], 1 }
0x1456   :  { %6635 = vsyncpa [#allocation8], 1 }

</bundles_post_ra>
